<compile_context>
chip_gen: v7x
topology: tpu7x:2x2x1
jax: 0.10.0
libtpu: 0.0.40
codegen_flags: <defaults>
</compile_context>

<pallas_src>
import functools

import jax
import jax.numpy as jnp
from jax.experimental import pallas as pl
from jax.experimental.pallas import tpu as pltpu


_TAPS = tuple((dy, dx) for dy in range(3) for dx in range(3))


def _down_block_kernel(xpad_ref, xs_ref, w1_ref, w2_ref, wd_ref, aff_ref, sel_ref,
                       out_ref, pad_ref, *, H, W, Cp):
    """Fused DownBlock forward for one batch element.

    xpad_ref: (1, H+2, W+2, Cp)  zero-padded, channel-padded input (conv1 'same' halo)
    xs_ref:   (1, Ho*Wo, Cp)     stride-2 subsampled input (1x1 downsample taps), flattened
    w1_ref:   (9, Cp, Cp)        conv1 weights, tap-major, channel-padded
    w2_ref:   (9, Cp, Cp)        conv2 weights
    wd_ref:   (Cp, Cp)           downsample 1x1 conv weights
    aff_ref:  (8, Cp)            rows: [s1, b1, s2, b2, sd, bd, 0, 0] folded-BN affine terms
    sel_ref:  (Ho*Wo, H*W)       0/1 selection matrix for the stride-2 pool subsample
    out_ref:  (1, Ho*Wo, Cp)
    pad_ref:  (H+2, W+2, Cp)     VMEM scratch, reused for conv2-pad and pool-pad slabs
    """
    HW = H * W

    def conv3x3(load_patch, w_ref):
        # 9 large tap matmuls: (H*W, Cp) x (Cp, Cp), accumulated in f32 on the MXU.
        acc = jnp.zeros((HW, Cp), jnp.float32)
        for t, (dy, dx) in enumerate(_TAPS):
            acc = acc + jnp.dot(load_patch(dy, dx), w_ref[t],
                                preferred_element_type=jnp.float32)
        return acc

    # ---- conv1 (3x3, pad=1, no bias) + folded BN1 + ReLU --------------------------------
    acc = conv3x3(lambda dy, dx: xpad_ref[0, dy:dy + H, dx:dx + W, :].reshape(HW, Cp),
                  w1_ref)
    a1 = jnp.maximum(acc * aff_ref[0:1, :] + aff_ref[1:2, :], 0.0)

    # Zero the padded slab ONCE: the border stays zero for both conv2's 'same' padding
    # and the maxpool's padding (interior is overwritten below each time).
    pad_ref[...] = jnp.zeros((H + 2, W + 2, Cp), jnp.float32)
    pad_ref[1:H + 1, 1:W + 1, :] = a1.reshape(H, W, Cp)

    # ---- conv2 (3x3, pad=1, no bias) + folded BN2 + ReLU --------------------------------
    acc = conv3x3(lambda dy, dx: pad_ref[dy:dy + H, dx:dx + W, :].reshape(HW, Cp),
                  w2_ref)
    a2 = jnp.maximum(acc * aff_ref[2:3, :] + aff_ref[3:4, :], 0.0)

    # ---- MaxPool2d(kernel=3, stride=2, padding=1) ---------------------------------------
    # Zero padding is equivalent to -inf padding here because a2 >= 0 (post-ReLU).
    pad_ref[1:H + 1, 1:W + 1, :] = a2.reshape(H, W, Cp)            # border already zero
    smax = pad_ref[0:H, 0:W, :]                                    # stride-1 3x3 max
    for (dy, dx) in _TAPS[1:]:
        smax = jnp.maximum(smax, pad_ref[dy:dy + H, dx:dx + W, :])
    # stride-2 spatial subsample as a 0/1 selection matmul (keeps everything lane-dense,
    # avoids strided vector slices inside the kernel).
    pooled = jnp.dot(sel_ref[...], smax.reshape(HW, Cp),
                     preferred_element_type=jnp.float32)           # (Ho*Wo, Cp)

    # ---- downsample identity: 1x1 stride-2 conv (+bias) + folded BN ---------------------
    ident = jnp.dot(xs_ref[0], wd_ref[...], preferred_element_type=jnp.float32)
    ident = ident * aff_ref[4:5, :] + aff_ref[5:6, :]

    out_ref[0] = (pooled + ident).astype(out_ref.dtype)


def down_block_forward(params, x_nchw):
    """Pallas implementation of DownBlock.forward (NCHW in / NCHW out).

    TODO(synk): BatchNorm2d is applied in eval mode (running stats folded); train-mode batch
    statistics and train-mode Dropout2d are not reproduced (module default dropout=False).
    Only the n_input != n_output path is implemented: with n_input == n_output the original
    module adds tensors of mismatched spatial size and is not runnable anyway.
    """
    eps = 1e-5
    x = jnp.transpose(x_nchw, (0, 2, 3, 1)).astype(jnp.float32)        # NHWC
    N, H, W, Cin = x.shape
    Cout = params["w1"].shape[0]
    Ho, Wo = (H - 1) // 2 + 1, (W - 1) // 2 + 1
    Cp = 128                                                           # lane-dense channel pad

    # ---- layout glue (plain XLA): channel pad, spatial halo, stride-2 taps ---------------
    x_c = jnp.pad(x, ((0, 0), (0, 0), (0, 0), (0, Cp - Cin)))          # (N, H, W, Cp)
    x_pad = jnp.pad(x_c, ((0, 0), (1, 1), (1, 1), (0, 0)))             # (N, H+2, W+2, Cp)
    x_s = x_c[:, ::2, ::2, :].reshape(N, Ho * Wo, Cp)                  # 1x1/stride-2 taps

    def conv_w(w):                                                     # OIHW -> (9, Cp, Cp)
        wt = jnp.transpose(w, (2, 3, 1, 0))                            # (3,3,Ci,Co)
        wt = jnp.pad(wt, ((0, 0), (0, 0),
                          (0, Cp - wt.shape[2]), (0, Cp - wt.shape[3])))
        return wt.reshape(9, Cp, Cp)

    w1 = conv_w(params["w1"])
    w2 = conv_w(params["w2"])
    wd = jnp.pad(params["wd"][:, :, 0, 0].T, ((0, Cp - Cin), (0, Cp - Cout)))   # (Cp, Cp)

    def fold_bn(g, b, m, v, conv_bias=None):                           # eval-mode BN fold
        s = g / jnp.sqrt(v + eps)
        sh = b - m * s
        if conv_bias is not None:
            sh = sh + conv_bias * s
        return jnp.pad(s, (0, Cp - s.shape[0])), jnp.pad(sh, (0, Cp - sh.shape[0]))

    s1, b1 = fold_bn(params["g1"], params["b1"], params["m1"], params["v1"])
    s2, b2 = fold_bn(params["g2"], params["b2"], params["m2"], params["v2"])
    sd, bd = fold_bn(params["gd"], params["bd"], params["md"], params["vd"], params["wd_b"])
    affine = (jnp.zeros((8, Cp), jnp.float32)
              .at[0].set(s1).at[1].set(b1)
              .at[2].set(s2).at[3].set(b2)
              .at[4].set(sd).at[5].set(bd))

    # 0/1 selection matrix: pooled[i*Wo+j] = smax[(2i)*W + 2j]
    rows = jnp.arange(Ho * Wo)
    cols = (rows // Wo) * (2 * W) + (rows % Wo) * 2
    sel = jnp.zeros((Ho * Wo, H * W), jnp.float32).at[rows, cols].set(1.0)

    kern = functools.partial(_down_block_kernel, H=H, W=W, Cp=Cp)
    out = pl.pallas_call(
        kern,
        out_shape=jax.ShapeDtypeStruct((N, Ho * Wo, Cp), jnp.float32),
        grid_spec=pltpu.PrefetchScalarGridSpec(
            num_scalar_prefetch=0,
            grid=(N,),
            in_specs=[
                pl.BlockSpec((1, H + 2, W + 2, Cp), lambda n: (n, 0, 0, 0)),   # x_pad
                pl.BlockSpec((1, Ho * Wo, Cp), lambda n: (n, 0, 0)),           # x_s
                pl.BlockSpec((9, Cp, Cp), lambda n: (0, 0, 0)),                # w1
                pl.BlockSpec((9, Cp, Cp), lambda n: (0, 0, 0)),                # w2
                pl.BlockSpec((Cp, Cp), lambda n: (0, 0)),                      # wd
                pl.BlockSpec((8, Cp), lambda n: (0, 0)),                       # affine
                pl.BlockSpec((Ho * Wo, H * W), lambda n: (0, 0)),              # sel
            ],
            out_specs=pl.BlockSpec((1, Ho * Wo, Cp), lambda n: (n, 0, 0)),
            scratch_shapes=[pltpu.VMEM((H + 2, W + 2, Cp), jnp.float32)],
        ),
        compiler_params=pltpu.CompilerParams(dimension_semantics=("parallel",)),
    )(x_pad, x_s, w1, w2, wd, affine, sel)

    out = out.reshape(N, Ho, Wo, Cp)[..., :Cout]                       # drop channel padding
    return jnp.transpose(out, (0, 3, 1, 2))                            # back to NCHW


def _ref_forward(params, x):
    """Pure-JAX (lax.conv / reduce_window) reference, NCHW, eval-mode BN."""
    dn = ("NCHW", "OIHW", "NCHW")
    eps = 1e-5

    def conv_bn_relu(h, w, g, b, m, v):
        h = jax.lax.conv_general_dilated(h, w, (1, 1), ((1, 1), (1, 1)),
                                         dimension_numbers=dn)
        s = g / jnp.sqrt(v + eps)
        return jnp.maximum(h * s[None, :, None, None] + (b - m * s)[None, :, None, None], 0.0)

    h = conv_bn_relu(x, params["w1"], params["g1"], params["b1"], params["m1"], params["v1"])
    h = conv_bn_relu(h, params["w2"], params["g2"], params["b2"], params["m2"], params["v2"])
    pooled = jax.lax.reduce_window(h, -jnp.inf, jax.lax.max,
                                   (1, 1, 3, 3), (1, 1, 2, 2),
                                   ((0, 0), (0, 0), (1, 1), (1, 1)))

    ident = jax.lax.conv_general_dilated(x, params["wd"], (2, 2), ((0, 0), (0, 0)),
                                         dimension_numbers=dn)
    ident = ident + params["wd_b"][None, :, None, None]
    sd = params["gd"] / jnp.sqrt(params["vd"] + eps)
    ident = ident * sd[None, :, None, None] + \
        (params["bd"] - params["md"] * sd)[None, :, None, None]
    return pooled + ident


if __name__ == "__main__":
    n_input, n_output = 8, 16
    N, H, W = 2, 16, 16

    keys = jax.random.split(jax.random.PRNGKey(0), 20)
    ki = iter(range(20))

    def nrm(shape, scale=0.1):
        return scale * jax.random.normal(keys[next(ki)], shape, jnp.float32)

    def var(shape):
        return 0.9 + jax.nn.softplus(jax.random.normal(keys[next(ki)], shape, jnp.float32))

    params = {
        # ConvBlock conv1 (OIHW, bias=False) + BN1
        "w1": nrm((n_output, n_input, 3, 3)),
        "g1": 1.0 + nrm((n_output,)), "b1": nrm((n_output,)),
        "m1": nrm((n_output,)), "v1": var((n_output,)),
        # ConvBlock conv2 (OIHW, bias=False) + BN2
        "w2": nrm((n_output, n_output, 3, 3)),
        "g2": 1.0 + nrm((n_output,)), "b2": nrm((n_output,)),
        "m2": nrm((n_output,)), "v2": var((n_output,)),
        # downsample: Conv2d(n_input, n_output, 1, stride=2) (bias=True) + BN
        "wd": nrm((n_output, n_input, 1, 1)), "wd_b": nrm((n_output,)),
        "gd": 1.0 + nrm((n_output,)), "bd": nrm((n_output,)),
        "md": nrm((n_output,)), "vd": var((n_output,)),
    }
    x = jax.random.normal(keys[next(ki)], (N, n_input, H, W), jnp.float32)

    out = jax.block_until_ready(down_block_forward(params, x))
    ref = jax.block_until_ready(_ref_forward(params, x))

    assert out.shape == (N, n_output, H // 2, W // 2), out.shape
    max_err = float(jnp.max(jnp.abs(out - ref)))
    assert bool(jnp.allclose(out, ref, rtol=1e-4, atol=1e-4)), max_err
    print("KERNEL_OK")
</pallas_src>

<mosaic_0001>
module attributes {stable_mosaic.version = 11 : i64} {
  func.func @_down_block_kernel(%arg0: i32, %arg1: memref<1x18x18x128xf32, #tpu.memory_space<vmem>>, %arg2: memref<1x64x128xf32, #tpu.memory_space<vmem>>, %arg3: memref<9x128x128xf32, #tpu.memory_space<vmem>>, %arg4: memref<9x128x128xf32, #tpu.memory_space<vmem>>, %arg5: memref<128x128xf32, #tpu.memory_space<vmem>>, %arg6: memref<8x128xf32, #tpu.memory_space<vmem>>, %arg7: memref<64x256xf32, #tpu.memory_space<vmem>>, %arg8: memref<1x64x128xf32, #tpu.memory_space<vmem>>, %arg9: memref<18x18x128xf32, #tpu.memory_space<vmem>>) attributes {dimension_semantics = [#tpu.dimension_semantics<parallel>], iteration_bounds = array<i64: 2>, scalar_prefetch = 0 : i64, scratch_operands = 1 : i64, tpu.core_type = #tpu.core_type<tc>, window_params = [{transform_indices = @transform_0, window_bounds = array<i64: 1, 18, 18, 128>}, {transform_indices = @transform_1, window_bounds = array<i64: 1, 64, 128>}, {pipeline_mode = #tpu.pipeline_mode<synchronous>, transform_indices = @transform_2, window_bounds = array<i64: 9, 128, 128>}, {pipeline_mode = #tpu.pipeline_mode<synchronous>, transform_indices = @transform_3, window_bounds = array<i64: 9, 128, 128>}, {pipeline_mode = #tpu.pipeline_mode<synchronous>, transform_indices = @transform_4, window_bounds = array<i64: 128, 128>}, {pipeline_mode = #tpu.pipeline_mode<synchronous>, transform_indices = @transform_5, window_bounds = array<i64: 8, 128>}, {pipeline_mode = #tpu.pipeline_mode<synchronous>, transform_indices = @transform_6, window_bounds = array<i64: 64, 256>}, {transform_indices = @transform_7, window_bounds = array<i64: 1, 64, 128>}]} {
    %cst = arith.constant 0.000000e+00 : f32
    %0 = vector.broadcast %cst : f32 to vector<256x128xf32>
    %c0 = arith.constant 0 : index
    %c0_0 = arith.constant 0 : index
    %c0_1 = arith.constant 0 : index
    %c0_2 = arith.constant 0 : index
    %1 = vector.load %arg1[%c0, %c0_0, %c0_1, %c0_2] : memref<1x18x18x128xf32, #tpu.memory_space<vmem>>, vector<1x16x16x128xf32>
    %2 = vector.shape_cast %1 : vector<1x16x16x128xf32> to vector<16x16x128xf32>
    %3 = vector.shape_cast %2 : vector<16x16x128xf32> to vector<256x128xf32>
    %c0_3 = arith.constant 0 : index
    %c0_4 = arith.constant 0 : index
    %c0_5 = arith.constant 0 : index
    %4 = vector.load %arg3[%c0_3, %c0_4, %c0_5] : memref<9x128x128xf32, #tpu.memory_space<vmem>>, vector<1x128x128xf32>
    %5 = vector.shape_cast %4 : vector<1x128x128xf32> to vector<128x128xf32>
    %cst_6 = arith.constant dense<0.000000e+00> : vector<256x128xf32>
    %6 = tpu.matmul %3, %5, %cst_6 {dimension_numbers = #tpu.dot_dimension_numbers<[1], [0], [0], [1], [0, 0, 1, 1], [], []>} : vector<256x128xf32>, vector<128x128xf32>, vector<256x128xf32> -> vector<256x128xf32>
    %7 = arith.addf %0, %6 : vector<256x128xf32>
    %c0_7 = arith.constant 0 : index
    %c0_8 = arith.constant 0 : index
    %c1 = arith.constant 1 : index
    %c0_9 = arith.constant 0 : index
    %8 = vector.load %arg1[%c0_7, %c0_8, %c1, %c0_9] : memref<1x18x18x128xf32, #tpu.memory_space<vmem>>, vector<1x16x16x128xf32>
    %9 = vector.shape_cast %8 : vector<1x16x16x128xf32> to vector<16x16x128xf32>
    %10 = vector.shape_cast %9 : vector<16x16x128xf32> to vector<256x128xf32>
    %c1_10 = arith.constant 1 : index
    %c0_11 = arith.constant 0 : index
    %c0_12 = arith.constant 0 : index
    %11 = vector.load %arg3[%c1_10, %c0_11, %c0_12] : memref<9x128x128xf32, #tpu.memory_space<vmem>>, vector<1x128x128xf32>
    %12 = vector.shape_cast %11 : vector<1x128x128xf32> to vector<128x128xf32>
    %cst_13 = arith.constant dense<0.000000e+00> : vector<256x128xf32>
    %13 = tpu.matmul %10, %12, %cst_13 {dimension_numbers = #tpu.dot_dimension_numbers<[1], [0], [0], [1], [0, 0, 1, 1], [], []>} : vector<256x128xf32>, vector<128x128xf32>, vector<256x128xf32> -> vector<256x128xf32>
    %14 = arith.addf %7, %13 : vector<256x128xf32>
    %c0_14 = arith.constant 0 : index
    %c0_15 = arith.constant 0 : index
    %c2 = arith.constant 2 : index
    %c0_16 = arith.constant 0 : index
    %15 = vector.load %arg1[%c0_14, %c0_15, %c2, %c0_16] : memref<1x18x18x128xf32, #tpu.memory_space<vmem>>, vector<1x16x16x128xf32>
    %16 = vector.shape_cast %15 : vector<1x16x16x128xf32> to vector<16x16x128xf32>
    %17 = vector.shape_cast %16 : vector<16x16x128xf32> to vector<256x128xf32>
    %c2_17 = arith.constant 2 : index
    %c0_18 = arith.constant 0 : index
    %c0_19 = arith.constant 0 : index
    %18 = vector.load %arg3[%c2_17, %c0_18, %c0_19] : memref<9x128x128xf32, #tpu.memory_space<vmem>>, vector<1x128x128xf32>
    %19 = vector.shape_cast %18 : vector<1x128x128xf32> to vector<128x128xf32>
    %cst_20 = arith.constant dense<0.000000e+00> : vector<256x128xf32>
    %20 = tpu.matmul %17, %19, %cst_20 {dimension_numbers = #tpu.dot_dimension_numbers<[1], [0], [0], [1], [0, 0, 1, 1], [], []>} : vector<256x128xf32>, vector<128x128xf32>, vector<256x128xf32> -> vector<256x128xf32>
    %21 = arith.addf %14, %20 : vector<256x128xf32>
    %c0_21 = arith.constant 0 : index
    %c1_22 = arith.constant 1 : index
    %c0_23 = arith.constant 0 : index
    %c0_24 = arith.constant 0 : index
    %22 = vector.load %arg1[%c0_21, %c1_22, %c0_23, %c0_24] : memref<1x18x18x128xf32, #tpu.memory_space<vmem>>, vector<1x16x16x128xf32>
    %23 = vector.shape_cast %22 : vector<1x16x16x128xf32> to vector<16x16x128xf32>
    %24 = vector.shape_cast %23 : vector<16x16x128xf32> to vector<256x128xf32>
    %c3 = arith.constant 3 : index
    %c0_25 = arith.constant 0 : index
    %c0_26 = arith.constant 0 : index
    %25 = vector.load %arg3[%c3, %c0_25, %c0_26] : memref<9x128x128xf32, #tpu.memory_space<vmem>>, vector<1x128x128xf32>
    %26 = vector.shape_cast %25 : vector<1x128x128xf32> to vector<128x128xf32>
    %cst_27 = arith.constant dense<0.000000e+00> : vector<256x128xf32>
    %27 = tpu.matmul %24, %26, %cst_27 {dimension_numbers = #tpu.dot_dimension_numbers<[1], [0], [0], [1], [0, 0, 1, 1], [], []>} : vector<256x128xf32>, vector<128x128xf32>, vector<256x128xf32> -> vector<256x128xf32>
    %28 = arith.addf %21, %27 : vector<256x128xf32>
    %c0_28 = arith.constant 0 : index
    %c1_29 = arith.constant 1 : index
    %c1_30 = arith.constant 1 : index
    %c0_31 = arith.constant 0 : index
    %29 = vector.load %arg1[%c0_28, %c1_29, %c1_30, %c0_31] : memref<1x18x18x128xf32, #tpu.memory_space<vmem>>, vector<1x16x16x128xf32>
    %30 = vector.shape_cast %29 : vector<1x16x16x128xf32> to vector<16x16x128xf32>
    %31 = vector.shape_cast %30 : vector<16x16x128xf32> to vector<256x128xf32>
    %c4 = arith.constant 4 : index
    %c0_32 = arith.constant 0 : index
    %c0_33 = arith.constant 0 : index
    %32 = vector.load %arg3[%c4, %c0_32, %c0_33] : memref<9x128x128xf32, #tpu.memory_space<vmem>>, vector<1x128x128xf32>
    %33 = vector.shape_cast %32 : vector<1x128x128xf32> to vector<128x128xf32>
    %cst_34 = arith.constant dense<0.000000e+00> : vector<256x128xf32>
    %34 = tpu.matmul %31, %33, %cst_34 {dimension_numbers = #tpu.dot_dimension_numbers<[1], [0], [0], [1], [0, 0, 1, 1], [], []>} : vector<256x128xf32>, vector<128x128xf32>, vector<256x128xf32> -> vector<256x128xf32>
    %35 = arith.addf %28, %34 : vector<256x128xf32>
    %c0_35 = arith.constant 0 : index
    %c1_36 = arith.constant 1 : index
    %c2_37 = arith.constant 2 : index
    %c0_38 = arith.constant 0 : index
    %36 = vector.load %arg1[%c0_35, %c1_36, %c2_37, %c0_38] : memref<1x18x18x128xf32, #tpu.memory_space<vmem>>, vector<1x16x16x128xf32>
    %37 = vector.shape_cast %36 : vector<1x16x16x128xf32> to vector<16x16x128xf32>
    %38 = vector.shape_cast %37 : vector<16x16x128xf32> to vector<256x128xf32>
    %c5 = arith.constant 5 : index
    %c0_39 = arith.constant 0 : index
    %c0_40 = arith.constant 0 : index
    %39 = vector.load %arg3[%c5, %c0_39, %c0_40] : memref<9x128x128xf32, #tpu.memory_space<vmem>>, vector<1x128x128xf32>
    %40 = vector.shape_cast %39 : vector<1x128x128xf32> to vector<128x128xf32>
    %cst_41 = arith.constant dense<0.000000e+00> : vector<256x128xf32>
    %41 = tpu.matmul %38, %40, %cst_41 {dimension_numbers = #tpu.dot_dimension_numbers<[1], [0], [0], [1], [0, 0, 1, 1], [], []>} : vector<256x128xf32>, vector<128x128xf32>, vector<256x128xf32> -> vector<256x128xf32>
    %42 = arith.addf %35, %41 : vector<256x128xf32>
    %c0_42 = arith.constant 0 : index
    %c2_43 = arith.constant 2 : index
    %c0_44 = arith.constant 0 : index
    %c0_45 = arith.constant 0 : index
    %43 = vector.load %arg1[%c0_42, %c2_43, %c0_44, %c0_45] : memref<1x18x18x128xf32, #tpu.memory_space<vmem>>, vector<1x16x16x128xf32>
    %44 = vector.shape_cast %43 : vector<1x16x16x128xf32> to vector<16x16x128xf32>
    %45 = vector.shape_cast %44 : vector<16x16x128xf32> to vector<256x128xf32>
    %c6 = arith.constant 6 : index
    %c0_46 = arith.constant 0 : index
    %c0_47 = arith.constant 0 : index
    %46 = vector.load %arg3[%c6, %c0_46, %c0_47] : memref<9x128x128xf32, #tpu.memory_space<vmem>>, vector<1x128x128xf32>
    %47 = vector.shape_cast %46 : vector<1x128x128xf32> to vector<128x128xf32>
    %cst_48 = arith.constant dense<0.000000e+00> : vector<256x128xf32>
    %48 = tpu.matmul %45, %47, %cst_48 {dimension_numbers = #tpu.dot_dimension_numbers<[1], [0], [0], [1], [0, 0, 1, 1], [], []>} : vector<256x128xf32>, vector<128x128xf32>, vector<256x128xf32> -> vector<256x128xf32>
    %49 = arith.addf %42, %48 : vector<256x128xf32>
    %c0_49 = arith.constant 0 : index
    %c2_50 = arith.constant 2 : index
    %c1_51 = arith.constant 1 : index
    %c0_52 = arith.constant 0 : index
    %50 = vector.load %arg1[%c0_49, %c2_50, %c1_51, %c0_52] : memref<1x18x18x128xf32, #tpu.memory_space<vmem>>, vector<1x16x16x128xf32>
    %51 = vector.shape_cast %50 : vector<1x16x16x128xf32> to vector<16x16x128xf32>
    %52 = vector.shape_cast %51 : vector<16x16x128xf32> to vector<256x128xf32>
    %c7 = arith.constant 7 : index
    %c0_53 = arith.constant 0 : index
    %c0_54 = arith.constant 0 : index
    %53 = vector.load %arg3[%c7, %c0_53, %c0_54] : memref<9x128x128xf32, #tpu.memory_space<vmem>>, vector<1x128x128xf32>
    %54 = vector.shape_cast %53 : vector<1x128x128xf32> to vector<128x128xf32>
    %cst_55 = arith.constant dense<0.000000e+00> : vector<256x128xf32>
    %55 = tpu.matmul %52, %54, %cst_55 {dimension_numbers = #tpu.dot_dimension_numbers<[1], [0], [0], [1], [0, 0, 1, 1], [], []>} : vector<256x128xf32>, vector<128x128xf32>, vector<256x128xf32> -> vector<256x128xf32>
    %56 = arith.addf %49, %55 : vector<256x128xf32>
    %c0_56 = arith.constant 0 : index
    %c2_57 = arith.constant 2 : index
    %c2_58 = arith.constant 2 : index
    %c0_59 = arith.constant 0 : index
    %57 = vector.load %arg1[%c0_56, %c2_57, %c2_58, %c0_59] : memref<1x18x18x128xf32, #tpu.memory_space<vmem>>, vector<1x16x16x128xf32>
    %58 = vector.shape_cast %57 : vector<1x16x16x128xf32> to vector<16x16x128xf32>
    %59 = vector.shape_cast %58 : vector<16x16x128xf32> to vector<256x128xf32>
    %c8 = arith.constant 8 : index
    %c0_60 = arith.constant 0 : index
    %c0_61 = arith.constant 0 : index
    %60 = vector.load %arg3[%c8, %c0_60, %c0_61] : memref<9x128x128xf32, #tpu.memory_space<vmem>>, vector<1x128x128xf32>
    %61 = vector.shape_cast %60 : vector<1x128x128xf32> to vector<128x128xf32>
    %cst_62 = arith.constant dense<0.000000e+00> : vector<256x128xf32>
    %62 = tpu.matmul %59, %61, %cst_62 {dimension_numbers = #tpu.dot_dimension_numbers<[1], [0], [0], [1], [0, 0, 1, 1], [], []>} : vector<256x128xf32>, vector<128x128xf32>, vector<256x128xf32> -> vector<256x128xf32>
    %63 = arith.addf %56, %62 : vector<256x128xf32>
    %c0_63 = arith.constant 0 : index
    %c0_64 = arith.constant 0 : index
    %64 = vector.load %arg6[%c0_63, %c0_64] : memref<8x128xf32, #tpu.memory_space<vmem>>, vector<1x128xf32>
    %65 = vector.broadcast %64 : vector<1x128xf32> to vector<256x128xf32>
    %66 = arith.mulf %63, %65 : vector<256x128xf32>
    %c1_65 = arith.constant 1 : index
    %c0_66 = arith.constant 0 : index
    %67 = vector.load %arg6[%c1_65, %c0_66] : memref<8x128xf32, #tpu.memory_space<vmem>>, vector<1x128xf32>
    %68 = vector.broadcast %67 : vector<1x128xf32> to vector<256x128xf32>
    %69 = arith.addf %66, %68 : vector<256x128xf32>
    %cst_67 = arith.constant 0.000000e+00 : f32
    %70 = vector.broadcast %cst_67 : f32 to vector<256x128xf32>
    %71 = arith.maximumf %69, %70 : vector<256x128xf32>
    %cst_68 = arith.constant 0.000000e+00 : f32
    %72 = vector.broadcast %cst_68 : f32 to vector<18x18x128xf32>
    %c0_69 = arith.constant 0 : index
    %c0_70 = arith.constant 0 : index
    %c0_71 = arith.constant 0 : index
    %73 = vector.load %arg9[%c0_69, %c0_70, %c0_71] : memref<18x18x128xf32, #tpu.memory_space<vmem>>, vector<18x18x128xf32>
    tpu.vector_store %arg9[%c0_69, %c0_70, %c0_71], %72 {strides = array<i32>} : memref<18x18x128xf32, #tpu.memory_space<vmem>>, vector<18x18x128xf32>,
    %74 = vector.shape_cast %71 : vector<256x128xf32> to vector<16x16x128xf32>
    %c1_72 = arith.constant 1 : index
    %c1_73 = arith.constant 1 : index
    %c0_74 = arith.constant 0 : index
    %75 = vector.load %arg9[%c1_72, %c1_73, %c0_74] : memref<18x18x128xf32, #tpu.memory_space<vmem>>, vector<16x16x128xf32>
    tpu.vector_store %arg9[%c1_72, %c1_73, %c0_74], %74 {strides = array<i32>} : memref<18x18x128xf32, #tpu.memory_space<vmem>>, vector<16x16x128xf32>,
    %cst_75 = arith.constant 0.000000e+00 : f32
    %76 = vector.broadcast %cst_75 : f32 to vector<256x128xf32>
    %c0_76 = arith.constant 0 : index
    %c0_77 = arith.constant 0 : index
    %c0_78 = arith.constant 0 : index
    %77 = vector.load %arg9[%c0_76, %c0_77, %c0_78] : memref<18x18x128xf32, #tpu.memory_space<vmem>>, vector<16x16x128xf32>
    %78 = vector.shape_cast %77 : vector<16x16x128xf32> to vector<256x128xf32>
    %c0_79 = arith.constant 0 : index
    %c0_80 = arith.constant 0 : index
    %c0_81 = arith.constant 0 : index
    %79 = vector.load %arg4[%c0_79, %c0_80, %c0_81] : memref<9x128x128xf32, #tpu.memory_space<vmem>>, vector<1x128x128xf32>
    %80 = vector.shape_cast %79 : vector<1x128x128xf32> to vector<128x128xf32>
    %cst_82 = arith.constant dense<0.000000e+00> : vector<256x128xf32>
    %81 = tpu.matmul %78, %80, %cst_82 {dimension_numbers = #tpu.dot_dimension_numbers<[1], [0], [0], [1], [0, 0, 1, 1], [], []>} : vector<256x128xf32>, vector<128x128xf32>, vector<256x128xf32> -> vector<256x128xf32>
    %82 = arith.addf %76, %81 : vector<256x128xf32>
    %c0_83 = arith.constant 0 : index
    %c1_84 = arith.constant 1 : index
    %c0_85 = arith.constant 0 : index
    %83 = vector.load %arg9[%c0_83, %c1_84, %c0_85] : memref<18x18x128xf32, #tpu.memory_space<vmem>>, vector<16x16x128xf32>
    %84 = vector.shape_cast %83 : vector<16x16x128xf32> to vector<256x128xf32>
    %c1_86 = arith.constant 1 : index
    %c0_87 = arith.constant 0 : index
    %c0_88 = arith.constant 0 : index
    %85 = vector.load %arg4[%c1_86, %c0_87, %c0_88] : memref<9x128x128xf32, #tpu.memory_space<vmem>>, vector<1x128x128xf32>
    %86 = vector.shape_cast %85 : vector<1x128x128xf32> to vector<128x128xf32>
    %cst_89 = arith.constant dense<0.000000e+00> : vector<256x128xf32>
    %87 = tpu.matmul %84, %86, %cst_89 {dimension_numbers = #tpu.dot_dimension_numbers<[1], [0], [0], [1], [0, 0, 1, 1], [], []>} : vector<256x128xf32>, vector<128x128xf32>, vector<256x128xf32> -> vector<256x128xf32>
    %88 = arith.addf %82, %87 : vector<256x128xf32>
    %c0_90 = arith.constant 0 : index
    %c2_91 = arith.constant 2 : index
    %c0_92 = arith.constant 0 : index
    %89 = vector.load %arg9[%c0_90, %c2_91, %c0_92] : memref<18x18x128xf32, #tpu.memory_space<vmem>>, vector<16x16x128xf32>
    %90 = vector.shape_cast %89 : vector<16x16x128xf32> to vector<256x128xf32>
    %c2_93 = arith.constant 2 : index
    %c0_94 = arith.constant 0 : index
    %c0_95 = arith.constant 0 : index
    %91 = vector.load %arg4[%c2_93, %c0_94, %c0_95] : memref<9x128x128xf32, #tpu.memory_space<vmem>>, vector<1x128x128xf32>
    %92 = vector.shape_cast %91 : vector<1x128x128xf32> to vector<128x128xf32>
    %cst_96 = arith.constant dense<0.000000e+00> : vector<256x128xf32>
    %93 = tpu.matmul %90, %92, %cst_96 {dimension_numbers = #tpu.dot_dimension_numbers<[1], [0], [0], [1], [0, 0, 1, 1], [], []>} : vector<256x128xf32>, vector<128x128xf32>, vector<256x128xf32> -> vector<256x128xf32>
    %94 = arith.addf %88, %93 : vector<256x128xf32>
    %c1_97 = arith.constant 1 : index
    %c0_98 = arith.constant 0 : index
    %c0_99 = arith.constant 0 : index
    %95 = vector.load %arg9[%c1_97, %c0_98, %c0_99] : memref<18x18x128xf32, #tpu.memory_space<vmem>>, vector<16x16x128xf32>
    %96 = vector.shape_cast %95 : vector<16x16x128xf32> to vector<256x128xf32>
    %c3_100 = arith.constant 3 : index
    %c0_101 = arith.constant 0 : index
    %c0_102 = arith.constant 0 : index
    %97 = vector.load %arg4[%c3_100, %c0_101, %c0_102] : memref<9x128x128xf32, #tpu.memory_space<vmem>>, vector<1x128x128xf32>
    %98 = vector.shape_cast %97 : vector<1x128x128xf32> to vector<128x128xf32>
    %cst_103 = arith.constant dense<0.000000e+00> : vector<256x128xf32>
    %99 = tpu.matmul %96, %98, %cst_103 {dimension_numbers = #tpu.dot_dimension_numbers<[1], [0], [0], [1], [0, 0, 1, 1], [], []>} : vector<256x128xf32>, vector<128x128xf32>, vector<256x128xf32> -> vector<256x128xf32>
    %100 = arith.addf %94, %99 : vector<256x128xf32>
    %c1_104 = arith.constant 1 : index
    %c1_105 = arith.constant 1 : index
    %c0_106 = arith.constant 0 : index
    %101 = vector.load %arg9[%c1_104, %c1_105, %c0_106] : memref<18x18x128xf32, #tpu.memory_space<vmem>>, vector<16x16x128xf32>
    %102 = vector.shape_cast %101 : vector<16x16x128xf32> to vector<256x128xf32>
    %c4_107 = arith.constant 4 : index
    %c0_108 = arith.constant 0 : index
    %c0_109 = arith.constant 0 : index
    %103 = vector.load %arg4[%c4_107, %c0_108, %c0_109] : memref<9x128x128xf32, #tpu.memory_space<vmem>>, vector<1x128x128xf32>
    %104 = vector.shape_cast %103 : vector<1x128x128xf32> to vector<128x128xf32>
    %cst_110 = arith.constant dense<0.000000e+00> : vector<256x128xf32>
    %105 = tpu.matmul %102, %104, %cst_110 {dimension_numbers = #tpu.dot_dimension_numbers<[1], [0], [0], [1], [0, 0, 1, 1], [], []>} : vector<256x128xf32>, vector<128x128xf32>, vector<256x128xf32> -> vector<256x128xf32>
    %106 = arith.addf %100, %105 : vector<256x128xf32>
    %c1_111 = arith.constant 1 : index
    %c2_112 = arith.constant 2 : index
    %c0_113 = arith.constant 0 : index
    %107 = vector.load %arg9[%c1_111, %c2_112, %c0_113] : memref<18x18x128xf32, #tpu.memory_space<vmem>>, vector<16x16x128xf32>
    %108 = vector.shape_cast %107 : vector<16x16x128xf32> to vector<256x128xf32>
    %c5_114 = arith.constant 5 : index
    %c0_115 = arith.constant 0 : index
    %c0_116 = arith.constant 0 : index
    %109 = vector.load %arg4[%c5_114, %c0_115, %c0_116] : memref<9x128x128xf32, #tpu.memory_space<vmem>>, vector<1x128x128xf32>
    %110 = vector.shape_cast %109 : vector<1x128x128xf32> to vector<128x128xf32>
    %cst_117 = arith.constant dense<0.000000e+00> : vector<256x128xf32>
    %111 = tpu.matmul %108, %110, %cst_117 {dimension_numbers = #tpu.dot_dimension_numbers<[1], [0], [0], [1], [0, 0, 1, 1], [], []>} : vector<256x128xf32>, vector<128x128xf32>, vector<256x128xf32> -> vector<256x128xf32>
    %112 = arith.addf %106, %111 : vector<256x128xf32>
    %c2_118 = arith.constant 2 : index
    %c0_119 = arith.constant 0 : index
    %c0_120 = arith.constant 0 : index
    %113 = vector.load %arg9[%c2_118, %c0_119, %c0_120] : memref<18x18x128xf32, #tpu.memory_space<vmem>>, vector<16x16x128xf32>
    %114 = vector.shape_cast %113 : vector<16x16x128xf32> to vector<256x128xf32>
    %c6_121 = arith.constant 6 : index
    %c0_122 = arith.constant 0 : index
    %c0_123 = arith.constant 0 : index
    %115 = vector.load %arg4[%c6_121, %c0_122, %c0_123] : memref<9x128x128xf32, #tpu.memory_space<vmem>>, vector<1x128x128xf32>
    %116 = vector.shape_cast %115 : vector<1x128x128xf32> to vector<128x128xf32>
    %cst_124 = arith.constant dense<0.000000e+00> : vector<256x128xf32>
    %117 = tpu.matmul %114, %116, %cst_124 {dimension_numbers = #tpu.dot_dimension_numbers<[1], [0], [0], [1], [0, 0, 1, 1], [], []>} : vector<256x128xf32>, vector<128x128xf32>, vector<256x128xf32> -> vector<256x128xf32>
    %118 = arith.addf %112, %117 : vector<256x128xf32>
    %c2_125 = arith.constant 2 : index
    %c1_126 = arith.constant 1 : index
    %c0_127 = arith.constant 0 : index
    %119 = vector.load %arg9[%c2_125, %c1_126, %c0_127] : memref<18x18x128xf32, #tpu.memory_space<vmem>>, vector<16x16x128xf32>
    %120 = vector.shape_cast %119 : vector<16x16x128xf32> to vector<256x128xf32>
    %c7_128 = arith.constant 7 : index
    %c0_129 = arith.constant 0 : index
    %c0_130 = arith.constant 0 : index
    %121 = vector.load %arg4[%c7_128, %c0_129, %c0_130] : memref<9x128x128xf32, #tpu.memory_space<vmem>>, vector<1x128x128xf32>
    %122 = vector.shape_cast %121 : vector<1x128x128xf32> to vector<128x128xf32>
    %cst_131 = arith.constant dense<0.000000e+00> : vector<256x128xf32>
    %123 = tpu.matmul %120, %122, %cst_131 {dimension_numbers = #tpu.dot_dimension_numbers<[1], [0], [0], [1], [0, 0, 1, 1], [], []>} : vector<256x128xf32>, vector<128x128xf32>, vector<256x128xf32> -> vector<256x128xf32>
    %124 = arith.addf %118, %123 : vector<256x128xf32>
    %c2_132 = arith.constant 2 : index
    %c2_133 = arith.constant 2 : index
    %c0_134 = arith.constant 0 : index
    %125 = vector.load %arg9[%c2_132, %c2_133, %c0_134] : memref<18x18x128xf32, #tpu.memory_space<vmem>>, vector<16x16x128xf32>
    %126 = vector.shape_cast %125 : vector<16x16x128xf32> to vector<256x128xf32>
    %c8_135 = arith.constant 8 : index
    %c0_136 = arith.constant 0 : index
    %c0_137 = arith.constant 0 : index
    %127 = vector.load %arg4[%c8_135, %c0_136, %c0_137] : memref<9x128x128xf32, #tpu.memory_space<vmem>>, vector<1x128x128xf32>
    %128 = vector.shape_cast %127 : vector<1x128x128xf32> to vector<128x128xf32>
    %cst_138 = arith.constant dense<0.000000e+00> : vector<256x128xf32>
    %129 = tpu.matmul %126, %128, %cst_138 {dimension_numbers = #tpu.dot_dimension_numbers<[1], [0], [0], [1], [0, 0, 1, 1], [], []>} : vector<256x128xf32>, vector<128x128xf32>, vector<256x128xf32> -> vector<256x128xf32>
    %130 = arith.addf %124, %129 : vector<256x128xf32>
    %c2_139 = arith.constant 2 : index
    %c0_140 = arith.constant 0 : index
    %131 = vector.load %arg6[%c2_139, %c0_140] : memref<8x128xf32, #tpu.memory_space<vmem>>, vector<1x128xf32>
    %132 = vector.broadcast %131 : vector<1x128xf32> to vector<256x128xf32>
    %133 = arith.mulf %130, %132 : vector<256x128xf32>
    %c3_141 = arith.constant 3 : index
    %c0_142 = arith.constant 0 : index
    %134 = vector.load %arg6[%c3_141, %c0_142] : memref<8x128xf32, #tpu.memory_space<vmem>>, vector<1x128xf32>
    %135 = vector.broadcast %134 : vector<1x128xf32> to vector<256x128xf32>
    %136 = arith.addf %133, %135 : vector<256x128xf32>
    %cst_143 = arith.constant 0.000000e+00 : f32
    %137 = vector.broadcast %cst_143 : f32 to vector<256x128xf32>
    %138 = arith.maximumf %136, %137 : vector<256x128xf32>
    %139 = vector.shape_cast %138 : vector<256x128xf32> to vector<16x16x128xf32>
    %c1_144 = arith.constant 1 : index
    %c1_145 = arith.constant 1 : index
    %c0_146 = arith.constant 0 : index
    %140 = vector.load %arg9[%c1_144, %c1_145, %c0_146] : memref<18x18x128xf32, #tpu.memory_space<vmem>>, vector<16x16x128xf32>
    tpu.vector_store %arg9[%c1_144, %c1_145, %c0_146], %139 {strides = array<i32>} : memref<18x18x128xf32, #tpu.memory_space<vmem>>, vector<16x16x128xf32>,
    %c0_147 = arith.constant 0 : index
    %c0_148 = arith.constant 0 : index
    %c0_149 = arith.constant 0 : index
    %141 = vector.load %arg9[%c0_147, %c0_148, %c0_149] : memref<18x18x128xf32, #tpu.memory_space<vmem>>, vector<16x16x128xf32>
    %c0_150 = arith.constant 0 : index
    %c1_151 = arith.constant 1 : index
    %c0_152 = arith.constant 0 : index
    %142 = vector.load %arg9[%c0_150, %c1_151, %c0_152] : memref<18x18x128xf32, #tpu.memory_space<vmem>>, vector<16x16x128xf32>
    %143 = arith.maximumf %141, %142 : vector<16x16x128xf32>
    %c0_153 = arith.constant 0 : index
    %c2_154 = arith.constant 2 : index
    %c0_155 = arith.constant 0 : index
    %144 = vector.load %arg9[%c0_153, %c2_154, %c0_155] : memref<18x18x128xf32, #tpu.memory_space<vmem>>, vector<16x16x128xf32>
    %145 = arith.maximumf %143, %144 : vector<16x16x128xf32>
    %c1_156 = arith.constant 1 : index
    %c0_157 = arith.constant 0 : index
    %c0_158 = arith.constant 0 : index
    %146 = vector.load %arg9[%c1_156, %c0_157, %c0_158] : memref<18x18x128xf32, #tpu.memory_space<vmem>>, vector<16x16x128xf32>
    %147 = arith.maximumf %145, %146 : vector<16x16x128xf32>
    %c1_159 = arith.constant 1 : index
    %c1_160 = arith.constant 1 : index
    %c0_161 = arith.constant 0 : index
    %148 = vector.load %arg9[%c1_159, %c1_160, %c0_161] : memref<18x18x128xf32, #tpu.memory_space<vmem>>, vector<16x16x128xf32>
    %149 = arith.maximumf %147, %148 : vector<16x16x128xf32>
    %c1_162 = arith.constant 1 : index
    %c2_163 = arith.constant 2 : index
    %c0_164 = arith.constant 0 : index
    %150 = vector.load %arg9[%c1_162, %c2_163, %c0_164] : memref<18x18x128xf32, #tpu.memory_space<vmem>>, vector<16x16x128xf32>
    %151 = arith.maximumf %149, %150 : vector<16x16x128xf32>
    %c2_165 = arith.constant 2 : index
    %c0_166 = arith.constant 0 : index
    %c0_167 = arith.constant 0 : index
    %152 = vector.load %arg9[%c2_165, %c0_166, %c0_167] : memref<18x18x128xf32, #tpu.memory_space<vmem>>, vector<16x16x128xf32>
    %153 = arith.maximumf %151, %152 : vector<16x16x128xf32>
    %c2_168 = arith.constant 2 : index
    %c1_169 = arith.constant 1 : index
    %c0_170 = arith.constant 0 : index
    %154 = vector.load %arg9[%c2_168, %c1_169, %c0_170] : memref<18x18x128xf32, #tpu.memory_space<vmem>>, vector<16x16x128xf32>
    %155 = arith.maximumf %153, %154 : vector<16x16x128xf32>
    %c2_171 = arith.constant 2 : index
    %c2_172 = arith.constant 2 : index
    %c0_173 = arith.constant 0 : index
    %156 = vector.load %arg9[%c2_171, %c2_172, %c0_173] : memref<18x18x128xf32, #tpu.memory_space<vmem>>, vector<16x16x128xf32>
    %157 = arith.maximumf %155, %156 : vector<16x16x128xf32>
    %c0_174 = arith.constant 0 : index
    %c0_175 = arith.constant 0 : index
    %158 = vector.load %arg7[%c0_174, %c0_175] : memref<64x256xf32, #tpu.memory_space<vmem>>, vector<64x256xf32>
    %159 = vector.shape_cast %157 : vector<16x16x128xf32> to vector<256x128xf32>
    %cst_176 = arith.constant dense<0.000000e+00> : vector<64x128xf32>
    %160 = tpu.matmul %158, %159, %cst_176 {dimension_numbers = #tpu.dot_dimension_numbers<[1], [0], [0], [1], [0, 0, 1, 1], [], []>} : vector<64x256xf32>, vector<256x128xf32>, vector<64x128xf32> -> vector<64x128xf32>
    %c0_177 = arith.constant 0 : index
    %c0_178 = arith.constant 0 : index
    %c0_179 = arith.constant 0 : index
    %161 = vector.load %arg2[%c0_177, %c0_178, %c0_179] : memref<1x64x128xf32, #tpu.memory_space<vmem>>, vector<1x64x128xf32>
    %162 = vector.shape_cast %161 : vector<1x64x128xf32> to vector<64x128xf32>
    %c0_180 = arith.constant 0 : index
    %c0_181 = arith.constant 0 : index
    %163 = vector.load %arg5[%c0_180, %c0_181] : memref<128x128xf32, #tpu.memory_space<vmem>>, vector<128x128xf32>
    %cst_182 = arith.constant dense<0.000000e+00> : vector<64x128xf32>
    %164 = tpu.matmul %162, %163, %cst_182 {dimension_numbers = #tpu.dot_dimension_numbers<[1], [0], [0], [1], [0, 0, 1, 1], [], []>} : vector<64x128xf32>, vector<128x128xf32>, vector<64x128xf32> -> vector<64x128xf32>
    %c4_183 = arith.constant 4 : index
    %c0_184 = arith.constant 0 : index
    %165 = vector.load %arg6[%c4_183, %c0_184] : memref<8x128xf32, #tpu.memory_space<vmem>>, vector<1x128xf32>
    %166 = vector.broadcast %165 : vector<1x128xf32> to vector<64x128xf32>
    %167 = arith.mulf %164, %166 : vector<64x128xf32>
    %c5_185 = arith.constant 5 : index
    %c0_186 = arith.constant 0 : index
    %168 = vector.load %arg6[%c5_185, %c0_186] : memref<8x128xf32, #tpu.memory_space<vmem>>, vector<1x128xf32>
    %169 = vector.broadcast %168 : vector<1x128xf32> to vector<64x128xf32>
    %170 = arith.addf %167, %169 : vector<64x128xf32>
    %171 = arith.addf %160, %170 : vector<64x128xf32>
    %c0_187 = arith.constant 0 : index
    %c0_188 = arith.constant 0 : index
    %c0_189 = arith.constant 0 : index
    %172 = vector.load %arg8[%c0_187, %c0_188, %c0_189] : memref<1x64x128xf32, #tpu.memory_space<vmem>>, vector<1x64x128xf32>
    %173 = vector.shape_cast %172 : vector<1x64x128xf32> to vector<64x128xf32>
    %174 = vector.shape_cast %171 : vector<64x128xf32> to vector<1x64x128xf32>
    tpu.vector_store %arg8[%c0_187, %c0_188, %c0_189], %174 {strides = array<i32>} : memref<1x64x128xf32, #tpu.memory_space<vmem>>, vector<1x64x128xf32>,
    return
  }
  func.func @transform_0(%arg0: i32) -> (i32, i32, i32, i32) {
    %c0_i32 = arith.constant 0 : i32
    %c0_i32_0 = arith.constant 0 : i32
    %c0_i32_1 = arith.constant 0 : i32
    %c0_i32_2 = arith.constant 0 : i32
    return %arg0, %c0_i32, %c0_i32_0, %c0_i32_1 : i32, i32, i32, i32
  }
  func.func @transform_1(%arg0: i32) -> (i32, i32, i32) {
    %c0_i32 = arith.constant 0 : i32
    %c0_i32_0 = arith.constant 0 : i32
    %c0_i32_1 = arith.constant 0 : i32
    return %arg0, %c0_i32, %c0_i32_0 : i32, i32, i32
  }
  func.func @transform_2(%arg0: i32) -> (i32, i32, i32) {
    %c0_i32 = arith.constant 0 : i32
    %c0_i32_0 = arith.constant 0 : i32
    %c0_i32_1 = arith.constant 0 : i32
    %c0_i32_2 = arith.constant 0 : i32
    return %c0_i32, %c0_i32_0, %c0_i32_1 : i32, i32, i32
  }
  func.func @transform_3(%arg0: i32) -> (i32, i32, i32) {
    %c0_i32 = arith.constant 0 : i32
    %c0_i32_0 = arith.constant 0 : i32
    %c0_i32_1 = arith.constant 0 : i32
    %c0_i32_2 = arith.constant 0 : i32
    return %c0_i32, %c0_i32_0, %c0_i32_1 : i32, i32, i32
  }
  func.func @transform_4(%arg0: i32) -> (i32, i32) {
    %c0_i32 = arith.constant 0 : i32
    %c0_i32_0 = arith.constant 0 : i32
    %c0_i32_1 = arith.constant 0 : i32
    return %c0_i32, %c0_i32_0 : i32, i32
  }
  func.func @transform_5(%arg0: i32) -> (i32, i32) {
    %c0_i32 = arith.constant 0 : i32
    %c0_i32_0 = arith.constant 0 : i32
    %c0_i32_1 = arith.constant 0 : i32
    return %c0_i32, %c0_i32_0 : i32, i32
  }
  func.func @transform_6(%arg0: i32) -> (i32, i32) {
    %c0_i32 = arith.constant 0 : i32
    %c0_i32_0 = arith.constant 0 : i32
    %c0_i32_1 = arith.constant 0 : i32
    return %c0_i32, %c0_i32_0 : i32, i32
  }
  func.func @transform_7(%arg0: i32) -> (i32, i32, i32) {
    %c0_i32 = arith.constant 0 : i32
    %c0_i32_0 = arith.constant 0 : i32
    %c0_i32_1 = arith.constant 0 : i32
    return %arg0, %c0_i32, %c0_i32_0 : i32, i32, i32
  }
}

</mosaic_0001>

<bundles_post_ra>
// kernel: tpu_custom_call.1
= control target key start
LH: loop header
LB: loop body
LE: loop exit
PB: predicated region body
PF: predicated region fallthrough
CT: control target
= control target key end

     0   :  { %12 = vsyncpa [#allocation4], 0  ;;  %s13354_s0 = inlined_call_operand.vmem [shape: f32[2,18,18,128], index: 0, kind: input, shape index: {}]   ;;  %s13355_s1 = inlined_call_operand.vmem [shape: f32[2,64,128], index: 1, kind: input, shape index: {}]   ;;  %s13356_s2 = inlined_call_operand.vmem [shape: f32[9,128,128], index: 2, kind: input, shape index: {}]   ;;  %s13357_s3 = inlined_call_operand.hbm [shape: f32[9,128,128], index: 3, kind: input, shape index: {}]   ;;  %s13358_s4 = inlined_call_operand.vmem [shape: f32[128,128], index: 4, kind: input, shape index: {}]   ;;  %s13359_s5 = inlined_call_operand.vmem [shape: f32[8,128], index: 5, kind: input, shape index: {}]   ;;  %s13360_s6 = inlined_call_operand.hbm [shape: f32[64,256], index: 6, kind: input, shape index: {}]   ;;  %s13361_s7 = inlined_call_operand.hbm [shape: f32[2,64,128], index: 7, kind: output, shape index: {}]  }
   0x1   :  { %13 = vsyncpa [#allocation7], 0 }
   0x2   :  { %14 = vsyncpa [#allocation5], 0 }
   0x3   :  { %16 = vsyncpa [#allocation5 + $0x1], 0  ;;  %s11150_s24 = smov 0   ;;  %s11152_s25 = smov 0  }
   0x4   :  { %s11154_s26 = smov 0   ;;  %s11156_s27 = smov 0  }
   0x5 LB: > { %s11171_s28 = sadd.s32 4294967295, %s11098_s27   ;;  %s6977_s29 = sadd.s32 4294967294, %s11098_s27   ;;  %s11098_s27 = sphi %s11156_s27, %s13590_s27   ;;  %s11094_s26 = sphi %s11154_s26, %s13589_s26   ;;  %s11090_s25 = sphi %s11152_s25, %s13588_s25   ;;  %s11086_s24 = sphi %s11150_s24, %s13587_s24  }
   0x6   : > { %s11175_s30 = sadd.s32 1, %s11098_s27   ;;  %s186_s8 = sadd.s32 1, %s11094_s26 }
   0x7   : > { %s183_s9 = ssub.s32 %s11098_s27, %s11175_s30  ;;  %p196_p0 = scmp.ne.s32.totalorder %s11094_s26, %s11090_s25 }
   0x8   : > { %p184_p1 = scmp.eq.s32.totalorder %s183_s9, 0  ;;  %p197_p2 = scmp.eq.s32.totalorder %s11171_s28, 1 }
   0x9   : > { %p202_p3 = scmp.ne.s32.totalorder %s11090_s25, %s11086_s24  ;;  %p203_p4 = scmp.eq.s32.totalorder %s6977_s29, 1 }
   0xa   : > { %s11186_s10 = scalar_select %p184_p1, %s11094_s26, %s186_s8  }
   0xb   : > { %p11188_p5 = por %p197_p2, %p196_p0  ;;  %p11192_p6 = por %p203_p4, %p202_p3 }
   0xc   : > { %13435 = sst [smem:[#allocation12_spill]] %s11186_s10  ;;  %p6978_p7 = scmp.ge.s32.totalorder %s11098_s27, 1 }
   0xd   : > { %s13436_s11 = scalar_select %p11188_p5, 1, 0 }
   0xe   : > { %s13437_s12 = scalar_select %p11192_p6, 1, 0 }
   0xf   : > { %p210_p8 = scmp.lt.s32.totalorder %s11098_s27, 3  ;;  %p13362_p9 = scmp.eq.s32.totalorder %s11171_s28, 0 }
  0x10   : > { %s11100_s14 = smov [#allocation3]   ;;  %s11101_s17 = smov [#allocation6]  }
  0x11   : > { %p11199_p10 = pnand %p6978_p7, %p210_p8  ;;  %s225_s15 = sshll.u32 %s11100_s14, 4  ;;  %s226_s15 = int_to_ptr.vmem [resolvable:$true] %s225_s15 }
  0x12   : > { %s244_s18 = sshll.u32 %s11101_s17, 4  ;;  %s10972_s21 = scalar_lea.hbm %s13357_s3, 18432  ;;  %s11211_s18 = int_to_ptr.vmem [resolvable:$true] %s244_s18 }
  0x13   : > { %s13438_s13 = scalar_select %p11199_p10, 1, 0 }
  0x14   : > { %p10913_p11 = pneg %p11199_p10  ;;  %p10973_p13 = scmp.ne.s32.totalorder %s13357_s3, %s10972_s21 }
  0x15   : > { %p10979_p3 = scmp.lt.u32.totalorder %s10972_s21, %s13357_s3 }
  0x16   : > { %p11207_p12 = pnand %p13362_p9, %p10913_p11 }
  0x18   : > { %p10974_p0 = pneg %p11207_p12 }
  0x1a   : > { %p10975_p1 = pnand %p10974_p0, %p10973_p13 }
  0x1c   : > { %p10976_p2 = pneg %p10975_p1 }
  0x1e   : > { %p10981_p4 = pnand %p10979_p3, %p10976_p2 }
  0x20   : > { %10984 = shalt.err (!%p10981_p4)
}
  0x21   : > { %s10985_s9 = scalar_lea.vmem %s226_s15, 18432  ;;  %p10993_p9 = scmp.lt.s32.totalorder %s226_s15, %s226_s15 }
  0x22   : > { %p10986_p7 = scmp.ne.s32.totalorder %s226_s15, %s10985_s9  ;;  %p10994_p6 = scmp.lt.s32.totalorder %s10985_s9, %s10985_s9 }
  0x24   : > { %p10988_p8 = pnand %p10986_p7, %p10974_p0  ;;  %p10995_p5 = por %p10994_p6, %p10993_p9 }
  0x26   : > { %p10989_p11 = pneg %p10988_p8 }
  0x28   : > { %p10996_p10 = pnand %p10995_p5, %p10989_p11 }
  0x2a   : > { %10999 = shalt.err (!%p10996_p10)
}
  0x2b   : > { %s11102_s14 = smov 128   ;;  %s11103_s17 = smov 8  }
  0x2c   : > { %10916 = dma.hbm_to_vmem [thread:$0]  (!%p11207_p12), %s13357_s3, 18432, %s226_s15, [#allocation4], %s11102_s14, %s11102_s14, %s11103_s17  }
  0x2d   : > { %s11000_s23 = scalar_lea.hbm %s13360_s6, 2048 }
  0x2e   : > { %p11001_p13 = scmp.ne.s32.totalorder %s13360_s6, %s11000_s23  ;;  %p11007_p9 = scmp.lt.u32.totalorder %s11000_s23, %s13360_s6 }
  0x30   : > { %p11003_p5 = pnand %p11001_p13, %p10974_p0 }
  0x32   : > { %p11004_p6 = pneg %p11003_p5 }
  0x34   : > { %p11009_p10 = pnand %p11007_p9, %p11004_p6 }
  0x36   : > { %11012 = shalt.err (!%p11009_p10)
}
  0x37   : > { %s11013_s15 = scalar_lea.vmem %s11211_s18, 2048  ;;  %p11021_p4 = scmp.lt.s32.totalorder %s11211_s18, %s11211_s18 }
  0x38   : > { %p11014_p1 = scmp.ne.s32.totalorder %s11211_s18, %s11013_s15  ;;  %p11022_p7 = scmp.lt.s32.totalorder %s11013_s15, %s11013_s15 }
  0x3a   : > { %p11016_p2 = pnand %p11014_p1, %p10974_p0  ;;  %p11023_p8 = por %p11022_p7, %p11021_p4 }
  0x3c   : > { %p11017_p3 = pneg %p11016_p2 }
  0x3e   : > { %p11024_p11 = pnand %p11023_p8, %p11017_p3 }
  0x40   : > { %11027 = shalt.err (!%p11024_p11)
}
  0x41   : > { %s11104_s10 = smov 256   ;;  %s11105_s14 = smov 16  }
  0x42   : > { %10919 = dma.hbm_to_vmem [thread:$0]  (!%p11207_p12), %s13360_s6, 2048, %s11211_s18, [#allocation7], %s11104_s10, %s11104_s10, %s11105_s14  }
  0x43   : > { %p13440_p13 = scmp.ne.s32.totalorder %s13438_s13, 0 }
  0x45   : > { %276 = sbr.rel (%p13440_p13) target bundleno = 1942 (0x796), region = 48 }
  0x4c   : > { %p13441_p0 = scmp.eq.s32.totalorder %s11171_s28, 0 }
  0x4e   : > { %11073 = dma.done.wait (%p13441_p0), [#allocation4], 18432   ;;  %p13442_p5 = pmov %p13441_p0 }
  0x4f   : > { %p13443_p6 = pmov %p13441_p0 }
  0x50   : > { %11075 = vsyncadd (%p13442_p5), [#allocation4], 4294948864 }
  0x51   : > { %11077 = dma.done.wait (%p13443_p6), [#allocation7], 2048   ;;  %p13444_p9 = pmov %p13441_p0 }
  0x52   : > { %p317_p10 = scmp.lt.s32.totalorder %s11171_s28, 1  ;;  %v6989_v0 = vld [vmem:[%s13356_s2 + $0x80] sm:$0xff]  ;;  %v6990_v1 = vld [vmem:[%s13356_s2 + $0x88] sm:$0xff]  ;;  %v6991_v2 = vld [vmem:[%s13356_s2 + $0x90] sm:$0xff]  ;;  %s7321_s17 = sshll.u32 %s11171_s28, 10 }
  0x53   : > { %11079 = vsyncadd (%p13444_p9), [#allocation7], 4294965248  ;;  %v9750_v3 = vpack.c.bf16 %v6990_v1, %v6989_v0  ;;  %v6992_v4 = vld [vmem:[%s13356_s2 + $0x98] sm:$0xff]  ;;  %v6993_v6 = vld [vmem:[%s13356_s2 + $0xa0] sm:$0xff]  ;;  %s13308_s22 = scalar_lea.hbm %s13361_s7, %s7321_s17  ;;  %p13584_p1 = scmp.ne.s32.totalorder %s13436_s11, 0 }
  0x54   : > { %s11272_s16 = scalar_select %p317_p10, %s11171_s28, 1  ;;  %v9754_v5 = vpack.c.bf16 %v6992_v4, %v6991_v2  ;;  %v6994_v7 = vld [vmem:[%s13356_s2 + $0xa8] sm:$0xff]  ;;  %v6995_v10 = vld [vmem:[%s13356_s2 + $0xb0] sm:$0xff]  ;;  %v6996_v11 = vld [vmem:[%s13356_s2 + $0xb8] sm:$0xff] }
  0x55   : > { %9751 = vmatprep.subr.bf16.mxu0 %v9750_v3  ;;  %v9758_v8 = vpack.c.bf16 %v6994_v7, %v6993_v6  ;;  %v9762_v12 = vpack.c.bf16 %v6996_v11, %v6995_v10  ;;  %v6997_v13 = vld [vmem:[%s13356_s2 + $0xc0] sm:$0xff]  ;;  %v6998_v14 = vld [vmem:[%s13356_s2 + $0xc8] sm:$0xff]  ;;  %v6999_v16 = vld [vmem:[%s13356_s2 + $0xd0] sm:$0xff]  ;;  %s11107_s28 = smov [#allocation8]  }
  0x56   : > { %s10902_s13 = smul.u32 432, %s11272_s16  ;;  %9753 = vmatpush3.bf16.msra.mxu0 %v9750_v3  ;;  %v9766_v15 = vpack.c.bf16 %v6998_v14, %v6997_v13  ;;  %v7000_v17 = vld [vmem:[%s13356_s2 + $0xd8] sm:$0xff]  ;;  %v7001_v19 = vld [vmem:[%s13356_s2 + $0xe0] sm:$0xff]  ;;  %v7002_v20 = vld [vmem:[%s13356_s2 + $0xe8] sm:$0xff]  ;;  %s7320_s9 = sshll.u32 %s11272_s16, 6 }
  0x57   : > { %9755 = vmatprep.subr.bf16.mxu0 %v9754_v5  ;;  %v9770_v18 = vpack.c.bf16 %v7000_v17, %v6999_v16  ;;  %v9774_v21 = vpack.c.bf16 %v7002_v20, %v7001_v19  ;;  %v7003_v22 = vld [vmem:[%s13356_s2 + $0xf0] sm:$0xff]  ;;  %v7004_v23 = vld [vmem:[%s13356_s2 + $0xf8] sm:$0xff]  ;;  %v359_v25 = vld [vmem:[%s13356_s2] sm:$0xff]  ;;  %s12879_s19 = scalar_lea.vmem %s13355_s1, %s7320_s9  ;;  %s314_s9 = sand.u32 1, %s11090_s25  }
  0x58   : > { %s11296_s20 = scalar_lea.vmem %s13354_s0, %s10902_s13  ;;  %v9778_v24 = vpack.c.bf16 %v7004_v23, %v7003_v22  ;;  %v360_v26 = vld [vmem:[%s13356_s2 + $0x8] sm:$0xff]  ;;  %v361_v28 = vld [vmem:[%s13356_s2 + $0x10] sm:$0xff]  ;;  %v362_v29 = vld [vmem:[%s13356_s2 + $0x18] sm:$0xff]  ;;  %s6985_s15 = sshll.u32 %s314_s9, 6 }
  0x59   : > { %v375_v9 = vld [vmem:[%s11296_s20 + $0x1] sm:$0xff]  ;;  %v9782_v27 = vpack.c.bf16 %v360_v26, %v359_v25  ;;  %v376_v30 = vld [vmem:[%s11296_s20 + $0x9] sm:$0xff]  ;;  %v11343_v31 = vld [vmem:[%s11296_s20 + $0x19] sm:$0xff]  ;;  %v9786_v32 = vpack.c.bf16 %v362_v29, %v361_v28  ;;  %s13292_s10 = scalar_lea.vmem [#allocation8], %s6985_s15  ;;  %s13313_s23 = scalar_lea.sflag [#allocation5], %s314_s9 }
  0x5a   : > { %8298 = vmatprep.mubr.f32.mxu0 %v375_v9  ;;  %9757 = vmatpush3.bf16.msra.mxu0 %v9754_v5  ;;  %v363_v33 = vld [vmem:[%s13356_s2 + $0x20] sm:$0xff]  ;;  %v364_v34 = vld [vmem:[%s13356_s2 + $0x28] sm:$0xff]  ;;  %v11356_v36 = vld [vmem:[%s11296_s20 + $0x31] sm:$0xff]  ;;  %s6881_s14 = sshll.u32 %s13292_s10, 4  ;;  %s13303_s14 = int_to_ptr.vmem [resolvable:$true] %s6881_s14 }
  0x5b   : > { %9759 = vmatprep.subr.bf16.mxu0 %v9758_v8  ;;  %v11353_v35 = vld [vmem:[%s11296_s20 + $0x21] sm:$0xff]  ;;  %v9790_v37 = vpack.c.bf16 %v364_v34, %v363_v33  ;;  %v365_v38 = vld [vmem:[%s13356_s2 + $0x30] sm:$0xff]  ;;  %v366_v39 = vld [vmem:[%s13356_s2 + $0x38] sm:$0xff]  ;;  %s11028_s16 = scalar_lea.vmem %s13303_s14, 1024 }
  0x5c   : > { %v11367_v40 = vld [vmem:[%s11296_s20 + $0x39] sm:$0xff]  ;;  %v11370_v41 = vld [vmem:[%s11296_s20 + $0x49] sm:$0xff]  ;;  %v9794_v42 = vpack.c.bf16 %v366_v39, %v365_v38  ;;  %v11381_v45 = vld [vmem:[%s11296_s20 + $0x51] sm:$0xff]  ;;  %p11029_p12 = scmp.ne.s32.totalorder %s13303_s14, %s11028_s16 }
  0x5d   : > { %v367_v43 = vld [vmem:[%s13356_s2 + $0x40] sm:$0xff]  ;;  %v368_v44 = vld [vmem:[%s13356_s2 + $0x48] sm:$0xff]  ;;  %v369_v48 = vld [vmem:[%s13356_s2 + $0x50] sm:$0xff] }
  0x5e   : > { %9761 = vmatpush3.bf16.msra.mxu0 %v9758_v8  ;;  %v11384_v46 = vld [vmem:[%s11296_s20 + $0x61] sm:$0xff]  ;;  %v9798_v47 = vpack.c.bf16 %v368_v44, %v367_v43  ;;  %v370_v49 = vld [vmem:[%s13356_s2 + $0x58] sm:$0xff]  ;;  %v11395_v50 = vld [vmem:[%s11296_s20 + $0x69] sm:$0xff]  ;;  %p11030_p2 = pnand %p11029_p12, %p13584_p1 }
  0x5f   : > { %9763 = vmatprep.subr.bf16.mxu0 %v9762_v12  ;;  %v11398_v51 = vld [vmem:[%s11296_s20 + $0x79] sm:$0xff]  ;;  %v9802_v52 = vpack.c.bf16 %v370_v49, %v369_v48  ;;  %v372_v54 = vld [vmem:[%s13356_s2 + $0x68] sm:$0xff]  ;;  %v11412_v56 = vld [vmem:[%s11296_s20 + $0x91] sm:$0xff] }
  0x60   : > { %v371_v53 = vld [vmem:[%s13356_s2 + $0x60] sm:$0xff]  ;;  %v373_v58 = vld [vmem:[%s13356_s2 + $0x70] sm:$0xff]  ;;  %v374_v59 = vld [vmem:[%s13356_s2 + $0x78] sm:$0xff]  ;;  %p11031_p3 = pneg %p11030_p2 }
  0x61   : > { %v11409_v55 = vld [vmem:[%s11296_s20 + $0x81] sm:$0xff]  ;;  %v9806_v57 = vpack.c.bf16 %v372_v54, %v371_v53  ;;  %v11423_v60 = vld [vmem:[%s11296_s20 + $0x99] sm:$0xff]  ;;  %v11426_v61 = vld [vmem:[%s11296_s20 + $0xa9] sm:$0xff]  ;;  %v9810_v62 = vpack.c.bf16 %v374_v59, %v373_v58 }
  0x62   : > { %9765 = vmatpush3.bf16.msra.mxu0 %v9762_v12  ;;  %v7005_v63 = vld [vmem:[%s13356_s2 + $0x100] sm:$0xff]  ;;  %v7006_v0 = vld [vmem:[%s13356_s2 + $0x108] sm:$0xff]  ;;  %v11437_v1 = vld [vmem:[%s11296_s20 + $0xb1] sm:$0xff] }
  0x63   : > { %9767 = vmatprep.subr.bf16.mxu0 %v9766_v15  ;;  %v11440_v2 = vld [vmem:[%s11296_s20 + $0xc1] sm:$0xff]  ;;  %v9814_v3 = vpack.c.bf16 %v7006_v0, %v7005_v63  ;;  %v11445_v4 = vld [vmem:[%s11296_s20 + $0xc9] sm:$0xff]  ;;  %v11448_v5 = vld [vmem:[%s11296_s20 + $0xd9] sm:$0xff] }
  0x64   : > { %v11453_v6 = vld [vmem:[%s11296_s20 + $0xe1] sm:$0xff]  ;;  %v11456_v7 = vld [vmem:[%s11296_s20 + $0xf1] sm:$0xff]  ;;  %v11461_v8 = vld [vmem:[%s11296_s20 + $0xf9] sm:$0xff] }
  0x65   : > { %v11464_v9 = vld [vmem:[%s11296_s20 + $0x109] sm:$0xff]  ;;  %v11469_v10 = vld [vmem:[%s11296_s20 + $0x111] sm:$0xff]  ;;  %v11472_v11 = vld [vmem:[%s11296_s20 + $0x121] sm:$0xff] }
  0x66   : > { %9769 = vmatpush3.bf16.msra.mxu0 %v9766_v15  ;;  %v11477_v12 = vld [vmem:[%s11296_s20 + $0x129] sm:$0xff]  ;;  %v11480_v13 = vld [vmem:[%s11296_s20 + $0x139] sm:$0xff]  ;;  %v11485_v14 = vld [vmem:[%s11296_s20 + $0x141] sm:$0xff] }
  0x67   : > { %9771 = vmatprep.subr.bf16.mxu0 %v9770_v18  ;;  %13445 = vst [vmem:[#allocation13_spill] sm:$0xff] %v11477_v12  ;;  %13446 = vst [vmem:[#allocation14_spill] sm:$0xff] %v11480_v13  ;;  %v11488_v15 = vld [vmem:[%s11296_s20 + $0x151] sm:$0xff]  ;;  %v11493_v16 = vld [vmem:[%s11296_s20 + $0x159] sm:$0xff] }
  0x68   : > { %13447 = vst [vmem:[#allocation15_spill] sm:$0xff] %v11485_v14  ;;  %13448 = vst [vmem:[#allocation16_spill] sm:$0xff] %v11488_v15  ;;  %v11496_v17 = vld [vmem:[%s11296_s20 + $0x169] sm:$0xff]  ;;  %v327_v19 = vld [vmem:[%s11296_s20] sm:$0xff] }
  0x69   : > { %13449 = vst [vmem:[#allocation17_spill] sm:$0xff] %v11493_v16  ;;  %13450 = vst [vmem:[#allocation18_spill] sm:$0xff] %v11496_v17  ;;  %v7007_v20 = vld [vmem:[%s13356_s2 + $0x110] sm:$0xff]  ;;  %v328_v22 = vld [vmem:[%s11296_s20 + $0x8] sm:$0xff] }
  0x6a   : > { %9773 = vmatpush3.bf16.msra.mxu0 %v9770_v18  ;;  %v11501_v18 = vld [vmem:[%s11296_s20 + $0x171] sm:$0xff]  ;;  %v7009_v25 = vld [vmem:[%s13356_s2 + $0x120] sm:$0xff]  ;;  %v7010_v26 = vld [vmem:[%s13356_s2 + $0x128] sm:$0xff] }
  0x6b   : > { %9775 = vmatprep.subr.bf16.mxu0 %v9774_v21  ;;  %13451 = vst [vmem:[#allocation19_spill] sm:$0xff] %v11501_v18  ;;  %v11513_v23 = vld [vmem:[%s11296_s20 + $0x18] sm:$0xff]  ;;  %v11526_v28 = vld [vmem:[%s11296_s20 + $0x30] sm:$0xff]  ;;  %v9822_v29 = vpack.c.bf16 %v7010_v26, %v7009_v25  ;;  %v11540_v34 = vld [vmem:[%s11296_s20 + $0x48] sm:$0xff] }
  0x6c   : > { %v11537_v33 = vld [vmem:[%s11296_s20 + $0x38] sm:$0xff]  ;;  %v7013_v38 = vld [vmem:[%s13356_s2 + $0x140] sm:$0xff]  ;;  %v7014_v39 = vld [vmem:[%s13356_s2 + $0x148] sm:$0xff] }
  0x6d   : > { %v11554_v43 = vld [vmem:[%s11296_s20 + $0x60] sm:$0xff]  ;;  %v9830_v44 = vpack.c.bf16 %v7014_v39, %v7013_v38  ;;  %v7016_v48 = vld [vmem:[%s13356_s2 + $0x158] sm:$0xff]  ;;  %v11565_v49 = vld [vmem:[%s11296_s20 + $0x68] sm:$0xff] }
  0x6e   : > { %9777 = vmatpush3.bf16.msra.mxu0 %v9774_v21  ;;  %v7008_v21 = vld [vmem:[%s13356_s2 + $0x118] sm:$0xff]  ;;  %v7017_v54 = vld [vmem:[%s13356_s2 + $0x160] sm:$0xff]  ;;  %v11582_v59 = vld [vmem:[%s11296_s20 + $0x90] sm:$0xff] }
  0x6f   : > { %9779 = vmatprep.subr.bf16.mxu0 %v9778_v24  ;;  %v11579_v58 = vld [vmem:[%s11296_s20 + $0x80] sm:$0xff]  ;;  %v7019_v63 = vld [vmem:[%s13356_s2 + $0x170] sm:$0xff]  ;;  %v7020_v0 = vld [vmem:[%s13356_s2 + $0x178] sm:$0xff] }
  0x70   : > { %v11610_v25 = vld [vmem:[%s11296_s20 + $0xc0] sm:$0xff]  ;;  %v11631_v38 = vld [vmem:[%s11296_s20 + $0xf8] sm:$0xff]  ;;  %v11634_v39 = vld [vmem:[%s11296_s20 + $0x108] sm:$0xff] }
  0x72   : > { %9781 = vmatpush3.bf16.msra.mxu0 %v9778_v24  ;;  %v9818_v24 = vpack.c.bf16 %v7008_v21, %v7007_v20  ;;  %v9842_v20 = vpack.c.bf16 %v7020_v0, %v7019_v63  ;;  %v7053_v21 = vld [vmem:[%s13356_s2 + $0x180] sm:$0xff]  ;;  %v11666_v63 = vld [vmem:[%s11296_s20 + $0x168] sm:$0xff]  ;;  %v11671_v0 = vld [vmem:[%s11296_s20 + $0x170] sm:$0xff] }
  0x73   : > { %9783 = vmatprep.subr.bf16.mxu0 %v9782_v27 }
  0x75   : > { %8299 = vmatmul.mubr.f32.vlgmr.msra.gmra.mrb[0].mxu0 %v376_v30  ;;  %v7011_v30 = vld [vmem:[%s13356_s2 + $0x130] sm:$0xff] }
  0x76   : > { %8301 = vmatprep.mubr.f32.mxu0 %v11343_v31  ;;  %9785 = vmatpush3.bf16.msra.mxu0 %v9782_v27  ;;  %v11523_v27 = vld [vmem:[%s11296_s20 + $0x20] sm:$0xff] }
  0x77   : > { %9787 = vmatprep.subr.bf16.mxu0 %v9786_v32 }
  0x79   : > { %8302 = vmatmul.mubr.f32.gmra.mrb[2].mxu0 %v11353_v35 }
  0x7a   : > { %8304 = vmatprep.mubr.f32.mxu0 %v11356_v36  ;;  %9789 = vmatpush3.bf16.msra.mxu0 %v9786_v32  ;;  %v7012_v32 = vld [vmem:[%s13356_s2 + $0x138] sm:$0xff] }
  0x7b   : > { %9791 = vmatprep.subr.bf16.mxu0 %v9790_v37 }
  0x7d   : > { %8305 = vmatmul.mubr.f32.gmra.mrb[4].mxu0 %v11367_v40 }
  0x7e   : > { %8307 = vmatprep.mubr.f32.mxu0 %v11370_v41  ;;  %9793 = vmatpush3.bf16.msra.mxu0 %v9790_v37  ;;  %v9826_v37 = vpack.c.bf16 %v7012_v32, %v7011_v30  ;;  %v11618_v30 = vld [vmem:[%s11296_s20 + $0xd8] sm:$0xff]  ;;  %v11623_v32 = vld [vmem:[%s11296_s20 + $0xe0] sm:$0xff] }
  0x7f   : > { %9795 = vmatprep.subr.bf16.mxu0 %v9794_v42 }
  0x81   : > { %8308 = vmatmul.mubr.f32.gmra.mrb[6].mxu0 %v11381_v45 }
  0x82   : > { %8310 = vmatprep.mubr.f32.mxu0 %v11384_v46  ;;  %9797 = vmatpush3.bf16.msra.mxu0 %v9794_v42  ;;  %v11551_v42 = vld [vmem:[%s11296_s20 + $0x50] sm:$0xff] }
  0x83   : > { %9799 = vmatprep.subr.bf16.mxu0 %v9798_v47 }
  0x85   : > { %8311 = vmatmul.mubr.f32.gmra.mrb[8].mxu0 %v11395_v50 }
  0x86   : > { %8313 = vmatprep.mubr.f32.mxu0 %v11398_v51  ;;  %9801 = vmatpush3.bf16.msra.mxu0 %v9798_v47  ;;  %v7015_v47 = vld [vmem:[%s13356_s2 + $0x150] sm:$0xff] }
  0x87   : > { %9803 = vmatprep.subr.bf16.mxu0 %v9802_v52  ;;  %v9834_v53 = vpack.c.bf16 %v7016_v48, %v7015_v47  ;;  %v11642_v47 = vld [vmem:[%s11296_s20 + $0x120] sm:$0xff]  ;;  %v11647_v48 = vld [vmem:[%s11296_s20 + $0x128] sm:$0xff] }
  0x89   : > { %8314 = vmatmul.mubr.f32.gmra.mrb[10].mxu0 %v11409_v55 }
  0x8a   : > { %8316 = vmatprep.mubr.f32.mxu0 %v11412_v56  ;;  %9805 = vmatpush3.bf16.msra.mxu0 %v9802_v52  ;;  %v11568_v52 = vld [vmem:[%s11296_s20 + $0x78] sm:$0xff] }
  0x8b   : > { %9807 = vmatprep.subr.bf16.mxu0 %v9806_v57 }
  0x8d   : > { %8317 = vmatmul.mubr.f32.gmra.mrb[12].mxu0 %v11423_v60 }
  0x8e   : > { %8319 = vmatprep.mubr.f32.mxu0 %v11426_v61  ;;  %9809 = vmatpush3.bf16.msra.mxu0 %v9806_v57  ;;  %v7018_v57 = vld [vmem:[%s13356_s2 + $0x168] sm:$0xff] }
  0x8f   : > { %9811 = vmatprep.subr.bf16.mxu0 %v9810_v62 }
  0x91   : > { %8320 = vmatmul.mubr.f32.gmra.mrb[14].mxu0 %v11437_v1 }
  0x92   : > { %8322 = vmatprep.mubr.f32.mxu0 %v11440_v2  ;;  %9813 = vmatpush3.bf16.msra.mxu0 %v9810_v62  ;;  %v9838_v62 = vpack.c.bf16 %v7018_v57, %v7017_v54  ;;  %v11655_v54 = vld [vmem:[%s11296_s20 + $0x140] sm:$0xff]  ;;  %v11658_v57 = vld [vmem:[%s11296_s20 + $0x150] sm:$0xff] }
  0x93   : > { %9815 = vmatprep.subr.bf16.mxu0 %v9814_v3 }
  0x95   : > { %8323 = vmatmul.mubr.f32.gmra.mrb[16].mxu0 %v11445_v4 }
  0x96   : > { %8325 = vmatprep.mubr.f32.mxu0 %v11448_v5 }
  0x99   : > { %8326 = vmatmul.mubr.f32.gmra.mrb[18].mxu0 %v11453_v6 }
  0x9a   : > { %8328 = vmatprep.mubr.f32.mxu0 %v11456_v7 }
  0x9d   : > { %8329 = vmatmul.mubr.f32.gmra.mrb[20].mxu0 %v11461_v8 }
  0x9e   : > { %8331 = vmatprep.mubr.f32.mxu0 %v11464_v9 }
  0xa1   : > { %8332 = vmatmul.mubr.f32.gmra.mrb[22].mxu0 %v11469_v10 }
  0xa2   : > { %8334 = vmatprep.mubr.f32.mxu0 %v11472_v11 }
  0xa5   : > { %8335 = vmatmul.mubr.f32.gmra.mrb[24].mxu0 %v11477_v12  ;;  %v7060_v12 = vld [vmem:[%s13356_s2 + $0x1b8] sm:$0xff] }
  0xa6   : > { %8337 = vmatprep.mubr.f32.mxu0 %v11480_v13  ;;  %v11693_v13 = vld [vmem:[%s11296_s20 + $0x22] sm:$0xff] }
  0xa7   : > { %13453 = vst [vmem:[#allocation21_spill] sm:$0xff] %v11693_v13 }
  0xa9   : > { %8338 = vmatmul.mubr.f32.gmra.mrb[26].mxu0 %v11485_v14  ;;  %v7058_v14 = vld [vmem:[%s13356_s2 + $0x1a8] sm:$0xff] }
  0xaa   : > { %8340 = vmatprep.mubr.f32.mxu0 %v11488_v15  ;;  %v7057_v15 = vld [vmem:[%s13356_s2 + $0x1a0] sm:$0xff] }
  0xad   : > { %8341 = vmatmul.mubr.f32.gmra.mrb[28].mxu0 %v11493_v16 }
  0xae   : > { %8343 = vmatprep.mubr.f32.mxu0 %v11496_v17  ;;  %v11683_v17 = vld [vmem:[%s11296_s20 + $0x1a] sm:$0xff] }
  0xaf   : > { %13452 = vst [vmem:[#allocation20_spill] sm:$0xff] %v11683_v17 }
  0xb1   : > { %8344 = vmatmul.mubr.f32.gmra.mrb[30].mxu0 %v11501_v18  ;;  %v875_v18 = vld [vmem:[%s11296_s20 + $0xa] sm:$0xff] }
  0xb2   : > { %8378 = vmatprep.mubr.f32.mxu0 %v327_v19  ;;  %v11596_v19 = vld [vmem:[%s11296_s20 + $0xa8] sm:$0xff] }
  0xb5   : > { %8379 = vmatmul.mubr.f32.vlgmr.msra.gmra.mrb[0].mxu0 %v328_v22  ;;  %v7054_v22 = vld [vmem:[%s13356_s2 + $0x188] sm:$0xff] }
  0xb6   : > { %8381 = vmatprep.mubr.f32.mxu0 %v11513_v23  ;;  %9817 = vmatpush3.bf16.msra.mxu0 %v9814_v3  ;;  %v11593_v3 = vld [vmem:[%s11296_s20 + $0x98] sm:$0xff]  ;;  %v9846_v26 = vpack.c.bf16 %v7054_v22, %v7053_v21  ;;  %v7055_v21 = vld [vmem:[%s13356_s2 + $0x190] sm:$0xff] }
  0xb7   : > { %9819 = vmatprep.subr.bf16.mxu0 %v9818_v24  ;;  %v7056_v22 = vld [vmem:[%s13356_s2 + $0x198] sm:$0xff] }
  0xb8   : > { %v9850_v16 = vpack.c.bf16 %v7056_v22, %v7055_v21  ;;  %v9854_v21 = vpack.c.bf16 %v7058_v14, %v7057_v15  ;;  %v7059_v22 = vld [vmem:[%s13356_s2 + $0x1b0] sm:$0xff]  ;;  %v7061_v15 = vld [vmem:[%s13356_s2 + $0x1c0] sm:$0xff] }
  0xb9   : > { %8382 = vmatmul.mubr.f32.gmra.mrb[2].mxu0 %v11523_v27  ;;  %v9858_v14 = vpack.c.bf16 %v7060_v12, %v7059_v22  ;;  %v7063_v22 = vld [vmem:[%s13356_s2 + $0x1d0] sm:$0xff] }
  0xba   : > { %8384 = vmatprep.mubr.f32.mxu0 %v11526_v28  ;;  %9821 = vmatpush3.bf16.msra.mxu0 %v9818_v24  ;;  %v11607_v24 = vld [vmem:[%s11296_s20 + $0xb0] sm:$0xff] }
  0xbb   : > { %9823 = vmatprep.subr.bf16.mxu0 %v9822_v29 }
  0xbd   : > { %8385 = vmatmul.mubr.f32.gmra.mrb[4].mxu0 %v11537_v33 }
  0xbe   : > { %8387 = vmatprep.mubr.f32.mxu0 %v11540_v34  ;;  %9825 = vmatpush3.bf16.msra.mxu0 %v9822_v29  ;;  %v11615_v29 = vld [vmem:[%s11296_s20 + $0xc8] sm:$0xff] }
  0xbf   : > { %9827 = vmatprep.subr.bf16.mxu0 %v9826_v37 }
  0xc1   : > { %8388 = vmatmul.mubr.f32.gmra.mrb[6].mxu0 %v11551_v42 }
  0xc2   : > { %8390 = vmatprep.mubr.f32.mxu0 %v11554_v43  ;;  %9829 = vmatpush3.bf16.msra.mxu0 %v9826_v37  ;;  %v11626_v37 = vld [vmem:[%s11296_s20 + $0xf0] sm:$0xff] }
  0xc3   : > { %9831 = vmatprep.subr.bf16.mxu0 %v9830_v44 }
  0xc5   : > { %8391 = vmatmul.mubr.f32.gmra.mrb[8].mxu0 %v11565_v49 }
  0xc6   : > { %8393 = vmatprep.mubr.f32.mxu0 %v11568_v52  ;;  %9833 = vmatpush3.bf16.msra.mxu0 %v9830_v44  ;;  %v11639_v44 = vld [vmem:[%s11296_s20 + $0x110] sm:$0xff] }
  0xc7   : > { %9835 = vmatprep.subr.bf16.mxu0 %v9834_v53 }
  0xc9   : > { %8394 = vmatmul.mubr.f32.gmra.mrb[10].mxu0 %v11579_v58 }
  0xca   : > { %8396 = vmatprep.mubr.f32.mxu0 %v11582_v59  ;;  %9837 = vmatpush3.bf16.msra.mxu0 %v9834_v53  ;;  %v11650_v53 = vld [vmem:[%s11296_s20 + $0x138] sm:$0xff] }
  0xcb   : > { %9839 = vmatprep.subr.bf16.mxu0 %v9838_v62 }
  0xcd   : > { %8397 = vmatmul.mubr.f32.gmra.mrb[12].mxu0 %v11593_v3 }
  0xce   : > { %8399 = vmatprep.mubr.f32.mxu0 %v11596_v19  ;;  %9841 = vmatpush3.bf16.msra.mxu0 %v9838_v62  ;;  %v11663_v62 = vld [vmem:[%s11296_s20 + $0x158] sm:$0xff] }
  0xcf   : > { %9843 = vmatprep.subr.bf16.mxu0 %v9842_v20 }
  0xd1   : > { %8400 = vmatmul.mubr.f32.gmra.mrb[14].mxu0 %v11607_v24 }
  0xd2   : > { %8402 = vmatprep.mubr.f32.mxu0 %v11610_v25  ;;  %9845 = vmatpush3.bf16.msra.mxu0 %v9842_v20  ;;  %v874_v20 = vld [vmem:[%s11296_s20 + $0x2] sm:$0xff] }
  0xd3   : > { %9847 = vmatprep.subr.bf16.mxu0 %v9846_v26 }
  0xd5   : > { %8403 = vmatmul.mubr.f32.gmra.mrb[16].mxu0 %v11615_v29 }
  0xd6   : > { %8405 = vmatprep.mubr.f32.mxu0 %v11618_v30 }
  0xd9   : > { %8406 = vmatmul.mubr.f32.gmra.mrb[18].mxu0 %v11623_v32 }
  0xda   : > { %8408 = vmatprep.mubr.f32.mxu0 %v11626_v37 }
  0xdd   : > { %8409 = vmatmul.mubr.f32.gmra.mrb[20].mxu0 %v11631_v38 }
  0xde   : > { %8411 = vmatprep.mubr.f32.mxu0 %v11634_v39 }
  0xe1   : > { %8412 = vmatmul.mubr.f32.gmra.mrb[22].mxu0 %v11639_v44 }
  0xe2   : > { %8414 = vmatprep.mubr.f32.mxu0 %v11642_v47 }
  0xe5   : > { %8415 = vmatmul.mubr.f32.gmra.mrb[24].mxu0 %v11647_v48 }
  0xe6   : > { %8417 = vmatprep.mubr.f32.mxu0 %v11650_v53 }
  0xe9   : > { %8418 = vmatmul.mubr.f32.gmra.mrb[26].mxu0 %v11655_v54 }
  0xea   : > { %8420 = vmatprep.mubr.f32.mxu0 %v11658_v57 }
  0xed   : > { %8421 = vmatmul.mubr.f32.gmra.mrb[28].mxu0 %v11663_v62 }
  0xee   : > { %8423 = vmatprep.mubr.f32.mxu0 %v11666_v63 }
  0xf1   : > { %8424 = vmatmul.mubr.f32.gmra.mrb[30].mxu0 %v11671_v0 }
  0xf2   : > { %8458 = vmatprep.mubr.f32.mxu0 %v874_v20  ;;  %v11696_v20 = vld [vmem:[%s11296_s20 + $0x32] sm:$0xff] }
  0xf3   : > { %13454 = vst [vmem:[#allocation22_spill] sm:$0xff] %v11696_v20 }
  0xf5   : > { %8459 = vmatmul.mubr.f32.vlgmr.msra.gmra.mrb[0].mxu0 %v875_v18  ;;  %v11707_v18 = vld [vmem:[%s11296_s20 + $0x3a] sm:$0xff] }
  0xf6   : > { %8461 = vmatprep.mubr.f32.mxu0 %v11683_v17  ;;  %9849 = vmatpush3.bf16.msra.mxu0 %v9846_v26  ;;  %13455 = vst [vmem:[#allocation23_spill] sm:$0xff] %v11707_v18  ;;  %v11710_v26 = vld [vmem:[%s11296_s20 + $0x4a] sm:$0xff] }
  0xf7   : > { %9851 = vmatprep.subr.bf16.mxu0 %v9850_v16  ;;  %13456 = vst [vmem:[#allocation24_spill] sm:$0xff] %v11710_v26  ;;  %v7062_v17 = vld [vmem:[%s13356_s2 + $0x1c8] sm:$0xff] }
  0xf8   : > { %v9862_v12 = vpack.c.bf16 %v7062_v17, %v7061_v15  ;;  %v7065_v15 = vld [vmem:[%s13356_s2 + $0x1e0] sm:$0xff] }
  0xf9   : > { %8462 = vmatmul.mubr.f32.gmra.mrb[2].mxu0 %v11693_v13  ;;  %v7064_v13 = vld [vmem:[%s13356_s2 + $0x1d8] sm:$0xff] }
  0xfa   : > { %8464 = vmatprep.mubr.f32.mxu0 %v11696_v20  ;;  %9853 = vmatpush3.bf16.msra.mxu0 %v9850_v16  ;;  %v11721_v20 = vld [vmem:[%s11296_s20 + $0x52] sm:$0xff]  ;;  %v11724_v16 = vld [vmem:[%s11296_s20 + $0x62] sm:$0xff]  ;;  %v9866_v17 = vpack.c.bf16 %v7064_v13, %v7063_v22 }
  0xfb   : > { %9855 = vmatprep.subr.bf16.mxu0 %v9854_v21  ;;  %13457 = vst [vmem:[#allocation25_spill] sm:$0xff] %v11721_v20  ;;  %13458 = vst [vmem:[#allocation26_spill] sm:$0xff] %v11724_v16  ;;  %v7067_v22 = vld [vmem:[%s13356_s2 + $0x1f0] sm:$0xff] }
  0xfd   : > { %8465 = vmatmul.mubr.f32.gmra.mrb[4].mxu0 %v11707_v18  ;;  %v7066_v18 = vld [vmem:[%s13356_s2 + $0x1e8] sm:$0xff] }
  0xfe   : > { %8467 = vmatprep.mubr.f32.mxu0 %v11710_v26  ;;  %9857 = vmatpush3.bf16.msra.mxu0 %v9854_v21  ;;  %v11735_v26 = vld [vmem:[%s11296_s20 + $0x6a] sm:$0xff]  ;;  %v11738_v21 = vld [vmem:[%s11296_s20 + $0x7a] sm:$0xff]  ;;  %v9870_v13 = vpack.c.bf16 %v7066_v18, %v7065_v15 }
  0xff   : > { %9859 = vmatprep.subr.bf16.mxu0 %v9858_v14  ;;  %13459 = vst [vmem:[#allocation27_spill] sm:$0xff] %v11735_v26  ;;  %13460 = vst [vmem:[#allocation28_spill] sm:$0xff] %v11738_v21  ;;  %v7101_v15 = vld [vmem:[%s13356_s2 + $0x200] sm:$0xff] }
 0x101   : > { %8468 = vmatmul.mubr.f32.gmra.mrb[6].mxu0 %v11721_v20  ;;  %v7068_v20 = vld [vmem:[%s13356_s2 + $0x1f8] sm:$0xff] }
 0x102   : > { %8470 = vmatprep.mubr.f32.mxu0 %v11724_v16  ;;  %9861 = vmatpush3.bf16.msra.mxu0 %v9858_v14  ;;  %v11749_v16 = vld [vmem:[%s11296_s20 + $0x82] sm:$0xff]  ;;  %v11752_v14 = vld [vmem:[%s11296_s20 + $0x92] sm:$0xff]  ;;  %v9874_v18 = vpack.c.bf16 %v7068_v20, %v7067_v22  ;;  %v11785_v22 = vld [vmem:[%s11296_s20 + $0xca] sm:$0xff] }
 0x103   : > { %9863 = vmatprep.subr.bf16.mxu0 %v9862_v12  ;;  %13461 = vst [vmem:[#allocation29_spill] sm:$0xff] %v11752_v14  ;;  %13464 = vst [vmem:[#allocation32_spill] sm:$0xff] %v11785_v22 }
 0x105   : > { %8471 = vmatmul.mubr.f32.gmra.mrb[8].mxu0 %v11735_v26  ;;  %v7102_v26 = vld [vmem:[%s13356_s2 + $0x208] sm:$0xff] }
 0x106   : > { %8473 = vmatprep.mubr.f32.mxu0 %v11738_v21  ;;  %9865 = vmatpush3.bf16.msra.mxu0 %v9862_v12  ;;  %v11763_v21 = vld [vmem:[%s11296_s20 + $0x9a] sm:$0xff]  ;;  %v11766_v12 = vld [vmem:[%s11296_s20 + $0xaa] sm:$0xff]  ;;  %v9878_v20 = vpack.c.bf16 %v7102_v26, %v7101_v15  ;;  %v11796_v26 = vld [vmem:[%s11296_s20 + $0xf2] sm:$0xff] }
 0x107   : > { %9867 = vmatprep.subr.bf16.mxu0 %v9866_v17  ;;  %13462 = vst [vmem:[#allocation30_spill] sm:$0xff] %v11763_v21  ;;  %13467 = vst [vmem:[#allocation35_spill] sm:$0xff] %v11796_v26  ;;  %v11804_v15 = vld [vmem:[%s11296_s20 + $0x10a] sm:$0xff] }
 0x108   : > { %13469 = vst [vmem:[#allocation37_spill] sm:$0xff] %v11804_v15 }
 0x109   : > { %8474 = vmatmul.mubr.f32.gmra.mrb[10].mxu0 %v11749_v16 }
 0x10a   : > { %8476 = vmatprep.mubr.f32.mxu0 %v11752_v14  ;;  %9869 = vmatpush3.bf16.msra.mxu0 %v9866_v17  ;;  %v11777_v17 = vld [vmem:[%s11296_s20 + $0xb2] sm:$0xff]  ;;  %v11780_v14 = vld [vmem:[%s11296_s20 + $0xc2] sm:$0xff] }
 0x10b   : > { %9871 = vmatprep.subr.bf16.mxu0 %v9870_v13  ;;  %13463 = vst [vmem:[#allocation31_spill] sm:$0xff] %v11780_v14 }
 0x10d   : > { %8477 = vmatmul.mubr.f32.gmra.mrb[12].mxu0 %v11763_v21  ;;  %v11788_v21 = vld [vmem:[%s11296_s20 + $0xda] sm:$0xff] }
 0x10e   : > { %8479 = vmatprep.mubr.f32.mxu0 %v11766_v12  ;;  %9873 = vmatpush3.bf16.msra.mxu0 %v9870_v13  ;;  %13465 = vst [vmem:[#allocation33_spill] sm:$0xff] %v11788_v21  ;;  %v11793_v13 = vld [vmem:[%s11296_s20 + $0xe2] sm:$0xff] }
 0x10f   : > { %9875 = vmatprep.subr.bf16.mxu0 %v9874_v18  ;;  %13466 = vst [vmem:[#allocation34_spill] sm:$0xff] %v11793_v13 }
 0x111   : > { %8480 = vmatmul.mubr.f32.gmra.mrb[14].mxu0 %v11777_v17 }
 0x112   : > { %8482 = vmatprep.mubr.f32.mxu0 %v11780_v14  ;;  %9877 = vmatpush3.bf16.msra.mxu0 %v9874_v18  ;;  %v11801_v18 = vld [vmem:[%s11296_s20 + $0xfa] sm:$0xff] }
 0x113   : > { %9879 = vmatprep.subr.bf16.mxu0 %v9878_v20  ;;  %13468 = vst [vmem:[#allocation36_spill] sm:$0xff] %v11801_v18  ;;  %v11833_v14 = vld [vmem:[%s11296_s20 + $0x15a] sm:$0xff] }
 0x114   : > { %13476 = vst [vmem:[#allocation44_spill] sm:$0xff] %v11833_v14 }
 0x115   : > { %8483 = vmatmul.mubr.f32.gmra.mrb[16].mxu0 %v11785_v22  ;;  %v11812_v22 = vld [vmem:[%s11296_s20 + $0x122] sm:$0xff] }
 0x116   : > { %8485 = vmatprep.mubr.f32.mxu0 %v11788_v21  ;;  %v11809_v21 = vld [vmem:[%s11296_s20 + $0x112] sm:$0xff]  ;;  %13471 = vst [vmem:[#allocation39_spill] sm:$0xff] %v11812_v22 }
 0x117   : > { %13470 = vst [vmem:[#allocation38_spill] sm:$0xff] %v11809_v21 }
 0x119   : > { %8486 = vmatmul.mubr.f32.gmra.mrb[18].mxu0 %v11793_v13  ;;  %v11820_v13 = vld [vmem:[%s11296_s20 + $0x13a] sm:$0xff] }
 0x11a   : > { %8488 = vmatprep.mubr.f32.mxu0 %v11796_v26  ;;  %v11817_v26 = vld [vmem:[%s11296_s20 + $0x12a] sm:$0xff]  ;;  %13473 = vst [vmem:[#allocation41_spill] sm:$0xff] %v11820_v13 }
 0x11b   : > { %13472 = vst [vmem:[#allocation40_spill] sm:$0xff] %v11817_v26 }
 0x11d   : > { %8489 = vmatmul.mubr.f32.gmra.mrb[20].mxu0 %v11801_v18  ;;  %v11825_v18 = vld [vmem:[%s11296_s20 + $0x142] sm:$0xff] }
 0x11e   : > { %8491 = vmatprep.mubr.f32.mxu0 %v11804_v15  ;;  %13474 = vst [vmem:[#allocation42_spill] sm:$0xff] %v11825_v18  ;;  %v11828_v15 = vld [vmem:[%s11296_s20 + $0x152] sm:$0xff] }
 0x11f   : > { %13475 = vst [vmem:[#allocation43_spill] sm:$0xff] %v11828_v15 }
 0x121   : > { %8492 = vmatmul.mubr.f32.gmra.mrb[22].mxu0 %v11809_v21  ;;  %v11836_v21 = vld [vmem:[%s11296_s20 + $0x16a] sm:$0xff] }
 0x122   : > { %8494 = vmatprep.mubr.f32.mxu0 %v11812_v22  ;;  %13477 = vst [vmem:[#allocation45_spill] sm:$0xff] %v11836_v21  ;;  %v11841_v22 = vld [vmem:[%s11296_s20 + $0x172] sm:$0xff] }
 0x125   : > { %8495 = vmatmul.mubr.f32.gmra.mrb[24].mxu0 %v11817_v26 }
 0x126   : > { %8497 = vmatprep.mubr.f32.mxu0 %v11820_v13  ;;  %v7103_v13 = vld [vmem:[%s13356_s2 + $0x210] sm:$0xff] }
 0x129   : > { %8498 = vmatmul.mubr.f32.gmra.mrb[26].mxu0 %v11825_v18  ;;  %v7104_v18 = vld [vmem:[%s13356_s2 + $0x218] sm:$0xff] }
 0x12a   : > { %8500 = vmatprep.mubr.f32.mxu0 %v11828_v15  ;;  %v9882_v15 = vpack.c.bf16 %v7104_v18, %v7103_v13  ;;  %v7108_v13 = vld [vmem:[%s13356_s2 + $0x238] sm:$0xff]  ;;  %v7111_v18 = vld [vmem:[%s13356_s2 + $0x250] sm:$0xff] }
 0x12d   : > { %8501 = vmatmul.mubr.f32.gmra.mrb[28].mxu0 %v11833_v14  ;;  %v7105_v14 = vld [vmem:[%s13356_s2 + $0x220] sm:$0xff] }
 0x12e   : > { %8503 = vmatprep.mubr.f32.mxu0 %v11836_v21  ;;  %v7106_v21 = vld [vmem:[%s13356_s2 + $0x228] sm:$0xff] }
 0x12f   : > { %v9886_v26 = vpack.c.bf16 %v7106_v21, %v7105_v14  ;;  %v7110_v21 = vld [vmem:[%s13356_s2 + $0x248] sm:$0xff] }
 0x131   : > { %8504 = vmatmul.mubr.f32.gmra.mrb[30].mxu0 %v11841_v22 }
 0x132   : > { %8538 = vmatprep.mubr.f32.mxu0 %v11513_v23  ;;  %v7107_v23 = vld [vmem:[%s13356_s2 + $0x230] sm:$0xff] }
 0x135   : > { %8539 = vmatmul.mubr.f32.vlgmr.msra.gmra.mrb[0].mxu0 %v11523_v27  ;;  %v9890_v27 = vpack.c.bf16 %v7108_v13, %v7107_v23  ;;  %v7114_v13 = vld [vmem:[%s13356_s2 + $0x268] sm:$0xff] }
 0x136   : > { %8541 = vmatprep.mubr.f32.mxu0 %v11526_v28  ;;  %9881 = vmatpush3.bf16.msra.mxu0 %v9878_v20  ;;  %v7109_v20 = vld [vmem:[%s13356_s2 + $0x240] sm:$0xff] }
 0x137   : > { %9883 = vmatprep.subr.bf16.mxu0 %v9882_v15  ;;  %v9894_v14 = vpack.c.bf16 %v7110_v21, %v7109_v20  ;;  %v7116_v21 = vld [vmem:[%s13356_s2 + $0x278] sm:$0xff] }
 0x139   : > { %8542 = vmatmul.mubr.f32.gmra.mrb[2].mxu0 %v11537_v33 }
 0x13a   : > { %8544 = vmatprep.mubr.f32.mxu0 %v11540_v34  ;;  %9885 = vmatpush3.bf16.msra.mxu0 %v9882_v15  ;;  %v7112_v15 = vld [vmem:[%s13356_s2 + $0x258] sm:$0xff] }
 0x13b   : > { %9887 = vmatprep.subr.bf16.mxu0 %v9886_v26  ;;  %v9898_v23 = vpack.c.bf16 %v7112_v15, %v7111_v18  ;;  %v7150_v15 = vld [vmem:[%s13356_s2 + $0x288] sm:$0xff] }
 0x13d   : > { %8545 = vmatmul.mubr.f32.gmra.mrb[4].mxu0 %v11551_v42 }
 0x13e   : > { %8547 = vmatprep.mubr.f32.mxu0 %v11554_v43  ;;  %9889 = vmatpush3.bf16.msra.mxu0 %v9886_v26  ;;  %v7113_v26 = vld [vmem:[%s13356_s2 + $0x260] sm:$0xff] }
 0x13f   : > { %9891 = vmatprep.subr.bf16.mxu0 %v9890_v27  ;;  %v9902_v20 = vpack.c.bf16 %v7114_v13, %v7113_v26  ;;  %v11927_v13 = vld [vmem:[%s11296_s20 + $0x188] sm:$0xff] }
 0x141   : > { %8548 = vmatmul.mubr.f32.gmra.mrb[6].mxu0 %v11565_v49 }
 0x142   : > { %8550 = vmatprep.mubr.f32.mxu0 %v11568_v52  ;;  %9893 = vmatpush3.bf16.msra.mxu0 %v9890_v27  ;;  %v7115_v27 = vld [vmem:[%s13356_s2 + $0x270] sm:$0xff] }
 0x143   : > { %9895 = vmatprep.subr.bf16.mxu0 %v9894_v14  ;;  %v9906_v18 = vpack.c.bf16 %v7116_v21, %v7115_v27  ;;  %v7152_v27 = vld [vmem:[%s13356_s2 + $0x298] sm:$0xff] }
 0x145   : > { %8551 = vmatmul.mubr.f32.gmra.mrb[8].mxu0 %v11579_v58 }
 0x146   : > { %8553 = vmatprep.mubr.f32.mxu0 %v11582_v59  ;;  %9897 = vmatpush3.bf16.msra.mxu0 %v9894_v14  ;;  %v7149_v14 = vld [vmem:[%s13356_s2 + $0x280] sm:$0xff] }
 0x147   : > { %9899 = vmatprep.subr.bf16.mxu0 %v9898_v23  ;;  %v9910_v26 = vpack.c.bf16 %v7150_v15, %v7149_v14  ;;  %v7154_v14 = vld [vmem:[%s13356_s2 + $0x2a8] sm:$0xff] }
 0x149   : > { %8554 = vmatmul.mubr.f32.gmra.mrb[10].mxu0 %v11593_v3 }
 0x14a   : > { %8556 = vmatprep.mubr.f32.mxu0 %v11596_v19  ;;  %9901 = vmatpush3.bf16.msra.mxu0 %v9898_v23  ;;  %v11922_v23 = vld [vmem:[%s11296_s20 + $0x180] sm:$0xff] }
 0x14b   : > { %9903 = vmatprep.subr.bf16.mxu0 %v9902_v20 }
 0x14d   : > { %8557 = vmatmul.mubr.f32.gmra.mrb[12].mxu0 %v11607_v24 }
 0x14e   : > { %8559 = vmatprep.mubr.f32.mxu0 %v11610_v25  ;;  %9905 = vmatpush3.bf16.msra.mxu0 %v9902_v20  ;;  %v7151_v20 = vld [vmem:[%s13356_s2 + $0x290] sm:$0xff] }
 0x14f   : > { %9907 = vmatprep.subr.bf16.mxu0 %v9906_v18  ;;  %v9914_v21 = vpack.c.bf16 %v7152_v27, %v7151_v20  ;;  %v7156_v20 = vld [vmem:[%s13356_s2 + $0x2b8] sm:$0xff] }
 0x150   : > { %v7160_v27 = vld [vmem:[%s13356_s2 + $0x2d8] sm:$0xff] }
 0x151   : > { %8560 = vmatmul.mubr.f32.gmra.mrb[14].mxu0 %v11615_v29 }
 0x152   : > { %8562 = vmatprep.mubr.f32.mxu0 %v11618_v30  ;;  %9909 = vmatpush3.bf16.msra.mxu0 %v9906_v18  ;;  %v7153_v18 = vld [vmem:[%s13356_s2 + $0x2a0] sm:$0xff] }
 0x153   : > { %9911 = vmatprep.subr.bf16.mxu0 %v9910_v26  ;;  %v9918_v15 = vpack.c.bf16 %v7154_v14, %v7153_v18  ;;  %v7164_v18 = vld [vmem:[%s13356_s2 + $0x2f8] sm:$0xff]  ;;  %v7198_v14 = vld [vmem:[%s13356_s2 + $0x308] sm:$0xff] }
 0x155   : > { %8563 = vmatmul.mubr.f32.gmra.mrb[16].mxu0 %v11623_v32 }
 0x156   : > { %8565 = vmatprep.mubr.f32.mxu0 %v11626_v37 }
 0x159   : > { %8566 = vmatmul.mubr.f32.gmra.mrb[18].mxu0 %v11631_v38 }
 0x15a   : > { %8568 = vmatprep.mubr.f32.mxu0 %v11634_v39 }
 0x15d   : > { %8569 = vmatmul.mubr.f32.gmra.mrb[20].mxu0 %v11639_v44 }
 0x15e   : > { %8571 = vmatprep.mubr.f32.mxu0 %v11642_v47 }
 0x161   : > { %8572 = vmatmul.mubr.f32.gmra.mrb[22].mxu0 %v11647_v48 }
 0x162   : > { %8574 = vmatprep.mubr.f32.mxu0 %v11650_v53 }
 0x165   : > { %8575 = vmatmul.mubr.f32.gmra.mrb[24].mxu0 %v11655_v54 }
 0x166   : > { %8577 = vmatprep.mubr.f32.mxu0 %v11658_v57 }
 0x169   : > { %8578 = vmatmul.mubr.f32.gmra.mrb[26].mxu0 %v11663_v62 }
 0x16a   : > { %8580 = vmatprep.mubr.f32.mxu0 %v11666_v63 }
 0x16d   : > { %8581 = vmatmul.mubr.f32.gmra.mrb[28].mxu0 %v11671_v0 }
 0x16e   : > { %8583 = vmatprep.mubr.f32.mxu0 %v11922_v23 }
 0x171   : > { %8584 = vmatmul.mubr.f32.gmra.mrb[30].mxu0 %v11927_v13 }
 0x172   : > { %8618 = vmatprep.mubr.f32.mxu0 %v11343_v31  ;;  %v7155_v31 = vld [vmem:[%s13356_s2 + $0x2b0] sm:$0xff] }
 0x175   : > { %8619 = vmatmul.mubr.f32.vlgmr.msra.gmra.mrb[0].mxu0 %v11353_v35  ;;  %v9922_v35 = vpack.c.bf16 %v7156_v20, %v7155_v31  ;;  %v7201_v20 = vld [vmem:[%s13356_s2 + $0x320] sm:$0xff] }
 0x176   : > { %8621 = vmatprep.mubr.f32.mxu0 %v11356_v36  ;;  %9913 = vmatpush3.bf16.msra.mxu0 %v9910_v26  ;;  %v7157_v36 = vld [vmem:[%s13356_s2 + $0x2c0] sm:$0xff]  ;;  %v7158_v26 = vld [vmem:[%s13356_s2 + $0x2c8] sm:$0xff] }
 0x177   : > { %9915 = vmatprep.subr.bf16.mxu0 %v9914_v21 }
 0x179   : > { %8622 = vmatmul.mubr.f32.gmra.mrb[2].mxu0 %v11367_v40  ;;  %v9926_v40 = vpack.c.bf16 %v7158_v26, %v7157_v36  ;;  %v13486_v36 = vld [vmem:[#allocation21_spill] sm:$0xff]  ;;  %v13487_v26 = vld [vmem:[#allocation22_spill] sm:$0xff] }
 0x17a   : > { %8624 = vmatprep.mubr.f32.mxu0 %v11370_v41  ;;  %9917 = vmatpush3.bf16.msra.mxu0 %v9914_v21  ;;  %v7159_v41 = vld [vmem:[%s13356_s2 + $0x2d0] sm:$0xff]  ;;  %v7162_v21 = vld [vmem:[%s13356_s2 + $0x2e8] sm:$0xff] }
 0x17b   : > { %9919 = vmatprep.subr.bf16.mxu0 %v9918_v15 }
 0x17d   : > { %8625 = vmatmul.mubr.f32.gmra.mrb[4].mxu0 %v11381_v45  ;;  %v9930_v45 = vpack.c.bf16 %v7160_v27, %v7159_v41  ;;  %v7203_v41 = vld [vmem:[%s13356_s2 + $0x330] sm:$0xff]  ;;  %v7204_v27 = vld [vmem:[%s13356_s2 + $0x338] sm:$0xff] }
 0x17e   : > { %8627 = vmatprep.mubr.f32.mxu0 %v11384_v46  ;;  %9921 = vmatpush3.bf16.msra.mxu0 %v9918_v15  ;;  %v7161_v46 = vld [vmem:[%s13356_s2 + $0x2e0] sm:$0xff]  ;;  %v13485_v15 = vld [vmem:[#allocation20_spill] sm:$0xff] }
 0x17f   : > { %9923 = vmatprep.subr.bf16.mxu0 %v9922_v35 }
 0x181   : > { %8628 = vmatmul.mubr.f32.gmra.mrb[6].mxu0 %v11395_v50  ;;  %v9934_v50 = vpack.c.bf16 %v7162_v21, %v7161_v46  ;;  %v13489_v46 = vld [vmem:[#allocation24_spill] sm:$0xff]  ;;  %v9954_v21 = vpack.c.bf16 %v7204_v27, %v7203_v41  ;;  %v13500_v41 = vld [vmem:[#allocation35_spill] sm:$0xff] }
 0x182   : > { %8630 = vmatprep.mubr.f32.mxu0 %v11398_v51  ;;  %9925 = vmatpush3.bf16.msra.mxu0 %v9922_v35  ;;  %v7163_v51 = vld [vmem:[%s13356_s2 + $0x2f0] sm:$0xff]  ;;  %v7202_v35 = vld [vmem:[%s13356_s2 + $0x328] sm:$0xff] }
 0x183   : > { %9927 = vmatprep.subr.bf16.mxu0 %v9926_v40  ;;  %v13501_v27 = vld [vmem:[#allocation36_spill] sm:$0xff] }
 0x185   : > { %8631 = vmatmul.mubr.f32.gmra.mrb[8].mxu0 %v11409_v55  ;;  %v9938_v55 = vpack.c.bf16 %v7164_v18, %v7163_v51  ;;  %v7206_v51 = vld [vmem:[%s13356_s2 + $0x348] sm:$0xff]  ;;  %v13490_v18 = vld [vmem:[#allocation25_spill] sm:$0xff] }
 0x186   : > { %8633 = vmatprep.mubr.f32.mxu0 %v11412_v56  ;;  %9929 = vmatpush3.bf16.msra.mxu0 %v9926_v40  ;;  %v7197_v56 = vld [vmem:[%s13356_s2 + $0x300] sm:$0xff]  ;;  %v9950_v40 = vpack.c.bf16 %v7202_v35, %v7201_v20  ;;  %v7246_v20 = vld [vmem:[%s13356_s2 + $0x388] sm:$0xff] }
 0x187   : > { %9931 = vmatprep.subr.bf16.mxu0 %v9930_v45  ;;  %v13496_v35 = vld [vmem:[#allocation31_spill] sm:$0xff] }
 0x189   : > { %8634 = vmatmul.mubr.f32.gmra.mrb[10].mxu0 %v11423_v60  ;;  %v9942_v60 = vpack.c.bf16 %v7198_v14, %v7197_v56  ;;  %v7207_v14 = vld [vmem:[%s13356_s2 + $0x350] sm:$0xff] }
 0x18a   : > { %8636 = vmatprep.mubr.f32.mxu0 %v11426_v61  ;;  %9933 = vmatpush3.bf16.msra.mxu0 %v9930_v45  ;;  %v13478_v61 = vld [vmem:[#allocation13_spill] sm:$0xff]  ;;  %v13488_v45 = vld [vmem:[#allocation23_spill] sm:$0xff] }
 0x18b   : > { %9935 = vmatprep.subr.bf16.mxu0 %v9934_v50 }
 0x18d   : > { %8637 = vmatmul.mubr.f32.gmra.mrb[12].mxu0 %v11437_v1  ;;  %v13479_v1 = vld [vmem:[#allocation14_spill] sm:$0xff] }
 0x18e   : > { %8639 = vmatprep.mubr.f32.mxu0 %v11440_v2  ;;  %9937 = vmatpush3.bf16.msra.mxu0 %v9934_v50  ;;  %v13480_v2 = vld [vmem:[#allocation15_spill] sm:$0xff] }
 0x18f   : > { %9939 = vmatprep.subr.bf16.mxu0 %v9938_v55  ;;  %v7205_v50 = vld [vmem:[%s13356_s2 + $0x340] sm:$0xff] }
 0x190   : > { %v9958_v56 = vpack.c.bf16 %v7206_v51, %v7205_v50  ;;  %v13506_v50 = vld [vmem:[#allocation41_spill] sm:$0xff]  ;;  %v13507_v51 = vld [vmem:[#allocation42_spill] sm:$0xff] }
 0x191   : > { %8640 = vmatmul.mubr.f32.gmra.mrb[14].mxu0 %v11445_v4  ;;  %v13481_v4 = vld [vmem:[#allocation16_spill] sm:$0xff] }
 0x192   : > { %8642 = vmatprep.mubr.f32.mxu0 %v11448_v5  ;;  %9941 = vmatpush3.bf16.msra.mxu0 %v9938_v55  ;;  %v13482_v5 = vld [vmem:[#allocation17_spill] sm:$0xff]  ;;  %v13491_v55 = vld [vmem:[#allocation26_spill] sm:$0xff] }
 0x193   : > { %9943 = vmatprep.subr.bf16.mxu0 %v9942_v60 }
 0x195   : > { %8643 = vmatmul.mubr.f32.gmra.mrb[16].mxu0 %v11453_v6  ;;  %v13483_v6 = vld [vmem:[#allocation18_spill] sm:$0xff] }
 0x196   : > { %8645 = vmatprep.mubr.f32.mxu0 %v11456_v7  ;;  %v12008_v7 = vld [vmem:[%s11296_s20 + $0x181] sm:$0xff] }
 0x199   : > { %8646 = vmatmul.mubr.f32.gmra.mrb[18].mxu0 %v11461_v8  ;;  %v13484_v8 = vld [vmem:[#allocation19_spill] sm:$0xff] }
 0x19a   : > { %8648 = vmatprep.mubr.f32.mxu0 %v11464_v9  ;;  %v12013_v9 = vld [vmem:[%s11296_s20 + $0x189] sm:$0xff] }
 0x19d   : > { %8649 = vmatmul.mubr.f32.gmra.mrb[20].mxu0 %v11469_v10  ;;  %v7199_v10 = vld [vmem:[%s13356_s2 + $0x310] sm:$0xff] }
 0x19e   : > { %8651 = vmatprep.mubr.f32.mxu0 %v11472_v11  ;;  %v7200_v11 = vld [vmem:[%s13356_s2 + $0x318] sm:$0xff] }
 0x19f   : > { %v9946_v31 = vpack.c.bf16 %v7200_v11, %v7199_v10  ;;  %v7211_v10 = vld [vmem:[%s13356_s2 + $0x370] sm:$0xff]  ;;  %v7212_v11 = vld [vmem:[%s13356_s2 + $0x378] sm:$0xff] }
 0x1a1   : > { %8652 = vmatmul.mubr.f32.gmra.mrb[22].mxu0 %v13478_v61  ;;  %v13492_v61 = vld [vmem:[#allocation27_spill] sm:$0xff] }
 0x1a2   : > { %8654 = vmatprep.mubr.f32.mxu0 %v13479_v1  ;;  %v13493_v1 = vld [vmem:[#allocation28_spill] sm:$0xff] }
 0x1a5   : > { %8655 = vmatmul.mubr.f32.gmra.mrb[24].mxu0 %v13480_v2 }
 0x1a6   : > { %8657 = vmatprep.mubr.f32.mxu0 %v13481_v4  ;;  %v7209_v4 = vld [vmem:[%s13356_s2 + $0x360] sm:$0xff] }
 0x1a9   : > { %8658 = vmatmul.mubr.f32.gmra.mrb[26].mxu0 %v13482_v5  ;;  %v7210_v5 = vld [vmem:[%s13356_s2 + $0x368] sm:$0xff] }
 0x1aa   : > { %8660 = vmatprep.mubr.f32.mxu0 %v13483_v6  ;;  %v13494_v6 = vld [vmem:[#allocation29_spill] sm:$0xff] }
 0x1ad   : > { %8661 = vmatmul.mubr.f32.gmra.mrb[28].mxu0 %v13484_v8  ;;  %v9966_v8 = vpack.c.bf16 %v7210_v5, %v7209_v4  ;;  %v7250_v4 = vld [vmem:[%s13356_s2 + $0x3a8] sm:$0xff] }
 0x1ae   : > { %8663 = vmatprep.mubr.f32.mxu0 %v12008_v7 }
 0x1b1   : > { %8664 = vmatmul.mubr.f32.gmra.mrb[30].mxu0 %v12013_v9 }
 0x1b2   : > { %8698 = vmatprep.mubr.f32.mxu0 %v13485_v15  ;;  %v13495_v15 = vld [vmem:[#allocation30_spill] sm:$0xff] }
 0x1b5   : > { %8699 = vmatmul.mubr.f32.vlgmr.msra.gmra.mrb[0].mxu0 %v13486_v36 }
 0x1b6   : > { %8701 = vmatprep.mubr.f32.mxu0 %v13487_v26  ;;  %9945 = vmatpush3.bf16.msra.mxu0 %v9942_v60  ;;  %v7208_v60 = vld [vmem:[%s13356_s2 + $0x358] sm:$0xff]  ;;  %v13497_v26 = vld [vmem:[#allocation32_spill] sm:$0xff] }
 0x1b7   : > { %9947 = vmatprep.subr.bf16.mxu0 %v9946_v31  ;;  %v9962_v2 = vpack.c.bf16 %v7208_v60, %v7207_v14  ;;  %v12094_v14 = vld [vmem:[%s11296_s20 + $0x182] sm:$0xff]  ;;  %v12099_v60 = vld [vmem:[%s11296_s20 + $0x18a] sm:$0xff] }
 0x1b9   : > { %8702 = vmatmul.mubr.f32.gmra.mrb[2].mxu0 %v13488_v45  ;;  %v13503_v45 = vld [vmem:[#allocation38_spill] sm:$0xff] }
 0x1ba   : > { %8704 = vmatprep.mubr.f32.mxu0 %v13489_v46  ;;  %9949 = vmatpush3.bf16.msra.mxu0 %v9946_v31  ;;  %v7245_v31 = vld [vmem:[%s13356_s2 + $0x380] sm:$0xff] }
 0x1bb   : > { %9951 = vmatprep.subr.bf16.mxu0 %v9950_v40  ;;  %v9974_v36 = vpack.c.bf16 %v7246_v20, %v7245_v31  ;;  %v13504_v46 = vld [vmem:[#allocation39_spill] sm:$0xff]  ;;  %v7216_v31 = vld [vmem:[%s11296_s20 + $0x51] sm:$0xff] }
 0x1bc   : > { %v7217_v20 = vld [vmem:[%s11296_s20 + $0x61] sm:$0xff] }
 0x1bd   : > { %8705 = vmatmul.mubr.f32.gmra.mrb[4].mxu0 %v13490_v18  ;;  %v13508_v18 = vld [vmem:[#allocation43_spill] sm:$0xff] }
 0x1be   : > { %8707 = vmatprep.mubr.f32.mxu0 %v13491_v55  ;;  %9953 = vmatpush3.bf16.msra.mxu0 %v9950_v40  ;;  %v13499_v40 = vld [vmem:[#allocation34_spill] sm:$0xff]  ;;  %v13509_v55 = vld [vmem:[#allocation44_spill] sm:$0xff] }
 0x1bf   : > { %9955 = vmatprep.subr.bf16.mxu0 %v9954_v21 }
 0x1c1   : > { %8708 = vmatmul.mubr.f32.gmra.mrb[6].mxu0 %v13492_v61  ;;  %v7247_v61 = vld [vmem:[%s13356_s2 + $0x390] sm:$0xff] }
 0x1c2   : > { %8710 = vmatprep.mubr.f32.mxu0 %v13493_v1  ;;  %9957 = vmatpush3.bf16.msra.mxu0 %v9954_v21  ;;  %v13505_v21 = vld [vmem:[#allocation40_spill] sm:$0xff]  ;;  %v7248_v1 = vld [vmem:[%s13356_s2 + $0x398] sm:$0xff] }
 0x1c3   : > { %9959 = vmatprep.subr.bf16.mxu0 %v9958_v56 }
 0x1c5   : > { %8711 = vmatmul.mubr.f32.gmra.mrb[8].mxu0 %v11749_v16  ;;  %v9970_v16 = vpack.c.bf16 %v7212_v11, %v7211_v10  ;;  %v7256_v10 = vld [vmem:[%s13356_s2 + $0x3d8] sm:$0xff]  ;;  %v7258_v11 = vld [vmem:[%s13356_s2 + $0x3e8] sm:$0xff] }
 0x1c6   : > { %8713 = vmatprep.mubr.f32.mxu0 %v13494_v6  ;;  %9961 = vmatpush3.bf16.msra.mxu0 %v9958_v56  ;;  %v13510_v56 = vld [vmem:[#allocation45_spill] sm:$0xff]  ;;  %v7252_v6 = vld [vmem:[%s13356_s2 + $0x3b8] sm:$0xff] }
 0x1c7   : > { %9963 = vmatprep.subr.bf16.mxu0 %v9962_v2 }
 0x1c9   : > { %8714 = vmatmul.mubr.f32.gmra.mrb[10].mxu0 %v13495_v15  ;;  %v7260_v15 = vld [vmem:[%s13356_s2 + $0x3f8] sm:$0xff] }
 0x1ca   : > { %8716 = vmatprep.mubr.f32.mxu0 %v11766_v12  ;;  %9965 = vmatpush3.bf16.msra.mxu0 %v9962_v2  ;;  %v13498_v12 = vld [vmem:[#allocation33_spill] sm:$0xff]  ;;  %v9978_v2 = vpack.c.bf16 %v7248_v1, %v7247_v61 }
 0x1cb   : > { %9967 = vmatprep.subr.bf16.mxu0 %v9966_v8 }
 0x1cd   : > { %8717 = vmatmul.mubr.f32.gmra.mrb[12].mxu0 %v11777_v17  ;;  %v13502_v17 = vld [vmem:[#allocation37_spill] sm:$0xff] }
 0x1ce   : > { %8719 = vmatprep.mubr.f32.mxu0 %v13496_v35  ;;  %9969 = vmatpush3.bf16.msra.mxu0 %v9966_v8  ;;  %v7254_v8 = vld [vmem:[%s13356_s2 + $0x3c8] sm:$0xff] }
 0x1cf   : > { %9971 = vmatprep.subr.bf16.mxu0 %v9970_v16 }
 0x1d1   : > { %8720 = vmatmul.mubr.f32.gmra.mrb[14].mxu0 %v13497_v26 }
 0x1d2   : > { %8722 = vmatprep.mubr.f32.mxu0 %v13498_v12  ;;  %9973 = vmatpush3.bf16.msra.mxu0 %v9970_v16  ;;  %v7294_v16 = vld [vmem:[%s13356_s2 + $0x408] sm:$0xff]  ;;  %v7300_v12 = vld [vmem:[%s13356_s2 + $0x438] sm:$0xff] }
 0x1d3   : > { %9975 = vmatprep.subr.bf16.mxu0 %v9974_v36 }
 0x1d5   : > { %8723 = vmatmul.mubr.f32.gmra.mrb[16].mxu0 %v13499_v40  ;;  %v3298_v40 = vld [vmem:[#allocation3 + $0xb0] sm:$0xff] }
 0x1d6   : > { %8725 = vmatprep.mubr.f32.mxu0 %v13500_v41  ;;  %v3299_v41 = vld [vmem:[#allocation3 + $0xb8] sm:$0xff] }
 0x1d9   : > { %8726 = vmatmul.mubr.f32.gmra.mrb[18].mxu0 %v13501_v27  ;;  %v7218_v27 = vld [vmem:[%s11296_s20 + $0x69] sm:$0xff] }
 0x1da   : > { %8728 = vmatprep.mubr.f32.mxu0 %v13502_v17  ;;  %v7219_v17 = vld [vmem:[%s11296_s20 + $0x79] sm:$0xff] }
 0x1dd   : > { %8729 = vmatmul.mubr.f32.gmra.mrb[20].mxu0 %v13503_v45 }
 0x1de   : > { %8731 = vmatprep.mubr.f32.mxu0 %v13504_v46  ;;  %v7301_v46 = vld [vmem:[%s13356_s2 + $0x440] sm:$0xff] }
 0x1e1   : > { %8732 = vmatmul.mubr.f32.gmra.mrb[22].mxu0 %v13505_v21  ;;  %v10050_v21 = vpack.c.bf16 %v3299_v41, %v3298_v40  ;;  %v7279_v40 = vld [vmem:[%s11296_s20 + $0x10a] sm:$0xff]  ;;  %v7280_v41 = vld [vmem:[%s11296_s20 + $0x112] sm:$0xff] }
 0x1e2   : > { %8734 = vmatprep.mubr.f32.mxu0 %v13506_v50  ;;  %v7302_v50 = vld [vmem:[%s13356_s2 + $0x448] sm:$0xff] }
 0x1e3   : > { %v10022_v61 = vpack.c.bf16 %v7302_v50, %v7301_v46  ;;  %v7284_v46 = vld [vmem:[%s11296_s20 + $0x142] sm:$0xff]  ;;  %v7286_v50 = vld [vmem:[%s11296_s20 + $0x15a] sm:$0xff] }
 0x1e5   : > { %8735 = vmatmul.mubr.f32.gmra.mrb[24].mxu0 %v13507_v51  ;;  %v3300_v51 = vld [vmem:[#allocation3 + $0xc0] sm:$0xff] }
 0x1e6   : > { %8737 = vmatprep.mubr.f32.mxu0 %v13508_v18  ;;  %v3301_v18 = vld [vmem:[#allocation3 + $0xc8] sm:$0xff] }
 0x1e7   : > { %v10054_v1 = vpack.c.bf16 %v3301_v18, %v3300_v51  ;;  %v7287_v51 = vld [vmem:[%s11296_s20 + $0x16a] sm:$0xff]  ;;  %v7288_v18 = vld [vmem:[%s11296_s20 + $0x172] sm:$0xff] }
 0x1e9   : > { %8738 = vmatmul.mubr.f32.gmra.mrb[26].mxu0 %v13509_v55  ;;  %v7220_v55 = vld [vmem:[%s11296_s20 + $0x81] sm:$0xff] }
 0x1ea   : > { %8740 = vmatprep.mubr.f32.mxu0 %v13510_v56  ;;  %v7221_v56 = vld [vmem:[%s11296_s20 + $0x91] sm:$0xff] }
 0x1ed   : > { %8741 = vmatmul.mubr.f32.gmra.mrb[28].mxu0 %v11841_v22  ;;  %v7249_v22 = vld [vmem:[%s13356_s2 + $0x3a0] sm:$0xff] }
 0x1ee   : > { %8743 = vmatprep.mubr.f32.mxu0 %v12094_v14  ;;  %v9982_v5 = vpack.c.bf16 %v7250_v4, %v7249_v22  ;;  %v7304_v22 = vld [vmem:[%s13356_s2 + $0x458] sm:$0xff] }
 0x1ef   : > { %v7222_v4 = vld [vmem:[%s11296_s20 + $0x99] sm:$0xff] }
 0x1f1   : > { %8744 = vmatmul.mubr.f32.gmra.mrb[30].mxu0 %v12099_v60 }
 0x1f2   : > { %8778 = vmatprep.mubr.f32.mxu0 %v11526_v28  ;;  %v7251_v28 = vld [vmem:[%s13356_s2 + $0x3b0] sm:$0xff] }
 0x1f5   : > { %8779 = vmatmul.mubr.f32.vlgmr.msra.gmra.mrb[0].mxu0 %v11537_v33  ;;  %v9986_v33 = vpack.c.bf16 %v7252_v6, %v7251_v28  ;;  %v7305_v6 = vld [vmem:[%s13356_s2 + $0x460] sm:$0xff] }
 0x1f6   : > { %8781 = vmatprep.mubr.f32.mxu0 %v11540_v34  ;;  %9977 = vmatpush3.bf16.msra.mxu0 %v9974_v36  ;;  %v7253_v34 = vld [vmem:[%s13356_s2 + $0x3c0] sm:$0xff]  ;;  %v7299_v36 = vld [vmem:[%s13356_s2 + $0x430] sm:$0xff] }
 0x1f7   : > { %9979 = vmatprep.subr.bf16.mxu0 %v9978_v2  ;;  %v10018_v45 = vpack.c.bf16 %v7300_v12, %v7299_v36  ;;  %v7276_v36 = vld [vmem:[%s11296_s20 + $0xe2] sm:$0xff]  ;;  %v7278_v12 = vld [vmem:[%s11296_s20 + $0xfa] sm:$0xff] }
 0x1f9   : > { %8782 = vmatmul.mubr.f32.gmra.mrb[2].mxu0 %v11551_v42  ;;  %v9990_v42 = vpack.c.bf16 %v7254_v8, %v7253_v34  ;;  %v7224_v34 = vld [vmem:[%s11296_s20 + $0xb1] sm:$0xff]  ;;  %v7225_v8 = vld [vmem:[%s11296_s20 + $0xc1] sm:$0xff] }
 0x1fa   : > { %8784 = vmatprep.mubr.f32.mxu0 %v11554_v43  ;;  %9981 = vmatpush3.bf16.msra.mxu0 %v9978_v2  ;;  %v7255_v43 = vld [vmem:[%s13356_s2 + $0x3d0] sm:$0xff] }
 0x1fb   : > { %9983 = vmatprep.subr.bf16.mxu0 %v9982_v5  ;;  %v7303_v2 = vld [vmem:[%s13356_s2 + $0x450] sm:$0xff] }
 0x1fc   : > { %v10026_v28 = vpack.c.bf16 %v7304_v22, %v7303_v2  ;;  %v3304_v22 = vld [vmem:[#allocation3 + $0xe0] sm:$0xff] }
 0x1fd   : > { %8785 = vmatmul.mubr.f32.gmra.mrb[4].mxu0 %v11565_v49  ;;  %v9994_v49 = vpack.c.bf16 %v7256_v10, %v7255_v43  ;;  %v7307_v43 = vld [vmem:[%s13356_s2 + $0x470] sm:$0xff]  ;;  %v7308_v10 = vld [vmem:[%s13356_s2 + $0x478] sm:$0xff] }
 0x1fe   : > { %8787 = vmatprep.mubr.f32.mxu0 %v11568_v52  ;;  %9985 = vmatpush3.bf16.msra.mxu0 %v9982_v5  ;;  %v7257_v52 = vld [vmem:[%s13356_s2 + $0x3e0] sm:$0xff]  ;;  %v7223_v5 = vld [vmem:[%s11296_s20 + $0xa9] sm:$0xff] }
 0x1ff   : > { %9987 = vmatprep.subr.bf16.mxu0 %v9986_v33 }
 0x201   : > { %8788 = vmatmul.mubr.f32.gmra.mrb[6].mxu0 %v11579_v58  ;;  %v9998_v58 = vpack.c.bf16 %v7258_v11, %v7257_v52  ;;  %v7227_v52 = vld [vmem:[%s11296_s20 + $0xd9] sm:$0xff]  ;;  %v10034_v11 = vpack.c.bf16 %v7308_v10, %v7307_v43 }
 0x202   : > { %8790 = vmatprep.mubr.f32.mxu0 %v11582_v59  ;;  %9989 = vmatpush3.bf16.msra.mxu0 %v9986_v33  ;;  %v7259_v59 = vld [vmem:[%s13356_s2 + $0x3f0] sm:$0xff]  ;;  %v7306_v33 = vld [vmem:[%s13356_s2 + $0x468] sm:$0xff]  ;;  %v3245_v10 = vld [vmem:[#allocation3 + $0x10] sm:$0xff] }
 0x203   : > { %9991 = vmatprep.subr.bf16.mxu0 %v9990_v42 }
 0x205   : > { %8791 = vmatmul.mubr.f32.gmra.mrb[8].mxu0 %v11593_v3  ;;  %v10002_v3 = vpack.c.bf16 %v7260_v15, %v7259_v59  ;;  %v7229_v59 = vld [vmem:[%s11296_s20 + $0xf1] sm:$0xff]  ;;  %v7230_v15 = vld [vmem:[%s11296_s20 + $0xf9] sm:$0xff] }
 0x206   : > { %8793 = vmatprep.mubr.f32.mxu0 %v11596_v19  ;;  %9993 = vmatpush3.bf16.msra.mxu0 %v9990_v42  ;;  %v7293_v19 = vld [vmem:[%s13356_s2 + $0x400] sm:$0xff]  ;;  %v10030_v42 = vpack.c.bf16 %v7306_v33, %v7305_v6 }
 0x207   : > { %9995 = vmatprep.subr.bf16.mxu0 %v9994_v49 }
 0x209   : > { %8794 = vmatmul.mubr.f32.gmra.mrb[10].mxu0 %v11607_v24  ;;  %v10006_v24 = vpack.c.bf16 %v7294_v16, %v7293_v19  ;;  %v7232_v19 = vld [vmem:[%s11296_s20 + $0x111] sm:$0xff]  ;;  %v7233_v16 = vld [vmem:[%s11296_s20 + $0x121] sm:$0xff] }
 0x20a   : > { %8796 = vmatprep.mubr.f32.mxu0 %v11610_v25  ;;  %9997 = vmatpush3.bf16.msra.mxu0 %v9994_v49  ;;  %v7195_v25 = vld [vmem:[%s11296_s20 + $0x198] sm:$0xff]  ;;  %v7226_v49 = vld [vmem:[%s11296_s20 + $0xc9] sm:$0xff] }
 0x20b   : > { %9999 = vmatprep.subr.bf16.mxu0 %v9998_v58 }
 0x20d   : > { %8797 = vmatmul.mubr.f32.gmra.mrb[12].mxu0 %v11615_v29  ;;  %v7196_v29 = vld [vmem:[%s11296_s20 + $0x1a0] sm:$0xff] }
 0x20e   : > { %8799 = vmatprep.mubr.f32.mxu0 %v11618_v30  ;;  %10001 = vmatpush3.bf16.msra.mxu0 %v9998_v58  ;;  %v7213_v30 = vld [vmem:[%s11296_s20 + $0x31] sm:$0xff]  ;;  %v7228_v58 = vld [vmem:[%s11296_s20 + $0xe1] sm:$0xff] }
 0x20f   : > { %10003 = vmatprep.subr.bf16.mxu0 %v10002_v3 }
 0x211   : > { %8800 = vmatmul.mubr.f32.gmra.mrb[14].mxu0 %v11623_v32  ;;  %v7295_v32 = vld [vmem:[%s13356_s2 + $0x410] sm:$0xff] }
 0x212   : > { %8802 = vmatprep.mubr.f32.mxu0 %v11626_v37  ;;  %10005 = vmatpush3.bf16.msra.mxu0 %v10002_v3  ;;  %v7296_v37 = vld [vmem:[%s13356_s2 + $0x418] sm:$0xff]  ;;  %v7231_v3 = vld [vmem:[%s11296_s20 + $0x109] sm:$0xff] }
 0x213   : > { %10007 = vmatprep.subr.bf16.mxu0 %v10006_v24 }
 0x215   : > { %8803 = vmatmul.mubr.f32.gmra.mrb[16].mxu0 %v11631_v38  ;;  %v3292_v38 = vld [vmem:[#allocation3 + $0x80] sm:$0xff] }
 0x216   : > { %8805 = vmatprep.mubr.f32.mxu0 %v11634_v39  ;;  %v3293_v39 = vld [vmem:[#allocation3 + $0x88] sm:$0xff] }
 0x219   : > { %8806 = vmatmul.mubr.f32.gmra.mrb[18].mxu0 %v11639_v44  ;;  %v3294_v44 = vld [vmem:[#allocation3 + $0x90] sm:$0xff] }
 0x21a   : > { %8808 = vmatprep.mubr.f32.mxu0 %v11642_v47  ;;  %v7214_v47 = vld [vmem:[%s11296_s20 + $0x39] sm:$0xff] }
 0x21d   : > { %8809 = vmatmul.mubr.f32.gmra.mrb[20].mxu0 %v11647_v48  ;;  %v10038_v48 = vpack.c.bf16 %v3293_v39, %v3292_v38  ;;  %v7240_v38 = vld [vmem:[%s11296_s20 + $0x171] sm:$0xff]  ;;  %v7243_v39 = vld [vmem:[%s11296_s20 + $0x199] sm:$0xff] }
 0x21e   : > { %8811 = vmatprep.mubr.f32.mxu0 %v11650_v53  ;;  %v3295_v53 = vld [vmem:[#allocation3 + $0x98] sm:$0xff] }
 0x21f   : > { %10039 = vmatprep.subr.bf16.mxu1 %v10038_v48 }
 0x220   : > { %10041 = vmatpush3.bf16.msra.mxu1 %v10038_v48  ;;  %v7262_v48 = vld [vmem:[%s11296_s20 + $0x3a] sm:$0xff] }
 0x221   : > { %8812 = vmatmul.mubr.f32.gmra.mrb[22].mxu0 %v11655_v54  ;;  %v7215_v54 = vld [vmem:[%s11296_s20 + $0x49] sm:$0xff] }
 0x222   : > { %8814 = vmatprep.mubr.f32.mxu0 %v11658_v57  ;;  %v10010_v57 = vpack.c.bf16 %v7296_v37, %v7295_v32  ;;  %v7238_v32 = vld [vmem:[%s11296_s20 + $0x159] sm:$0xff]  ;;  %v7239_v37 = vld [vmem:[%s11296_s20 + $0x169] sm:$0xff] }
 0x225   : > { %8815 = vmatmul.mubr.f32.gmra.mrb[24].mxu0 %v11663_v62  ;;  %v7297_v62 = vld [vmem:[%s13356_s2 + $0x420] sm:$0xff] }
 0x226   : > { %8817 = vmatprep.mubr.f32.mxu0 %v11666_v63  ;;  %v10042_v63 = vpack.c.bf16 %v3295_v53, %v3294_v44  ;;  %v7244_v44 = vld [vmem:[%s11296_s20 + $0x1a1] sm:$0xff]  ;;  %v7263_v53 = vld [vmem:[%s11296_s20 + $0x4a] sm:$0xff] }
 0x228   : > { %10043 = vmatprep.subr.bf16.mxu1 %v10042_v63 }
 0x229   : > { %8818 = vmatmul.mubr.f32.gmra.mrb[26].mxu0 %v11671_v0  ;;  %v7298_v0 = vld [vmem:[%s13356_s2 + $0x428] sm:$0xff]  ;;  %10045 = vmatpush3.bf16.msra.mxu1 %v10042_v63  ;;  %v7269_v63 = vld [vmem:[%s11296_s20 + $0x92] sm:$0xff] }
 0x22a   : > { %8820 = vmatprep.mubr.f32.mxu0 %v11922_v23  ;;  %v3296_v23 = vld [vmem:[#allocation3 + $0xa0] sm:$0xff]  ;;  %v10014_v35 = vpack.c.bf16 %v7298_v0, %v7297_v62  ;;  %v7268_v62 = vld [vmem:[%s11296_s20 + $0x82] sm:$0xff]  ;;  %v7270_v0 = vld [vmem:[%s11296_s20 + $0x9a] sm:$0xff] }
 0x22d   : > { %8821 = vmatmul.mubr.f32.gmra.mrb[28].mxu0 %v11927_v13  ;;  %v3297_v13 = vld [vmem:[#allocation3 + $0xa8] sm:$0xff] }
 0x22e   : > { %8823 = vmatprep.mubr.f32.mxu0 %v7195_v25  ;;  %v10046_v26 = vpack.c.bf16 %v3297_v13, %v3296_v23  ;;  %v7235_v25 = vld [vmem:[%s11296_s20 + $0x139] sm:$0xff]  ;;  %v7271_v23 = vld [vmem:[%s11296_s20 + $0xaa] sm:$0xff] }
 0x22f   : > { %v7272_v13 = vld [vmem:[%s11296_s20 + $0xb2] sm:$0xff] }
 0x230   : > { %10047 = vmatprep.subr.bf16.mxu1 %v10046_v26 }
 0x231   : > { %8824 = vmatmul.mubr.f32.gmra.mrb[30].mxu0 %v7196_v29  ;;  %10049 = vmatpush3.bf16.msra.mxu1 %v10046_v26  ;;  %v7236_v29 = vld [vmem:[%s11296_s20 + $0x141] sm:$0xff]  ;;  %v7277_v26 = vld [vmem:[%s11296_s20 + $0xf2] sm:$0xff] }
 0x232   : > { %8858 = vmatprep.mubr.f32.mxu0 %v7213_v30  ;;  %10051 = vmatprep.subr.bf16.mxu1 %v10050_v21  ;;  %v7237_v30 = vld [vmem:[%s11296_s20 + $0x151] sm:$0xff] }
 0x235   : > { %8859 = vmatmul.mubr.f32.vlgmr.msra.gmra.mrb[0].mxu0 %v7214_v47  ;;  %10053 = vmatpush3.bf16.msra.mxu1 %v10050_v21  ;;  %v7261_v47 = vld [vmem:[%s11296_s20 + $0x32] sm:$0xff] }
 0x236   : > { %8861 = vmatprep.mubr.f32.mxu0 %v7215_v54  ;;  %10009 = vmatpush3.bf16.msra.mxu0 %v10006_v24  ;;  %v7234_v24 = vld [vmem:[%s11296_s20 + $0x129] sm:$0xff]  ;;  %v7264_v54 = vld [vmem:[%s11296_s20 + $0x52] sm:$0xff] }
 0x237   : > { %10011 = vmatprep.subr.bf16.mxu0 %v10010_v57  ;;  %10055 = vmatprep.subr.bf16.mxu1 %v10054_v1  ;;  %v7285_v21 = vld [vmem:[%s11296_s20 + $0x152] sm:$0xff] }
 0x239   : > { %8862 = vmatmul.mubr.f32.gmra.mrb[2].mxu0 %v7216_v31  ;;  %10057 = vmatpush3.bf16.msra.mxu1 %v10054_v1  ;;  %v7273_v31 = vld [vmem:[%s11296_s20 + $0xc2] sm:$0xff] }
 0x23a   : > { %8864 = vmatprep.mubr.f32.mxu0 %v7217_v20  ;;  %10013 = vmatpush3.bf16.msra.mxu0 %v10010_v57  ;;  %v7267_v57 = vld [vmem:[%s11296_s20 + $0x7a] sm:$0xff]  ;;  %v7274_v20 = vld [vmem:[%s11296_s20 + $0xca] sm:$0xff] }
 0x23b   : > { %10015 = vmatprep.subr.bf16.mxu0 %v10014_v35  ;;  %v3303_v1 = vld [vmem:[#allocation3 + $0xd8] sm:$0xff] }
 0x23d   : > { %8865 = vmatmul.mubr.f32.gmra.mrb[4].mxu0 %v7218_v27  ;;  %v7281_v27 = vld [vmem:[%s11296_s20 + $0x122] sm:$0xff] }
 0x23e   : > { %8867 = vmatprep.mubr.f32.mxu0 %v7219_v17  ;;  %10017 = vmatpush3.bf16.msra.mxu0 %v10014_v35  ;;  %v7275_v35 = vld [vmem:[%s11296_s20 + $0xda] sm:$0xff]  ;;  %v7282_v17 = vld [vmem:[%s11296_s20 + $0x12a] sm:$0xff] }
 0x23f   : > { %10019 = vmatprep.subr.bf16.mxu0 %v10018_v45 }
 0x241   : > { %8868 = vmatmul.mubr.f32.gmra.mrb[6].mxu0 %v7220_v55  ;;  %v7291_v55 = vld [vmem:[%s11296_s20 + $0x19a] sm:$0xff] }
 0x242   : > { %8870 = vmatprep.mubr.f32.mxu0 %v7221_v56  ;;  %10021 = vmatpush3.bf16.msra.mxu0 %v10018_v45  ;;  %v7283_v45 = vld [vmem:[%s11296_s20 + $0x13a] sm:$0xff]  ;;  %v7292_v56 = vld [vmem:[%s11296_s20 + $0x1a2] sm:$0xff] }
 0x243   : > { %10023 = vmatprep.subr.bf16.mxu0 %v10022_v61 }
 0x245   : > { %8871 = vmatmul.mubr.f32.gmra.mrb[8].mxu0 %v7222_v4  ;;  %v3305_v4 = vld [vmem:[#allocation3 + $0xe8] sm:$0xff] }
 0x246   : > { %8873 = vmatprep.mubr.f32.mxu0 %v7223_v5  ;;  %10025 = vmatpush3.bf16.msra.mxu0 %v10022_v61  ;;  %v3302_v61 = vld [vmem:[#allocation3 + $0xd0] sm:$0xff]  ;;  %v10062_v5 = vpack.c.bf16 %v3305_v4, %v3304_v22 }
 0x247   : > { %10027 = vmatprep.subr.bf16.mxu0 %v10026_v28  ;;  %v10058_v2 = vpack.c.bf16 %v3303_v1, %v3302_v61 }
 0x249   : > { %8874 = vmatmul.mubr.f32.gmra.mrb[10].mxu0 %v7224_v34  ;;  %10059 = vmatprep.subr.bf16.mxu1 %v10058_v2 }
 0x24a   : > { %8876 = vmatprep.mubr.f32.mxu0 %v7225_v8  ;;  %10029 = vmatpush3.bf16.msra.mxu0 %v10026_v28  ;;  %v11106_v28 = vmov 0.0   ;;  %v3243_v8 = vld [vmem:[#allocation3] sm:$0xff] }
 0x24b   : > { %10031 = vmatprep.subr.bf16.mxu0 %v10030_v42  ;;  %10061 = vmatpush3.bf16.msra.mxu1 %v10058_v2  ;;  %3128 = vst [vmem:[#allocation2 + $0x20] sm:$0xff] %v11106_v28  ;;  %3129 = vst [vmem:[#allocation2 + $0x28] sm:$0x3] %v11106_v28 }
 0x24c   : > { %3124 = vst [vmem:[#allocation2] sm:$0xff] %v11106_v28  ;;  %3125 = vst [vmem:[#allocation2 + $0x8] sm:$0xff] %v11106_v28  ;;  %10063 = vmatprep.subr.bf16.mxu1 %v10062_v5 }
 0x24d   : > { %8877 = vmatmul.mubr.f32.gmra.mrb[12].mxu0 %v7226_v49  ;;  %3126 = vst [vmem:[#allocation2 + $0x10] sm:$0x3] %v11106_v28  ;;  %3127 = vst [vmem:[#allocation2 + $0x18] sm:$0xff] %v11106_v28  ;;  %v3246_v49 = vld [vmem:[#allocation3 + $0x18] sm:$0xff] }
 0x24e   : > { %8879 = vmatprep.mubr.f32.mxu0 %v7227_v52  ;;  %10033 = vmatpush3.bf16.msra.mxu0 %v10030_v42  ;;  %3130 = vst [vmem:[#allocation2 + $0x30] sm:$0xff] %v11106_v28  ;;  %3131 = vst [vmem:[#allocation2 + $0x38] sm:$0xff] %v11106_v28  ;;  %v3244_v42 = vld [vmem:[#allocation3 + $0x8] sm:$0xff]  ;;  %v10074_v52 = vpack.c.bf16 %v3246_v49, %v3245_v10 }
 0x24f   : > { %10035 = vmatprep.subr.bf16.mxu0 %v10034_v11  ;;  %3132 = vst [vmem:[#allocation2 + $0x40] sm:$0x3] %v11106_v28  ;;  %3133 = vst [vmem:[#allocation2 + $0x48] sm:$0xff] %v11106_v28  ;;  %10065 = vmatpush3.bf16.msra.mxu1 %v10062_v5  ;;  %v10070_v43 = vpack.c.bf16 %v3244_v42, %v3243_v8 }
 0x250   : > { %3134 = vst [vmem:[#allocation2 + $0x50] sm:$0xff] %v11106_v28  ;;  %3135 = vst [vmem:[#allocation2 + $0x58] sm:$0x3] %v11106_v28 }
 0x251   : > { %8880 = vmatmul.mubr.f32.gmra.mrb[14].mxu0 %v7228_v58  ;;  %3136 = vst [vmem:[#allocation2 + $0x60] sm:$0xff] %v11106_v28  ;;  %3137 = vst [vmem:[#allocation2 + $0x68] sm:$0xff] %v11106_v28  ;;  %v3248_v58 = vld [vmem:[#allocation3 + $0x28] sm:$0xff] }
 0x252   : > { %8882 = vmatprep.mubr.f32.mxu0 %v7229_v59  ;;  %10037 = vmatpush3.bf16.msra.mxu0 %v10034_v11  ;;  %3138 = vst [vmem:[#allocation2 + $0x70] sm:$0x3] %v11106_v28  ;;  %3139 = vst [vmem:[#allocation2 + $0x78] sm:$0xff] %v11106_v28  ;;  %v3247_v11 = vld [vmem:[#allocation3 + $0x20] sm:$0xff] }
 0x253   : > { %3140 = vst [vmem:[#allocation2 + $0x80] sm:$0xff] %v11106_v28  ;;  %3141 = vst [vmem:[#allocation2 + $0x88] sm:$0x3] %v11106_v28  ;;  %v3259_v33 = vld [vmem:[#allocation2 + $0x1] sm:$0xff]  ;;  %v10078_v59 = vpack.c.bf16 %v3248_v58, %v3247_v11 }
 0x254   : > { %3142 = vst [vmem:[#allocation2 + $0x90] sm:$0xff] %v11106_v28  ;;  %3143 = vst [vmem:[#allocation2 + $0x98] sm:$0xff] %v11106_v28  ;;  %9018 = vmatprep.mubr.f32.mxu1 %v3259_v33  ;;  %v3260_v34 = vld [vmem:[#allocation2 + $0x9] sm:$0xff] }
 0x255   : > { %8883 = vmatmul.mubr.f32.gmra.mrb[16].mxu0 %v7230_v15  ;;  %3144 = vst [vmem:[#allocation2 + $0xa0] sm:$0x3] %v11106_v28  ;;  %3145 = vst [vmem:[#allocation2 + $0xa8] sm:$0xff] %v11106_v28  ;;  %v3249_v15 = vld [vmem:[#allocation3 + $0x30] sm:$0xff] }
 0x256   : > { %8885 = vmatprep.mubr.f32.mxu0 %v7231_v3  ;;  %3146 = vst [vmem:[#allocation2 + $0xb0] sm:$0xff] %v11106_v28  ;;  %3147 = vst [vmem:[#allocation2 + $0xb8] sm:$0x3] %v11106_v28  ;;  %v3250_v3 = vld [vmem:[#allocation3 + $0x38] sm:$0xff] }
 0x257   : > { %3148 = vst [vmem:[#allocation2 + $0xc0] sm:$0xff] %v11106_v28  ;;  %3149 = vst [vmem:[#allocation2 + $0xc8] sm:$0xff] %v11106_v28 }
 0x258   : > { %3150 = vst [vmem:[#allocation2 + $0xd0] sm:$0x3] %v11106_v28  ;;  %3151 = vst [vmem:[#allocation2 + $0xd8] sm:$0xff] %v11106_v28 }
 0x259   : > { %8886 = vmatmul.mubr.f32.gmra.mrb[18].mxu0 %v7232_v19  ;;  %3152 = vst [vmem:[#allocation2 + $0xe0] sm:$0xff] %v11106_v28  ;;  %3153 = vst [vmem:[#allocation2 + $0xe8] sm:$0x3] %v11106_v28  ;;  %v10082_v19 = vpack.c.bf16 %v3250_v3, %v3249_v15 }
 0x25a   : > { %8888 = vmatprep.mubr.f32.mxu0 %v7233_v16  ;;  %3154 = vst [vmem:[#allocation2 + $0xf0] sm:$0xff] %v11106_v28  ;;  %3155 = vst [vmem:[#allocation2 + $0xf8] sm:$0xff] %v11106_v28  ;;  %v3251_v16 = vld [vmem:[#allocation3 + $0x40] sm:$0xff] }
 0x25b   : > { %3156 = vst [vmem:[#allocation2 + $0x100] sm:$0x3] %v11106_v28  ;;  %3157 = vst [vmem:[#allocation2 + $0x108] sm:$0xff] %v11106_v28 }
 0x25c   : > { %3158 = vst [vmem:[#allocation2 + $0x110] sm:$0xff] %v11106_v28  ;;  %3159 = vst [vmem:[#allocation2 + $0x118] sm:$0x3] %v11106_v28 }
 0x25d   : > { %8889 = vmatmul.mubr.f32.gmra.mrb[20].mxu0 %v7234_v24  ;;  %3160 = vst [vmem:[#allocation2 + $0x120] sm:$0xff] %v11106_v28  ;;  %3161 = vst [vmem:[#allocation2 + $0x128] sm:$0xff] %v11106_v28  ;;  %v3252_v24 = vld [vmem:[#allocation3 + $0x48] sm:$0xff] }
 0x25e   : > { %8891 = vmatprep.mubr.f32.mxu0 %v7235_v25  ;;  %3162 = vst [vmem:[#allocation2 + $0x130] sm:$0x3] %v11106_v28  ;;  %3163 = vst [vmem:[#allocation2 + $0x138] sm:$0xff] %v11106_v28  ;;  %v10086_v25 = vpack.c.bf16 %v3252_v24, %v3251_v16 }
 0x25f   : > { %3164 = vst [vmem:[#allocation2 + $0x140] sm:$0xff] %v11106_v28  ;;  %3165 = vst [vmem:[#allocation2 + $0x148] sm:$0x3] %v11106_v28 }
 0x260   : > { %3166 = vst [vmem:[#allocation2 + $0x150] sm:$0xff] %v11106_v28  ;;  %3167 = vst [vmem:[#allocation2 + $0x158] sm:$0xff] %v11106_v28 }
 0x261   : > { %8892 = vmatmul.mubr.f32.gmra.mrb[22].mxu0 %v7236_v29  ;;  %3168 = vst [vmem:[#allocation2 + $0x160] sm:$0x3] %v11106_v28  ;;  %3169 = vst [vmem:[#allocation2 + $0x168] sm:$0xff] %v11106_v28  ;;  %v3253_v29 = vld [vmem:[#allocation3 + $0x50] sm:$0xff] }
 0x262   : > { %8894 = vmatprep.mubr.f32.mxu0 %v7237_v30  ;;  %3170 = vst [vmem:[#allocation2 + $0x170] sm:$0xff] %v11106_v28  ;;  %3171 = vst [vmem:[#allocation2 + $0x178] sm:$0x3] %v11106_v28  ;;  %v3254_v30 = vld [vmem:[#allocation3 + $0x58] sm:$0xff] }
 0x263   : > { %3172 = vst [vmem:[#allocation2 + $0x180] sm:$0xff] %v11106_v28  ;;  %3173 = vst [vmem:[#allocation2 + $0x188] sm:$0xff] %v11106_v28 }
 0x264   : > { %3174 = vst [vmem:[#allocation2 + $0x190] sm:$0x3] %v11106_v28  ;;  %3175 = vst [vmem:[#allocation2 + $0x198] sm:$0xff] %v11106_v28 }
 0x265   : > { %8895 = vmatmul.mubr.f32.gmra.mrb[24].mxu0 %v7238_v32  ;;  %3176 = vst [vmem:[#allocation2 + $0x1a0] sm:$0xff] %v11106_v28  ;;  %3177 = vst [vmem:[#allocation2 + $0x1a8] sm:$0x3] %v11106_v28  ;;  %v10090_v32 = vpack.c.bf16 %v3254_v30, %v3253_v29 }
 0x266   : > { %8897 = vmatprep.mubr.f32.mxu0 %v7239_v37  ;;  %v3255_v37 = vld [vmem:[#allocation3 + $0x60] sm:$0xff] }
 0x269   : > { %8898 = vmatmul.mubr.f32.gmra.mrb[26].mxu0 %v7240_v38  ;;  %v3256_v38 = vld [vmem:[#allocation3 + $0x68] sm:$0xff] }
 0x26a   : > { %8900 = vmatprep.mubr.f32.mxu0 %v12008_v7  ;;  %v7265_v7 = vld [vmem:[%s11296_s20 + $0x62] sm:$0xff] }
 0x26d   : > { %8901 = vmatmul.mubr.f32.gmra.mrb[28].mxu0 %v12013_v9  ;;  %v7266_v9 = vld [vmem:[%s11296_s20 + $0x6a] sm:$0xff]  ;;  %s11032_s20 = sshll.u32 %s11107_s28, 4  ;;  %s11033_s20 = int_to_ptr.vmem [resolvable:$false] %s11032_s20 }
 0x26e   : > { %8903 = vmatprep.mubr.f32.mxu0 %v7243_v39  ;;  %v10094_v39 = vpack.c.bf16 %v3256_v38, %v3255_v37  ;;  %p11035_p4 = scmp.lt.s32.totalorder %s13303_s14, %s11033_s20 }
 0x271   : > { %8904 = vmatmul.mubr.f32.gmra.mrb[30].mxu0 %v7244_v44  ;;  %v3257_v44 = vld [vmem:[#allocation3 + $0x70] sm:$0xff] }
 0x272   : > { %8938 = vmatprep.mubr.f32.mxu0 %v7261_v47  ;;  %v3258_v47 = vld [vmem:[#allocation3 + $0x78] sm:$0xff] }
 0x275   : > { %8939 = vmatmul.mubr.f32.vlgmr.msra.gmra.mrb[0].mxu0 %v7262_v48  ;;  %v10098_v48 = vpack.c.bf16 %v3258_v47, %v3257_v44 }
 0x276   : > { %8941 = vmatprep.mubr.f32.mxu0 %v7263_v53  ;;  %v3791_v53 = vld [vmem:[#allocation3 + $0x100] sm:$0xff] }
 0x279   : > { %8942 = vmatmul.mubr.f32.gmra.mrb[2].mxu0 %v7264_v54  ;;  %v3792_v54 = vld [vmem:[#allocation3 + $0x108] sm:$0xff] }
 0x27a   : > { %8944 = vmatprep.mubr.f32.mxu0 %v7265_v7  ;;  %v12342_v7 = vpack.c.bf16 %v3792_v54, %v3791_v53 }
 0x27d   : > { %8945 = vmatmul.mubr.f32.gmra.mrb[4].mxu0 %v7266_v9  ;;  %v12348_v9 = vld [vmem:[%s13359_s5] ss:$0 sm:$0xff] }
 0x27e   : > { %8947 = vmatprep.mubr.f32.mxu0 %v7267_v57 }
 0x281   : > { %8948 = vmatmul.mubr.f32.gmra.mrb[6].mxu0 %v7268_v62  ;;  %v12353_v62 = vld [vmem:[%s13359_s5 + $0x1] ss:$0 sm:$0xff] }
 0x282   : > { %8950 = vmatprep.mubr.f32.mxu0 %v7269_v63 }
 0x285   : > { %8951 = vmatmul.mubr.f32.gmra.mrb[8].mxu0 %v7270_v0 }
 0x286   : > { %8953 = vmatprep.mubr.f32.mxu0 %v7271_v23 }
 0x289   : > { %8954 = vmatmul.mubr.f32.gmra.mrb[10].mxu0 %v7272_v13 }
 0x28a   : > { %8956 = vmatprep.mubr.f32.mxu0 %v7273_v31 }
 0x28d   : > { %8957 = vmatmul.mubr.f32.gmra.mrb[12].mxu0 %v7274_v20 }
 0x28e   : > { %8959 = vmatprep.mubr.f32.mxu0 %v7275_v35 }
 0x291   : > { %8960 = vmatmul.mubr.f32.gmra.mrb[14].mxu0 %v7276_v36 }
 0x292   : > { %8962 = vmatprep.mubr.f32.mxu0 %v7277_v26 }
 0x295   : > { %8963 = vmatmul.mubr.f32.gmra.mrb[16].mxu0 %v7278_v12 }
 0x296   : > { %8965 = vmatprep.mubr.f32.mxu0 %v7279_v40 }
 0x299   : > { %8966 = vmatmul.mubr.f32.gmra.mrb[18].mxu0 %v7280_v41 }
 0x29a   : > { %8968 = vmatprep.mubr.f32.mxu0 %v7281_v27 }
 0x29d   : > { %8969 = vmatmul.mubr.f32.gmra.mrb[20].mxu0 %v7282_v17 }
 0x29e   : > { %8971 = vmatprep.mubr.f32.mxu0 %v7283_v45 }
 0x2a1   : > { %8972 = vmatmul.mubr.f32.gmra.mrb[22].mxu0 %v7284_v46 }
 0x2a2   : > { %8974 = vmatprep.mubr.f32.mxu0 %v7285_v21 }
 0x2a5   : > { %8975 = vmatmul.mubr.f32.gmra.mrb[24].mxu0 %v7286_v50 }
 0x2a6   : > { %8977 = vmatprep.mubr.f32.mxu0 %v7287_v51 }
 0x2a9   : > { %8978 = vmatmul.mubr.f32.gmra.mrb[26].mxu0 %v7288_v18 }
 0x2aa   : > { %8980 = vmatprep.mubr.f32.mxu0 %v12094_v14  ;;  %v3306_v14 = vld [vmem:[#allocation3 + $0xf0] sm:$0xff] }
 0x2ad   : > { %8981 = vmatmul.mubr.f32.gmra.mrb[28].mxu0 %v12099_v60  ;;  %v3307_v60 = vld [vmem:[#allocation3 + $0xf8] sm:$0xff] }
 0x2ae   : > { %8983 = vmatprep.mubr.f32.mxu0 %v7291_v55  ;;  %v10066_v6 = vpack.c.bf16 %v3307_v60, %v3306_v14 }
 0x2b0   : > { %10067 = vmatprep.subr.bf16.mxu1 %v10066_v6 }
 0x2b1   : > { %8984 = vmatmul.mubr.f32.gmra.mrb[30].mxu0 %v7292_v56  ;;  %10069 = vmatpush3.bf16.msra.mxu1 %v10066_v6 }
 0x2b2   : > { %10071 = vmatprep.subr.bf16.mxu1 %v10070_v43 }
 0x2b4   : > { %9019 = vmatmul.mubr.f32.vlgmr.msra.gmra.mrb[0].mxu1 %v3260_v34 }
 0x2b5   : > { %10073 = vmatpush3.bf16.msra.mxu1 %v10070_v43 }
 0x2b6   : > { %10075 = vmatprep.subr.bf16.mxu1 %v10074_v52 }
 0x2b9   : > { %10077 = vmatpush3.bf16.msra.mxu1 %v10074_v52 }
 0x2ba   : > { %10079 = vmatprep.subr.bf16.mxu1 %v10078_v59 }
 0x2bd   : > { %10081 = vmatpush3.bf16.msra.mxu1 %v10078_v59 }
 0x2be   : > { %10083 = vmatprep.subr.bf16.mxu1 %v10082_v19 }
 0x2c1   : > { %10085 = vmatpush3.bf16.msra.mxu1 %v10082_v19 }
 0x2c2   : > { %10087 = vmatprep.subr.bf16.mxu1 %v10086_v25 }
 0x2c5   : > { %10089 = vmatpush3.bf16.msra.mxu1 %v10086_v25 }
 0x2c6   : > { %10091 = vmatprep.subr.bf16.mxu1 %v10090_v32 }
 0x2c9   : > { %10093 = vmatpush3.bf16.msra.mxu1 %v10090_v32 }
 0x2ca   : > { %10095 = vmatprep.subr.bf16.mxu1 %v10094_v39 }
 0x2cd   : > { %10097 = vmatpush3.bf16.msra.mxu1 %v10094_v39 }
 0x2ce   : > { %10099 = vmatprep.subr.bf16.mxu1 %v10098_v48 }
 0x2d1   : > { %10101 = vmatpush3.bf16.msra.mxu1 %v10098_v48 }
 0x2d2   : > { %10103 = vmatprep.subr.bf16.mxu1 %v12342_v7 }
 0x348   : > { %v8940_v57 = vpop.f32.mrb[0].mxu0 }
 0x349   : > { %v3024_v63 = vmul.f32 %v8940_v57, %v12348_v9  ;;  %v2827_v0 = vpop.f32.mrb[1].mxu0 }
 0x34a   : > { %v3023_v23 = vmul.f32 %v12348_v9, %v2827_v0 }
 0x34b   : > { %v3061_v13 = vadd.f32 %v12353_v62, %v3024_v63 }
 0x34c   : > { %v3060_v31 = vadd.f32 %v12353_v62, %v3023_v23  ;;  %v8943_v20 = vpop.f32.mrb[2].mxu0 }
 0x34d   : > { %v3093_v35 = vmax.f32 %v3061_v13, 0.0  ;;  %v3026_v36 = vmul.f32 %v8943_v20, %v12348_v9  ;;  %v2837_v26 = vpop.f32.mrb[3].mxu0 }
 0x34e   : > { %v3092_v12 = vmax.f32 %v3060_v31, 0.0  ;;  %v3025_v40 = vmul.f32 %v12348_v9, %v2837_v26 }
 0x34f   : > { %3180 = vst [vmem:[#allocation2 + $0x21] sm:$0xff] %v3093_v35  ;;  %v3063_v41 = vadd.f32 %v12353_v62, %v3026_v36 }
 0x350   : > { %3179 = vst [vmem:[#allocation2 + $0x19] sm:$0xff] %v3092_v12  ;;  %v3062_v27 = vadd.f32 %v12353_v62, %v3025_v40  ;;  %v8946_v17 = vpop.f32.mrb[4].mxu0  ;;  %9021 = vmatprep.mubr.f32.mxu1 %v3092_v12 }
 0x351   : > { %v3095_v45 = vmax.f32 %v3063_v41, 0.0  ;;  %v3028_v46 = vmul.f32 %v8946_v17, %v12348_v9  ;;  %v2847_v21 = vpop.f32.mrb[5].mxu0  ;;  %9022 = vmatmul.mubr.f32.gmra.mrb[2].mxu1 %v3093_v35 }
 0x352   : > { %v3094_v50 = vmax.f32 %v3062_v27, 0.0  ;;  %v3027_v51 = vmul.f32 %v12348_v9, %v2847_v21 }
 0x353   : > { %3182 = vst [vmem:[#allocation2 + $0x39] sm:$0xff] %v3095_v45  ;;  %v3065_v18 = vadd.f32 %v12353_v62, %v3028_v46 }
 0x354   : > { %3181 = vst [vmem:[#allocation2 + $0x31] sm:$0xff] %v3094_v50  ;;  %v3064_v55 = vadd.f32 %v12353_v62, %v3027_v51  ;;  %v8949_v56 = vpop.f32.mrb[6].mxu0  ;;  %9024 = vmatprep.mubr.f32.mxu1 %v3094_v50 }
 0x355   : > { %v3097_v61 = vmax.f32 %v3065_v18, 0.0  ;;  %v3030_v1 = vmul.f32 %v8949_v56, %v12348_v9  ;;  %v2857_v2 = vpop.f32.mrb[7].mxu0  ;;  %9025 = vmatmul.mubr.f32.gmra.mrb[4].mxu1 %v3095_v45 }
 0x356   : > { %v3096_v22 = vmax.f32 %v3064_v55, 0.0  ;;  %v3029_v4 = vmul.f32 %v12348_v9, %v2857_v2 }
 0x357   : > { %3184 = vst [vmem:[#allocation2 + $0x51] sm:$0xff] %v3097_v61  ;;  %v3067_v5 = vadd.f32 %v12353_v62, %v3030_v1 }
 0x358   : > { %3183 = vst [vmem:[#allocation2 + $0x49] sm:$0xff] %v3096_v22  ;;  %v3066_v14 = vadd.f32 %v12353_v62, %v3029_v4  ;;  %v8952_v60 = vpop.f32.mrb[8].mxu0  ;;  %9027 = vmatprep.mubr.f32.mxu1 %v3096_v22 }
 0x359   : > { %v3099_v6 = vmax.f32 %v3067_v5, 0.0  ;;  %v3032_v33 = vmul.f32 %v8952_v60, %v12348_v9  ;;  %v2867_v34 = vpop.f32.mrb[9].mxu0  ;;  %9028 = vmatmul.mubr.f32.gmra.mrb[6].mxu1 %v3097_v61 }
 0x35a   : > { %v3098_v8 = vmax.f32 %v3066_v14, 0.0  ;;  %v3031_v42 = vmul.f32 %v12348_v9, %v2867_v34 }
 0x35b   : > { %3186 = vst [vmem:[#allocation2 + $0x69] sm:$0xff] %v3099_v6  ;;  %v3069_v43 = vadd.f32 %v12353_v62, %v3032_v33 }
 0x35c   : > { %3185 = vst [vmem:[#allocation2 + $0x61] sm:$0xff] %v3098_v8  ;;  %v3068_v10 = vadd.f32 %v12353_v62, %v3031_v42  ;;  %v8955_v49 = vpop.f32.mrb[10].mxu0  ;;  %9030 = vmatprep.mubr.f32.mxu1 %v3098_v8 }
 0x35d   : > { %v3101_v52 = vmax.f32 %v3069_v43, 0.0  ;;  %v3034_v11 = vmul.f32 %v8955_v49, %v12348_v9  ;;  %v2877_v58 = vpop.f32.mrb[11].mxu0  ;;  %9031 = vmatmul.mubr.f32.gmra.mrb[8].mxu1 %v3099_v6 }
 0x35e   : > { %v3100_v59 = vmax.f32 %v3068_v10, 0.0  ;;  %v3033_v15 = vmul.f32 %v12348_v9, %v2877_v58 }
 0x35f   : > { %3188 = vst [vmem:[#allocation2 + $0x81] sm:$0xff] %v3101_v52  ;;  %v3071_v3 = vadd.f32 %v12353_v62, %v3034_v11 }
 0x360   : > { %3187 = vst [vmem:[#allocation2 + $0x79] sm:$0xff] %v3100_v59  ;;  %v3070_v19 = vadd.f32 %v12353_v62, %v3033_v15  ;;  %v8958_v16 = vpop.f32.mrb[12].mxu0  ;;  %9033 = vmatprep.mubr.f32.mxu1 %v3100_v59 }
 0x361   : > { %v3103_v24 = vmax.f32 %v3071_v3, 0.0  ;;  %v3036_v25 = vmul.f32 %v8958_v16, %v12348_v9  ;;  %v2887_v29 = vpop.f32.mrb[13].mxu0  ;;  %9034 = vmatmul.mubr.f32.gmra.mrb[10].mxu1 %v3101_v52 }
 0x362   : > { %v3102_v30 = vmax.f32 %v3070_v19, 0.0  ;;  %v3035_v32 = vmul.f32 %v12348_v9, %v2887_v29 }
 0x363   : > { %3190 = vst [vmem:[#allocation2 + $0x99] sm:$0xff] %v3103_v24  ;;  %v3073_v37 = vadd.f32 %v12353_v62, %v3036_v25 }
 0x364   : > { %3189 = vst [vmem:[#allocation2 + $0x91] sm:$0xff] %v3102_v30  ;;  %v3072_v38 = vadd.f32 %v12353_v62, %v3035_v32  ;;  %v8961_v39 = vpop.f32.mrb[14].mxu0  ;;  %9036 = vmatprep.mubr.f32.mxu1 %v3102_v30 }
 0x365   : > { %v3105_v44 = vmax.f32 %v3073_v37, 0.0  ;;  %v3038_v47 = vmul.f32 %v8961_v39, %v12348_v9  ;;  %v2897_v48 = vpop.f32.mrb[15].mxu0  ;;  %9037 = vmatmul.mubr.f32.gmra.mrb[12].mxu1 %v3103_v24 }
 0x366   : > { %v3104_v53 = vmax.f32 %v3072_v38, 0.0  ;;  %v3037_v54 = vmul.f32 %v12348_v9, %v2897_v48 }
 0x367   : > { %3192 = vst [vmem:[#allocation2 + $0xb1] sm:$0xff] %v3105_v44  ;;  %v3075_v57 = vadd.f32 %v12353_v62, %v3038_v47 }
 0x368   : > { %3191 = vst [vmem:[#allocation2 + $0xa9] sm:$0xff] %v3104_v53  ;;  %v3074_v63 = vadd.f32 %v12353_v62, %v3037_v54  ;;  %v8964_v0 = vpop.f32.mrb[16].mxu0  ;;  %9039 = vmatprep.mubr.f32.mxu1 %v3104_v53 }
 0x369   : > { %v3107_v23 = vmax.f32 %v3075_v57, 0.0  ;;  %v3040_v13 = vmul.f32 %v8964_v0, %v12348_v9  ;;  %v2907_v31 = vpop.f32.mrb[17].mxu0  ;;  %9040 = vmatmul.mubr.f32.gmra.mrb[14].mxu1 %v3105_v44 }
 0x36a   : > { %v12388_v20 = vmax.f32 %v3074_v63, 0.0  ;;  %v3039_v35 = vmul.f32 %v12348_v9, %v2907_v31 }
 0x36b   : > { %3194 = vst [vmem:[#allocation2 + $0xc9] sm:$0xff] %v3107_v23  ;;  %v3077_v36 = vadd.f32 %v12353_v62, %v3040_v13 }
 0x36c   : > { %3193 = vst [vmem:[#allocation2 + $0xc1] sm:$0xff] %v12388_v20  ;;  %v3076_v26 = vadd.f32 %v12353_v62, %v3039_v35  ;;  %v8967_v12 = vpop.f32.mrb[18].mxu0  ;;  %9042 = vmatprep.mubr.f32.mxu1 %v12388_v20  ;;  %v3793_v35 = vld [vmem:[#allocation3 + $0x110] sm:$0xff] }
 0x36d   : > { %v12395_v40 = vmax.f32 %v3077_v36, 0.0  ;;  %v3042_v41 = vmul.f32 %v8967_v12, %v12348_v9  ;;  %v2917_v27 = vpop.f32.mrb[19].mxu0  ;;  %9043 = vmatmul.mubr.f32.gmra.mrb[16].mxu1 %v3107_v23  ;;  %v3794_v36 = vld [vmem:[#allocation3 + $0x118] sm:$0xff] }
 0x36e   : > { %v12398_v17 = vmax.f32 %v3076_v26, 0.0  ;;  %v3041_v45 = vmul.f32 %v12348_v9, %v2917_v27  ;;  %v10106_v12 = vpack.c.bf16 %v3794_v36, %v3793_v35  ;;  %v12491_v27 = vld [vmem:[#allocation2 + $0x18] sm:$0xff] }
 0x36f   : > { %3196 = vst [vmem:[#allocation2 + $0xe1] sm:$0xff] %v12395_v40  ;;  %v3079_v46 = vadd.f32 %v12353_v62, %v3042_v41  ;;  %v3796_v41 = vld [vmem:[#allocation3 + $0x128] sm:$0xff] }
 0x370   : > { %3195 = vst [vmem:[#allocation2 + $0xd9] sm:$0xff] %v12398_v17  ;;  %v3078_v21 = vadd.f32 %v12353_v62, %v3041_v45  ;;  %v8970_v50 = vpop.f32.mrb[20].mxu0  ;;  %9045 = vmatprep.mubr.f32.mxu1 %v12398_v17 }
 0x371   : > { %v12406_v51 = vmax.f32 %v3079_v46, 0.0  ;;  %v3044_v18 = vmul.f32 %v8970_v50, %v12348_v9  ;;  %v2927_v55 = vpop.f32.mrb[21].mxu0  ;;  %9046 = vmatmul.mubr.f32.gmra.mrb[18].mxu1 %v12395_v40  ;;  %v12495_v46 = vld [vmem:[#allocation2 + $0x20] sm:$0xff]  ;;  %v3798_v50 = vld [vmem:[#allocation3 + $0x138] sm:$0xff] }
 0x372   : > { %v12410_v56 = vmax.f32 %v3078_v21, 0.0  ;;  %v3043_v61 = vmul.f32 %v12348_v9, %v2927_v55  ;;  %v3797_v21 = vld [vmem:[#allocation3 + $0x130] sm:$0xff]  ;;  %v12501_v55 = vld [vmem:[#allocation2 + $0x38] sm:$0xff] }
 0x373   : > { %3198 = vst [vmem:[#allocation2 + $0xf9] sm:$0xff] %v12406_v51  ;;  %v3081_v1 = vadd.f32 %v12353_v62, %v3044_v18  ;;  %v12498_v18 = vld [vmem:[#allocation2 + $0x30] sm:$0xff] }
 0x374   : > { %3197 = vst [vmem:[#allocation2 + $0xf1] sm:$0xff] %v12410_v56  ;;  %v3080_v2 = vadd.f32 %v12353_v62, %v3043_v61  ;;  %v8973_v22 = vpop.f32.mrb[22].mxu0  ;;  %9048 = vmatprep.mubr.f32.mxu1 %v12410_v56  ;;  %v3799_v61 = vld [vmem:[#allocation3 + $0x140] sm:$0xff] }
 0x375   : > { %v12418_v4 = vmax.f32 %v3081_v1, 0.0  ;;  %v3046_v5 = vmul.f32 %v8973_v22, %v12348_v9  ;;  %v2937_v14 = vpop.f32.mrb[23].mxu0  ;;  %9049 = vmatmul.mubr.f32.gmra.mrb[20].mxu1 %v12406_v51  ;;  %v3800_v1 = vld [vmem:[#allocation3 + $0x148] sm:$0xff]  ;;  %v12507_v22 = vld [vmem:[#allocation2 + $0x50] sm:$0xff] }
 0x376   : > { %v12422_v60 = vmax.f32 %v3080_v2, 0.0  ;;  %v3045_v6 = vmul.f32 %v12348_v9, %v2937_v14  ;;  %v10118_v2 = vpack.c.bf16 %v3800_v1, %v3799_v61  ;;  %v3802_v14 = vld [vmem:[#allocation3 + $0x158] sm:$0xff]  ;;  %v4099_v1 = vld [vmem:[#allocation3 + $0x190] sm:$0xff] }
 0x377   : > { %3200 = vst [vmem:[#allocation2 + $0x111] sm:$0xff] %v12418_v4  ;;  %v3083_v33 = vadd.f32 %v12353_v62, %v3046_v5  ;;  %v3801_v5 = vld [vmem:[#allocation3 + $0x150] sm:$0xff] }
 0x378   : > { %3199 = vst [vmem:[#allocation2 + $0x109] sm:$0xff] %v12422_v60  ;;  %v3082_v34 = vadd.f32 %v12353_v62, %v3045_v6  ;;  %v8976_v8 = vpop.f32.mrb[24].mxu0  ;;  %9051 = vmatprep.mubr.f32.mxu1 %v12422_v60  ;;  %v12510_v6 = vld [vmem:[#allocation2 + $0x60] sm:$0xff] }
 0x379   : > { %v12430_v42 = vmax.f32 %v3083_v33, 0.0  ;;  %v3048_v43 = vmul.f32 %v8976_v8, %v12348_v9  ;;  %v2947_v10 = vpop.f32.mrb[25].mxu0  ;;  %9052 = vmatmul.mubr.f32.gmra.mrb[22].mxu1 %v12418_v4  ;;  %v10122_v33 = vpack.c.bf16 %v3802_v14, %v3801_v5  ;;  %v3803_v8 = vld [vmem:[#allocation3 + $0x160] sm:$0xff] }
 0x37a   : > { %v12434_v49 = vmax.f32 %v3082_v34, 0.0  ;;  %v3047_v52 = vmul.f32 %v12348_v9, %v2947_v10  ;;  %v12513_v34 = vld [vmem:[#allocation2 + $0x68] sm:$0xff]  ;;  %v12516_v10 = vld [vmem:[#allocation2 + $0x78] sm:$0xff] }
 0x37b   : > { %3202 = vst [vmem:[#allocation2 + $0x129] sm:$0xff] %v12430_v42  ;;  %v3085_v11 = vadd.f32 %v12353_v62, %v3048_v43  ;;  %v3804_v43 = vld [vmem:[#allocation3 + $0x168] sm:$0xff]  ;;  %v3759_v5 = vld [vmem:[#allocation2 + $0xa] sm:$0xff] }
 0x37c   : > { %3201 = vst [vmem:[#allocation2 + $0x121] sm:$0xff] %v12434_v49  ;;  %v3084_v58 = vadd.f32 %v12353_v62, %v3047_v52  ;;  %v8979_v59 = vpop.f32.mrb[26].mxu0  ;;  %9054 = vmatprep.mubr.f32.mxu1 %v12434_v49  ;;  %v10126_v52 = vpack.c.bf16 %v3804_v43, %v3803_v8  ;;  %v4102_v8 = vld [vmem:[#allocation3 + $0x1a8] sm:$0xff] }
 0x37d   : > { %v12442_v15 = vmax.f32 %v3085_v11, 0.0  ;;  %v3050_v3 = vmul.f32 %v8979_v59, %v12348_v9  ;;  %v2957_v19 = vpop.f32.mrb[27].mxu0  ;;  %9055 = vmatmul.mubr.f32.gmra.mrb[24].mxu1 %v12430_v42  ;;  %v12519_v11 = vld [vmem:[#allocation2 + $0x80] sm:$0xff]  ;;  %v3806_v59 = vld [vmem:[#allocation3 + $0x178] sm:$0xff] }
 0x37e   : > { %v12446_v16 = vmax.f32 %v3084_v58, 0.0  ;;  %v3049_v24 = vmul.f32 %v12348_v9, %v2957_v19  ;;  %v3805_v58 = vld [vmem:[#allocation3 + $0x170] sm:$0xff] }
 0x37f   : > { %3204 = vst [vmem:[#allocation2 + $0x141] sm:$0xff] %v12442_v15  ;;  %v3087_v25 = vadd.f32 %v12353_v62, %v3050_v3  ;;  %v12522_v3 = vld [vmem:[#allocation2 + $0x90] sm:$0xff]  ;;  %v10130_v19 = vpack.c.bf16 %v3806_v59, %v3805_v58  ;;  %v12582_v43 = vld [vmem:[#allocation2 + $0x1a] sm:$0xff]  ;;  %v12585_v58 = vld [vmem:[#allocation2 + $0x22] sm:$0xff] }
 0x380   : > { %3203 = vst [vmem:[#allocation2 + $0x139] sm:$0xff] %v12446_v16  ;;  %v3086_v29 = vadd.f32 %v12353_v62, %v3049_v24  ;;  %v8982_v30 = vpop.f32.mrb[28].mxu0  ;;  %9057 = vmatprep.mubr.f32.mxu1 %v12446_v16  ;;  %v12525_v24 = vld [vmem:[#allocation2 + $0x98] sm:$0xff]  ;;  %v12555_v35 = vld [vmem:[#allocation2 + $0x110] sm:$0xff]  ;;  %v4103_v59 = vld [vmem:[#allocation3 + $0x1b0] sm:$0xff] }
 0x381   : > { %v12454_v32 = vmax.f32 %v3087_v25, 0.0  ;;  %v3052_v37 = vmul.f32 %v8982_v30, %v12348_v9  ;;  %v2967_v38 = vpop.f32.mrb[29].mxu0  ;;  %9058 = vmatmul.mubr.f32.gmra.mrb[26].mxu1 %v12442_v15  ;;  %v4097_v25 = vld [vmem:[#allocation3 + $0x180] sm:$0xff]  ;;  %v12528_v30 = vld [vmem:[#allocation2 + $0xa8] sm:$0xff] }
 0x382   : > { %v12458_v39 = vmax.f32 %v3086_v29, 0.0  ;;  %v3051_v44 = vmul.f32 %v12348_v9, %v2967_v38  ;;  %v4098_v29 = vld [vmem:[#allocation3 + $0x188] sm:$0xff]  ;;  %v12531_v38 = vld [vmem:[#allocation2 + $0xb0] sm:$0xff] }
 0x383   : > { %3206 = vst [vmem:[#allocation2 + $0x159] sm:$0xff] %v12454_v32  ;;  %v3089_v47 = vadd.f32 %v12353_v62, %v3052_v37  ;;  %v10134_v37 = vpack.c.bf16 %v4098_v29, %v4097_v25  ;;  %v12558_v36 = vld [vmem:[#allocation2 + $0x120] sm:$0xff]  ;;  %v12588_v25 = vld [vmem:[#allocation2 + $0x32] sm:$0xff] }
 0x384   : > { %3205 = vst [vmem:[#allocation2 + $0x151] sm:$0xff] %v12458_v39  ;;  %v3088_v48 = vadd.f32 %v12353_v62, %v3051_v44  ;;  %v8985_v53 = vpop.f32.mrb[30].mxu0  ;;  %9060 = vmatprep.mubr.f32.mxu1 %v12458_v39  ;;  %v12534_v44 = vld [vmem:[#allocation2 + $0xc0] sm:$0xff] }
 0x385   : > { %v12466_v54 = vmax.f32 %v3089_v47, 0.0  ;;  %v3054_v57 = vmul.f32 %v8985_v53, %v12348_v9  ;;  %v2977_v63 = vpop.f32.mrb[31].mxu0  ;;  %9061 = vmatmul.mubr.f32.gmra.mrb[28].mxu1 %v12454_v32  ;;  %v12537_v47 = vld [vmem:[#allocation2 + $0xc8] sm:$0xff]  ;;  %v12543_v53 = vld [vmem:[#allocation2 + $0xe0] sm:$0xff] }
 0x386   : > { %v12470_v0 = vmax.f32 %v3088_v48, 0.0  ;;  %v3053_v23 = vmul.f32 %v12348_v9, %v2977_v63  ;;  %v12540_v48 = vld [vmem:[#allocation2 + $0xd8] sm:$0xff] }
 0x387   : > { %3208 = vst [vmem:[#allocation2 + $0x171] sm:$0xff] %v12466_v54  ;;  %v12475_v13 = vadd.f32 %v12353_v62, %v3054_v57  ;;  %v12546_v57 = vld [vmem:[#allocation2 + $0xf0] sm:$0xff]  ;;  %v12549_v63 = vld [vmem:[#allocation2 + $0xf8] sm:$0xff] }
 0x388   : > { %3207 = vst [vmem:[#allocation2 + $0x169] sm:$0xff] %v12470_v0  ;;  %v12479_v31 = vadd.f32 %v12353_v62, %v3053_v23  ;;  %9063 = vmatprep.mubr.f32.mxu1 %v12470_v0  ;;  %v3795_v62 = vld [vmem:[#allocation3 + $0x120] sm:$0xff]  ;;  %v12552_v23 = vld [vmem:[#allocation2 + $0x108] sm:$0xff] }
 0x389   : > { %v13398_v26 = vmax.f32 %v12475_v13, 0.0  ;;  %9064 = vmatmul.mubr.f32.gmra.mrb[30].mxu1 %v12466_v54  ;;  %v10110_v45 = vpack.c.bf16 %v3796_v41, %v3795_v62  ;;  %v12564_v62 = vld [vmem:[#allocation2 + $0x138] sm:$0xff]  ;;  %v12567_v41 = vld [vmem:[#allocation2 + $0x140] sm:$0xff] }
 0x38a   : > { %v13399_v9 = vmax.f32 %v12479_v31, 0.0  ;;  %9098 = vmatprep.mubr.f32.mxu1 %v11106_v28 }
 0x38b   : > { %3210 = vst [vmem:[#allocation2 + $0x189] sm:$0xff] %v13398_v26  ;;  %v4108_v26 = vld [vmem:[#allocation3 + $0x1d8] sm:$0xff] }
 0x38c   : > { %3209 = vst [vmem:[#allocation2 + $0x181] sm:$0xff] %v13399_v9  ;;  %v4109_v9 = vld [vmem:[#allocation3 + $0x1e0] sm:$0xff] }
 0x38d   : > { %9099 = vmatmul.mubr.f32.vlgmr.msra.gmra.mrb[0].mxu1 %v11106_v28  ;;  %v10114_v28 = vpack.c.bf16 %v3798_v50, %v3797_v21  ;;  %v12573_v21 = vld [vmem:[#allocation2 + $0x158] sm:$0xff] }
 0x38e   : > { %9101 = vmatprep.mubr.f32.mxu1 %v12491_v27  ;;  %10105 = vmatpush3.bf16.msra.mxu1 %v12342_v7  ;;  %v12504_v7 = vld [vmem:[#allocation2 + $0x48] sm:$0xff] }
 0x38f   : > { %10107 = vmatprep.subr.bf16.mxu1 %v10106_v12  ;;  %v12576_v50 = vld [vmem:[#allocation2 + $0x168] sm:$0xff]  ;;  %v12579_v61 = vld [vmem:[#allocation2 + $0x170] sm:$0xff] }
 0x390   : > { %13511 = vst [vmem:[#allocation13_spill] sm:$0xff] %v12576_v50  ;;  %13512 = vst [vmem:[#allocation14_spill] sm:$0xff] %v12579_v61 }
 0x391   : > { %9102 = vmatmul.mubr.f32.gmra.mrb[2].mxu1 %v12495_v46 }
 0x392   : > { %9104 = vmatprep.mubr.f32.mxu1 %v12498_v18  ;;  %10109 = vmatpush3.bf16.msra.mxu1 %v10106_v12  ;;  %v12561_v12 = vld [vmem:[#allocation2 + $0x128] sm:$0xff] }
 0x393   : > { %10111 = vmatprep.subr.bf16.mxu1 %v10110_v45 }
 0x395   : > { %9105 = vmatmul.mubr.f32.gmra.mrb[4].mxu1 %v12501_v55 }
 0x396   : > { %9107 = vmatprep.mubr.f32.mxu1 %v12504_v7  ;;  %10113 = vmatpush3.bf16.msra.mxu1 %v10110_v45  ;;  %v12570_v45 = vld [vmem:[#allocation2 + $0x150] sm:$0xff] }
 0x397   : > { %10115 = vmatprep.subr.bf16.mxu1 %v10114_v28 }
 0x399   : > { %9108 = vmatmul.mubr.f32.gmra.mrb[6].mxu1 %v12507_v22 }
 0x39a   : > { %9110 = vmatprep.mubr.f32.mxu1 %v12510_v6  ;;  %10117 = vmatpush3.bf16.msra.mxu1 %v10114_v28  ;;  %v3758_v28 = vld [vmem:[#allocation2 + $0x2] sm:$0xff] }
 0x39b   : > { %10119 = vmatprep.subr.bf16.mxu1 %v10118_v2 }
 0x39d   : > { %9111 = vmatmul.mubr.f32.gmra.mrb[8].mxu1 %v12513_v34 }
 0x39e   : > { %9113 = vmatprep.mubr.f32.mxu1 %v12516_v10  ;;  %10121 = vmatpush3.bf16.msra.mxu1 %v10118_v2  ;;  %v4100_v2 = vld [vmem:[#allocation3 + $0x198] sm:$0xff] }
 0x39f   : > { %10123 = vmatprep.subr.bf16.mxu1 %v10122_v33  ;;  %v10138_v14 = vpack.c.bf16 %v4100_v2, %v4099_v1  ;;  %v4105_v1 = vld [vmem:[#allocation3 + $0x1c0] sm:$0xff]  ;;  %v4106_v2 = vld [vmem:[#allocation3 + $0x1c8] sm:$0xff] }
 0x3a1   : > { %9114 = vmatmul.mubr.f32.gmra.mrb[10].mxu1 %v12519_v11 }
 0x3a2   : > { %9116 = vmatprep.mubr.f32.mxu1 %v12522_v3  ;;  %10125 = vmatpush3.bf16.msra.mxu1 %v10122_v33  ;;  %v4101_v33 = vld [vmem:[#allocation3 + $0x1a0] sm:$0xff] }
 0x3a3   : > { %10127 = vmatprep.subr.bf16.mxu1 %v10126_v52 }
 0x3a5   : > { %9117 = vmatmul.mubr.f32.gmra.mrb[12].mxu1 %v12525_v24 }
 0x3a6   : > { %9119 = vmatprep.mubr.f32.mxu1 %v12528_v30  ;;  %10129 = vmatpush3.bf16.msra.mxu1 %v10126_v52  ;;  %v10142_v52 = vpack.c.bf16 %v4102_v8, %v4101_v33  ;;  %v12597_v33 = vld [vmem:[#allocation2 + $0x52] sm:$0xff]  ;;  %v4107_v8 = vld [vmem:[#allocation3 + $0x1d0] sm:$0xff] }
 0x3a7   : > { %10131 = vmatprep.subr.bf16.mxu1 %v10130_v19  ;;  %13514 = vst [vmem:[#allocation16_spill] sm:$0xff] %v12597_v33 }
 0x3a9   : > { %9120 = vmatmul.mubr.f32.gmra.mrb[14].mxu1 %v12531_v38 }
 0x3aa   : > { %9122 = vmatprep.mubr.f32.mxu1 %v12534_v44  ;;  %10133 = vmatpush3.bf16.msra.mxu1 %v10130_v19  ;;  %v4104_v19 = vld [vmem:[#allocation3 + $0x1b8] sm:$0xff] }
 0x3ab   : > { %10135 = vmatprep.subr.bf16.mxu1 %v10134_v37  ;;  %v10146_v29 = vpack.c.bf16 %v4104_v19, %v4103_v59  ;;  %v10154_v59 = vpack.c.bf16 %v4108_v26, %v4107_v8  ;;  %v12603_v19 = vld [vmem:[#allocation2 + $0x6a] sm:$0xff]  ;;  %v12612_v26 = vld [vmem:[#allocation2 + $0x92] sm:$0xff]  ;;  %v12615_v8 = vld [vmem:[#allocation2 + $0x9a] sm:$0xff] }
 0x3ac   : > { %13516 = vst [vmem:[#allocation18_spill] sm:$0xff] %v12603_v19 }
 0x3ad   : > { %9123 = vmatmul.mubr.f32.gmra.mrb[16].mxu1 %v12537_v47 }
 0x3ae   : > { %9125 = vmatprep.mubr.f32.mxu1 %v12540_v48 }
 0x3b1   : > { %9126 = vmatmul.mubr.f32.gmra.mrb[18].mxu1 %v12543_v53 }
 0x3b2   : > { %9128 = vmatprep.mubr.f32.mxu1 %v12546_v57 }
 0x3b5   : > { %9129 = vmatmul.mubr.f32.gmra.mrb[20].mxu1 %v12549_v63 }
 0x3b6   : > { %9131 = vmatprep.mubr.f32.mxu1 %v12552_v23 }
 0x3b9   : > { %9132 = vmatmul.mubr.f32.gmra.mrb[22].mxu1 %v12555_v35 }
 0x3ba   : > { %9134 = vmatprep.mubr.f32.mxu1 %v12558_v36 }
 0x3bd   : > { %9135 = vmatmul.mubr.f32.gmra.mrb[24].mxu1 %v12561_v12 }
 0x3be   : > { %9137 = vmatprep.mubr.f32.mxu1 %v12564_v62 }
 0x3c1   : > { %9138 = vmatmul.mubr.f32.gmra.mrb[26].mxu1 %v12567_v41 }
 0x3c2   : > { %9140 = vmatprep.mubr.f32.mxu1 %v12570_v45 }
 0x3c5   : > { %9141 = vmatmul.mubr.f32.gmra.mrb[28].mxu1 %v12573_v21 }
 0x3c6   : > { %9143 = vmatprep.mubr.f32.mxu1 %v12576_v50 }
 0x3c9   : > { %9144 = vmatmul.mubr.f32.gmra.mrb[30].mxu1 %v12579_v61 }
 0x3ca   : > { %9178 = vmatprep.mubr.f32.mxu1 %v3758_v28  ;;  %v12591_v28 = vld [vmem:[#allocation2 + $0x3a] sm:$0xff] }
 0x3cd   : > { %9179 = vmatmul.mubr.f32.vlgmr.msra.gmra.mrb[0].mxu1 %v3759_v5  ;;  %v10150_v5 = vpack.c.bf16 %v4106_v2, %v4105_v1  ;;  %v12609_v2 = vld [vmem:[#allocation2 + $0x82] sm:$0xff] }
 0x3ce   : > { %9181 = vmatprep.mubr.f32.mxu1 %v12582_v43  ;;  %10137 = vmatpush3.bf16.msra.mxu1 %v10134_v37  ;;  %v12594_v37 = vld [vmem:[#allocation2 + $0x4a] sm:$0xff] }
 0x3cf   : > { %10139 = vmatprep.subr.bf16.mxu1 %v10138_v14  ;;  %13513 = vst [vmem:[#allocation15_spill] sm:$0xff] %v12594_v37 }
 0x3d1   : > { %9182 = vmatmul.mubr.f32.gmra.mrb[2].mxu1 %v12585_v58 }
 0x3d2   : > { %9184 = vmatprep.mubr.f32.mxu1 %v12588_v25  ;;  %10141 = vmatpush3.bf16.msra.mxu1 %v10138_v14  ;;  %v12600_v14 = vld [vmem:[#allocation2 + $0x62] sm:$0xff] }
 0x3d3   : > { %10143 = vmatprep.subr.bf16.mxu1 %v10142_v52  ;;  %13515 = vst [vmem:[#allocation17_spill] sm:$0xff] %v12600_v14 }
 0x3d5   : > { %9185 = vmatmul.mubr.f32.gmra.mrb[4].mxu1 %v12591_v28 }
 0x3d6   : > { %9187 = vmatprep.mubr.f32.mxu1 %v12594_v37  ;;  %10145 = vmatpush3.bf16.msra.mxu1 %v10142_v52  ;;  %v4110_v37 = vld [vmem:[#allocation3 + $0x1e8] sm:$0xff] }
 0x3d7   : > { %10147 = vmatprep.subr.bf16.mxu1 %v10146_v29  ;;  %v12606_v52 = vld [vmem:[#allocation2 + $0x7a] sm:$0xff]  ;;  %v10158_v1 = vpack.c.bf16 %v4110_v37, %v4109_v9  ;;  %v12618_v9 = vld [vmem:[#allocation2 + $0xaa] sm:$0xff] }
 0x3d8   : > { %13517 = vst [vmem:[#allocation19_spill] sm:$0xff] %v12606_v52  ;;  %13518 = vst [vmem:[#allocation20_spill] sm:$0xff] %v12618_v9 }
 0x3d9   : > { %9188 = vmatmul.mubr.f32.gmra.mrb[6].mxu1 %v12597_v33  ;;  %v4111_v33 = vld [vmem:[#allocation3 + $0x1f0] sm:$0xff] }
 0x3da   : > { %9190 = vmatprep.mubr.f32.mxu1 %v12600_v14  ;;  %10149 = vmatpush3.bf16.msra.mxu1 %v10146_v29  ;;  %v4112_v14 = vld [vmem:[#allocation3 + $0x1f8] sm:$0xff] }
 0x3db   : > { %10151 = vmatprep.subr.bf16.mxu1 %v10150_v5  ;;  %v10162_v29 = vpack.c.bf16 %v4112_v14, %v4111_v33  ;;  %v12627_v33 = vld [vmem:[#allocation2 + $0xca] sm:$0xff]  ;;  %v12630_v14 = vld [vmem:[#allocation2 + $0xda] sm:$0xff] }
 0x3dc   : > { %13521 = vst [vmem:[#allocation23_spill] sm:$0xff] %v12627_v33  ;;  %13522 = vst [vmem:[#allocation24_spill] sm:$0xff] %v12630_v14 }
 0x3dd   : > { %9191 = vmatmul.mubr.f32.gmra.mrb[8].mxu1 %v12603_v19  ;;  %v4403_v19 = vld [vmem:[#allocation3 + $0x200] sm:$0xff] }
 0x3de   : > { %9193 = vmatprep.mubr.f32.mxu1 %v12606_v52  ;;  %10153 = vmatpush3.bf16.msra.mxu1 %v10150_v5  ;;  %v4404_v52 = vld [vmem:[#allocation3 + $0x208] sm:$0xff] }
 0x3df   : > { %10155 = vmatprep.subr.bf16.mxu1 %v10154_v59  ;;  %v10166_v37 = vpack.c.bf16 %v4404_v52, %v4403_v19  ;;  %v12621_v5 = vld [vmem:[#allocation2 + $0xb2] sm:$0xff]  ;;  %v12639_v52 = vld [vmem:[#allocation2 + $0xfa] sm:$0xff] }
 0x3e0   : > { %13519 = vst [vmem:[#allocation21_spill] sm:$0xff] %v12621_v5  ;;  %v12636_v19 = vld [vmem:[#allocation2 + $0xf2] sm:$0xff]  ;;  %13525 = vst [vmem:[#allocation27_spill] sm:$0xff] %v12639_v52 }
 0x3e1   : > { %9194 = vmatmul.mubr.f32.gmra.mrb[10].mxu1 %v12609_v2  ;;  %13524 = vst [vmem:[#allocation26_spill] sm:$0xff] %v12636_v19 }
 0x3e2   : > { %9196 = vmatprep.mubr.f32.mxu1 %v12612_v26  ;;  %10157 = vmatpush3.bf16.msra.mxu1 %v10154_v59  ;;  %v12624_v59 = vld [vmem:[#allocation2 + $0xc2] sm:$0xff] }
 0x3e3   : > { %10159 = vmatprep.subr.bf16.mxu1 %v10158_v1  ;;  %13520 = vst [vmem:[#allocation22_spill] sm:$0xff] %v12624_v59 }
 0x3e5   : > { %9197 = vmatmul.mubr.f32.gmra.mrb[12].mxu1 %v12615_v8 }
 0x3e6   : > { %9199 = vmatprep.mubr.f32.mxu1 %v12618_v9  ;;  %10161 = vmatpush3.bf16.msra.mxu1 %v10158_v1  ;;  %v12633_v1 = vld [vmem:[#allocation2 + $0xe2] sm:$0xff]  ;;  %v4408_v9 = vld [vmem:[#allocation3 + $0x228] sm:$0xff] }
 0x3e7   : > { %10163 = vmatprep.subr.bf16.mxu1 %v10162_v29  ;;  %13523 = vst [vmem:[#allocation25_spill] sm:$0xff] %v12633_v1 }
 0x3e9   : > { %9200 = vmatmul.mubr.f32.gmra.mrb[14].mxu1 %v12621_v5  ;;  %v4407_v5 = vld [vmem:[#allocation3 + $0x220] sm:$0xff] }
 0x3ea   : > { %9202 = vmatprep.mubr.f32.mxu1 %v12624_v59  ;;  %10165 = vmatpush3.bf16.msra.mxu1 %v10162_v29  ;;  %v12642_v29 = vld [vmem:[#allocation2 + $0x10a] sm:$0xff]  ;;  %v4405_v59 = vld [vmem:[#allocation3 + $0x210] sm:$0xff] }
 0x3eb   : > { %10167 = vmatprep.subr.bf16.mxu1 %v10166_v37  ;;  %13526 = vst [vmem:[#allocation28_spill] sm:$0xff] %v12642_v29 }
 0x3ed   : > { %9203 = vmatmul.mubr.f32.gmra.mrb[16].mxu1 %v12627_v33  ;;  %v12645_v33 = vld [vmem:[#allocation2 + $0x112] sm:$0xff] }
 0x3ee   : > { %9205 = vmatprep.mubr.f32.mxu1 %v12630_v14  ;;  %13527 = vst [vmem:[#allocation29_spill] sm:$0xff] %v12645_v33  ;;  %v12648_v14 = vld [vmem:[#allocation2 + $0x122] sm:$0xff] }
 0x3ef   : > { %13528 = vst [vmem:[#allocation30_spill] sm:$0xff] %v12648_v14 }
 0x3f1   : > { %9206 = vmatmul.mubr.f32.gmra.mrb[18].mxu1 %v12633_v1  ;;  %v12651_v1 = vld [vmem:[#allocation2 + $0x12a] sm:$0xff] }
 0x3f2   : > { %9208 = vmatprep.mubr.f32.mxu1 %v12636_v19  ;;  %13529 = vst [vmem:[#allocation31_spill] sm:$0xff] %v12651_v1  ;;  %v12654_v19 = vld [vmem:[#allocation2 + $0x13a] sm:$0xff] }
 0x3f3   : > { %13530 = vst [vmem:[#allocation32_spill] sm:$0xff] %v12654_v19 }
 0x3f5   : > { %9209 = vmatmul.mubr.f32.gmra.mrb[20].mxu1 %v12639_v52  ;;  %v12657_v52 = vld [vmem:[#allocation2 + $0x142] sm:$0xff] }
 0x3f6   : > { %9211 = vmatprep.mubr.f32.mxu1 %v12642_v29  ;;  %13531 = vst [vmem:[#allocation33_spill] sm:$0xff] %v12657_v52  ;;  %v12660_v29 = vld [vmem:[#allocation2 + $0x152] sm:$0xff] }
 0x3f7   : > { %13532 = vst [vmem:[#allocation34_spill] sm:$0xff] %v12660_v29 }
 0x3f9   : > { %9212 = vmatmul.mubr.f32.gmra.mrb[22].mxu1 %v12645_v33  ;;  %v12663_v33 = vld [vmem:[#allocation2 + $0x15a] sm:$0xff] }
 0x3fa   : > { %9214 = vmatprep.mubr.f32.mxu1 %v12648_v14  ;;  %13533 = vst [vmem:[#allocation35_spill] sm:$0xff] %v12663_v33  ;;  %v12666_v14 = vld [vmem:[#allocation2 + $0x16a] sm:$0xff] }
 0x3fb   : > { %13534 = vst [vmem:[#allocation36_spill] sm:$0xff] %v12666_v14 }
 0x3fd   : > { %9215 = vmatmul.mubr.f32.gmra.mrb[24].mxu1 %v12651_v1  ;;  %v12669_v1 = vld [vmem:[#allocation2 + $0x172] sm:$0xff] }
 0x3fe   : > { %9217 = vmatprep.mubr.f32.mxu1 %v12654_v19  ;;  %13535 = vst [vmem:[#allocation37_spill] sm:$0xff] %v12669_v1  ;;  %v4406_v19 = vld [vmem:[#allocation3 + $0x218] sm:$0xff] }
 0x401   : > { %9218 = vmatmul.mubr.f32.gmra.mrb[26].mxu1 %v12657_v52  ;;  %v10170_v52 = vpack.c.bf16 %v4406_v19, %v4405_v59  ;;  %v4412_v59 = vld [vmem:[#allocation3 + $0x248] sm:$0xff]  ;;  %v4415_v19 = vld [vmem:[#allocation3 + $0x260] sm:$0xff] }
 0x402   : > { %9220 = vmatprep.mubr.f32.mxu1 %v12660_v29  ;;  %v4409_v29 = vld [vmem:[#allocation3 + $0x230] sm:$0xff] }
 0x405   : > { %9221 = vmatmul.mubr.f32.gmra.mrb[28].mxu1 %v12663_v33  ;;  %v10174_v33 = vpack.c.bf16 %v4408_v9, %v4407_v5  ;;  %v4414_v9 = vld [vmem:[#allocation3 + $0x258] sm:$0xff] }
 0x406   : > { %9223 = vmatprep.mubr.f32.mxu1 %v12666_v14  ;;  %v4410_v14 = vld [vmem:[#allocation3 + $0x238] sm:$0xff] }
 0x409   : > { %9224 = vmatmul.mubr.f32.gmra.mrb[30].mxu1 %v12669_v1  ;;  %v10178_v1 = vpack.c.bf16 %v4410_v14, %v4409_v29  ;;  %v4416_v14 = vld [vmem:[#allocation3 + $0x268] sm:$0xff]  ;;  %v4418_v29 = vld [vmem:[#allocation3 + $0x278] sm:$0xff] }
 0x40a   : > { %9258 = vmatprep.mubr.f32.mxu1 %v12491_v27  ;;  %v4411_v27 = vld [vmem:[#allocation3 + $0x240] sm:$0xff] }
 0x40d   : > { %9259 = vmatmul.mubr.f32.vlgmr.msra.gmra.mrb[0].mxu1 %v12495_v46  ;;  %v10182_v46 = vpack.c.bf16 %v4412_v59, %v4411_v27  ;;  %v4709_v27 = vld [vmem:[#allocation3 + $0x280] sm:$0xff]  ;;  %v4710_v59 = vld [vmem:[#allocation3 + $0x288] sm:$0xff] }
 0x40e   : > { %9261 = vmatprep.mubr.f32.mxu1 %v12498_v18  ;;  %10169 = vmatpush3.bf16.msra.mxu1 %v10166_v37  ;;  %v4413_v37 = vld [vmem:[#allocation3 + $0x250] sm:$0xff] }
 0x40f   : > { %10171 = vmatprep.subr.bf16.mxu1 %v10170_v52  ;;  %v10186_v5 = vpack.c.bf16 %v4414_v9, %v4413_v37  ;;  %v12702_v37 = vld [vmem:[#allocation2 + $0x180] sm:$0xff]  ;;  %v12705_v9 = vld [vmem:[#allocation2 + $0x188] sm:$0xff] }
 0x410   : > { %13536 = vst [vmem:[#allocation38_spill] sm:$0xff] %v12702_v37  ;;  %13537 = vst [vmem:[#allocation39_spill] sm:$0xff] %v12705_v9 }
 0x411   : > { %9262 = vmatmul.mubr.f32.gmra.mrb[2].mxu1 %v12501_v55 }
 0x412   : > { %9264 = vmatprep.mubr.f32.mxu1 %v12504_v7  ;;  %10173 = vmatpush3.bf16.msra.mxu1 %v10170_v52  ;;  %v4417_v52 = vld [vmem:[#allocation3 + $0x270] sm:$0xff] }
 0x413   : > { %10175 = vmatprep.subr.bf16.mxu1 %v10174_v33 }
 0x415   : > { %9265 = vmatmul.mubr.f32.gmra.mrb[4].mxu1 %v12507_v22 }
 0x416   : > { %9267 = vmatprep.mubr.f32.mxu1 %v12510_v6  ;;  %10177 = vmatpush3.bf16.msra.mxu1 %v10174_v33  ;;  %v10190_v33 = vpack.c.bf16 %v4416_v14, %v4415_v19  ;;  %v4712_v19 = vld [vmem:[#allocation3 + $0x298] sm:$0xff]  ;;  %v4370_v14 = vld [vmem:[#allocation2 + $0x19] sm:$0xff] }
 0x417   : > { %10179 = vmatprep.subr.bf16.mxu1 %v10178_v1 }
 0x419   : > { %9268 = vmatmul.mubr.f32.gmra.mrb[6].mxu1 %v12513_v34 }
 0x41a   : > { %9270 = vmatprep.mubr.f32.mxu1 %v12516_v10  ;;  %10181 = vmatpush3.bf16.msra.mxu1 %v10178_v1  ;;  %v10194_v1 = vpack.c.bf16 %v4418_v29, %v4417_v52  ;;  %v4371_v52 = vld [vmem:[#allocation2 + $0x21] sm:$0xff]  ;;  %v4713_v29 = vld [vmem:[#allocation3 + $0x2a0] sm:$0xff] }
 0x41b   : > { %10183 = vmatprep.subr.bf16.mxu1 %v10182_v46 }
 0x41d   : > { %9271 = vmatmul.mubr.f32.gmra.mrb[8].mxu1 %v12519_v11 }
 0x41e   : > { %9273 = vmatprep.mubr.f32.mxu1 %v12522_v3  ;;  %10185 = vmatpush3.bf16.msra.mxu1 %v10182_v46  ;;  %v10198_v46 = vpack.c.bf16 %v4710_v59, %v4709_v27  ;;  %v12708_v27 = vld [vmem:[#allocation2 + $0x31] sm:$0xff] }
 0x41f   : > { %10187 = vmatprep.subr.bf16.mxu1 %v10186_v5 }
 0x421   : > { %9274 = vmatmul.mubr.f32.gmra.mrb[10].mxu1 %v12525_v24 }
 0x422   : > { %9276 = vmatprep.mubr.f32.mxu1 %v12528_v30  ;;  %10189 = vmatpush3.bf16.msra.mxu1 %v10186_v5  ;;  %v4711_v5 = vld [vmem:[#allocation3 + $0x290] sm:$0xff] }
 0x423   : > { %10191 = vmatprep.subr.bf16.mxu1 %v10190_v33 }
 0x425   : > { %9277 = vmatmul.mubr.f32.gmra.mrb[12].mxu1 %v12531_v38 }
 0x426   : > { %9279 = vmatprep.mubr.f32.mxu1 %v12534_v44  ;;  %10193 = vmatpush3.bf16.msra.mxu1 %v10190_v33  ;;  %v10202_v33 = vpack.c.bf16 %v4712_v19, %v4711_v5  ;;  %v12717_v19 = vld [vmem:[#allocation2 + $0x51] sm:$0xff] }
 0x427   : > { %10195 = vmatprep.subr.bf16.mxu1 %v10194_v1  ;;  %13540 = vst [vmem:[#allocation42_spill] sm:$0xff] %v12717_v19 }
 0x429   : > { %9280 = vmatmul.mubr.f32.gmra.mrb[14].mxu1 %v12537_v47 }
 0x42a   : > { %9282 = vmatprep.mubr.f32.mxu1 %v12540_v48  ;;  %10197 = vmatpush3.bf16.msra.mxu1 %v10194_v1  ;;  %v4714_v1 = vld [vmem:[#allocation3 + $0x2a8] sm:$0xff] }
 0x42b   : > { %10199 = vmatprep.subr.bf16.mxu1 %v10198_v46  ;;  %v10206_v59 = vpack.c.bf16 %v4714_v1, %v4713_v29  ;;  %v12723_v1 = vld [vmem:[#allocation2 + $0x69] sm:$0xff] }
 0x42c   : > { %13542 = vst [vmem:[#allocation44_spill] sm:$0xff] %v12723_v1 }
 0x42d   : > { %9283 = vmatmul.mubr.f32.gmra.mrb[16].mxu1 %v12543_v53 }
 0x42e   : > { %9285 = vmatprep.mubr.f32.mxu1 %v12546_v57 }
 0x431   : > { %9286 = vmatmul.mubr.f32.gmra.mrb[18].mxu1 %v12549_v63 }
 0x432   : > { %9288 = vmatprep.mubr.f32.mxu1 %v12552_v23 }
 0x435   : > { %9289 = vmatmul.mubr.f32.gmra.mrb[20].mxu1 %v12555_v35 }
 0x436   : > { %9291 = vmatprep.mubr.f32.mxu1 %v12558_v36 }
 0x439   : > { %9292 = vmatmul.mubr.f32.gmra.mrb[22].mxu1 %v12561_v12 }
 0x43a   : > { %9294 = vmatprep.mubr.f32.mxu1 %v12564_v62 }
 0x43d   : > { %9295 = vmatmul.mubr.f32.gmra.mrb[24].mxu1 %v12567_v41 }
 0x43e   : > { %9297 = vmatprep.mubr.f32.mxu1 %v12570_v45 }
 0x441   : > { %9298 = vmatmul.mubr.f32.gmra.mrb[26].mxu1 %v12573_v21 }
 0x442   : > { %9300 = vmatprep.mubr.f32.mxu1 %v12576_v50  ;;  %v4716_v50 = vld [vmem:[#allocation3 + $0x2b8] sm:$0xff] }
 0x445   : > { %9301 = vmatmul.mubr.f32.gmra.mrb[28].mxu1 %v12579_v61  ;;  %v4715_v61 = vld [vmem:[#allocation3 + $0x2b0] sm:$0xff] }
 0x446   : > { %9303 = vmatprep.mubr.f32.mxu1 %v12702_v37  ;;  %v12711_v37 = vld [vmem:[#allocation2 + $0x39] sm:$0xff]  ;;  %v10210_v5 = vpack.c.bf16 %v4716_v50, %v4715_v61 }
 0x447   : > { %13538 = vst [vmem:[#allocation40_spill] sm:$0xff] %v12711_v37  ;;  %v12726_v50 = vld [vmem:[#allocation2 + $0x79] sm:$0xff] }
 0x448   : > { %13543 = vst [vmem:[#allocation45_spill] sm:$0xff] %v12726_v50 }
 0x449   : > { %9304 = vmatmul.mubr.f32.gmra.mrb[30].mxu1 %v12705_v9  ;;  %v12714_v9 = vld [vmem:[#allocation2 + $0x49] sm:$0xff] }
 0x44a   : > { %9338 = vmatprep.mubr.f32.mxu1 %v4370_v14  ;;  %13539 = vst [vmem:[#allocation41_spill] sm:$0xff] %v12714_v9  ;;  %v4717_v14 = vld [vmem:[#allocation3 + $0x2c0] sm:$0xff] }
 0x44d   : > { %9339 = vmatmul.mubr.f32.vlgmr.msra.gmra.mrb[0].mxu1 %v4371_v52  ;;  %v4718_v52 = vld [vmem:[#allocation3 + $0x2c8] sm:$0xff] }
 0x44e   : > { %9341 = vmatprep.mubr.f32.mxu1 %v12708_v27  ;;  %10201 = vmatpush3.bf16.msra.mxu1 %v10198_v46  ;;  %v12720_v46 = vld [vmem:[#allocation2 + $0x61] sm:$0xff]  ;;  %v10214_v29 = vpack.c.bf16 %v4718_v52, %v4717_v14  ;;  %v12735_v52 = vld [vmem:[#allocation2 + $0x99] sm:$0xff] }
 0x44f   : > { %10203 = vmatprep.subr.bf16.mxu1 %v10202_v33  ;;  %13541 = vst [vmem:[#allocation43_spill] sm:$0xff] %v12720_v46 }
 0x451   : > { %9342 = vmatmul.mubr.f32.gmra.mrb[2].mxu1 %v12711_v37  ;;  %v4719_v37 = vld [vmem:[#allocation3 + $0x2d0] sm:$0xff] }
 0x452   : > { %9344 = vmatprep.mubr.f32.mxu1 %v12714_v9  ;;  %10205 = vmatpush3.bf16.msra.mxu1 %v10202_v33  ;;  %v4720_v9 = vld [vmem:[#allocation3 + $0x2d8] sm:$0xff] }
 0x453   : > { %10207 = vmatprep.subr.bf16.mxu1 %v10206_v59  ;;  %v10218_v61 = vpack.c.bf16 %v4720_v9, %v4719_v37  ;;  %v12729_v33 = vld [vmem:[#allocation2 + $0x81] sm:$0xff]  ;;  %v12738_v37 = vld [vmem:[#allocation2 + $0xa9] sm:$0xff] }
 0x454   : > { %13544 = vst [vmem:[#allocation46_spill] sm:$0xff] %v12729_v33 }
 0x455   : > { %9345 = vmatmul.mubr.f32.gmra.mrb[4].mxu1 %v12717_v19  ;;  %v4721_v19 = vld [vmem:[#allocation3 + $0x2e0] sm:$0xff] }
 0x456   : > { %9347 = vmatprep.mubr.f32.mxu1 %v12720_v46  ;;  %10209 = vmatpush3.bf16.msra.mxu1 %v10206_v59  ;;  %v4722_v46 = vld [vmem:[#allocation3 + $0x2e8] sm:$0xff] }
 0x457   : > { %10211 = vmatprep.subr.bf16.mxu1 %v10210_v5  ;;  %v12732_v59 = vld [vmem:[#allocation2 + $0x91] sm:$0xff]  ;;  %v10222_v14 = vpack.c.bf16 %v4722_v46, %v4721_v19  ;;  %v12745_v46 = vld [vmem:[#allocation2 + $0xc9] sm:$0xff] }
 0x458   : > { %13545 = vst [vmem:[#allocation47_spill] sm:$0xff] %v12732_v59 }
 0x459   : > { %9348 = vmatmul.mubr.f32.gmra.mrb[6].mxu1 %v12723_v1  ;;  %v4723_v1 = vld [vmem:[#allocation3 + $0x2f0] sm:$0xff] }
 0x45a   : > { %9350 = vmatprep.mubr.f32.mxu1 %v12726_v50  ;;  %10213 = vmatpush3.bf16.msra.mxu1 %v10210_v5  ;;  %v4724_v50 = vld [vmem:[#allocation3 + $0x2f8] sm:$0xff]  ;;  %v12741_v5 = vld [vmem:[#allocation2 + $0xb1] sm:$0xff] }
 0x45b   : > { %10215 = vmatprep.subr.bf16.mxu1 %v10214_v29  ;;  %v10226_v9 = vpack.c.bf16 %v4724_v50, %v4723_v1  ;;  %v5028_v1 = vld [vmem:[#allocation3 + $0x360] sm:$0xff]  ;;  %v5029_v50 = vld [vmem:[#allocation3 + $0x368] sm:$0xff] }
 0x45d   : > { %9351 = vmatmul.mubr.f32.gmra.mrb[8].mxu1 %v12729_v33  ;;  %v5016_v33 = vld [vmem:[#allocation3 + $0x300] sm:$0xff] }
 0x45e   : > { %9353 = vmatprep.mubr.f32.mxu1 %v12732_v59  ;;  %10217 = vmatpush3.bf16.msra.mxu1 %v10214_v29  ;;  %v5017_v59 = vld [vmem:[#allocation3 + $0x308] sm:$0xff]  ;;  %v13552_v29 = vld [vmem:[#allocation19_spill] sm:$0xff] }
 0x45f   : > { %10219 = vmatprep.subr.bf16.mxu1 %v10218_v61  ;;  %v10230_v19 = vpack.c.bf16 %v5017_v59, %v5016_v33  ;;  %v5030_v33 = vld [vmem:[#allocation3 + $0x370] sm:$0xff]  ;;  %v5031_v59 = vld [vmem:[#allocation3 + $0x378] sm:$0xff] }
 0x461   : > { %9354 = vmatmul.mubr.f32.gmra.mrb[10].mxu1 %v12735_v52 }
 0x462   : > { %9356 = vmatprep.mubr.f32.mxu1 %v12738_v37  ;;  %10221 = vmatpush3.bf16.msra.mxu1 %v10218_v61  ;;  %v10254_v61 = vpack.c.bf16 %v5029_v50, %v5028_v1  ;;  %v5327_v1 = vld [vmem:[#allocation3 + $0x3a8] sm:$0xff] }
 0x463   : > { %10223 = vmatprep.subr.bf16.mxu1 %v10222_v14 }
 0x465   : > { %9357 = vmatmul.mubr.f32.gmra.mrb[12].mxu1 %v12741_v5 }
 0x466   : > { %9359 = vmatprep.mubr.f32.mxu1 %v12388_v20  ;;  %10225 = vmatpush3.bf16.msra.mxu1 %v10222_v14  ;;  %v13546_v20 = vmax.f32 %v12479_v31, 0.0  ;;  %v13553_v14 = vld [vmem:[#allocation20_spill] sm:$0xff] }
 0x467   : > { %10227 = vmatprep.subr.bf16.mxu1 %v10226_v9 }
 0x469   : > { %9360 = vmatmul.mubr.f32.gmra.mrb[14].mxu1 %v12745_v46 }
 0x46a   : > { %9362 = vmatprep.mubr.f32.mxu1 %v12398_v17  ;;  %10229 = vmatpush3.bf16.msra.mxu1 %v10226_v9  ;;  %v5019_v17 = vld [vmem:[#allocation3 + $0x318] sm:$0xff]  ;;  %v10258_v9 = vpack.c.bf16 %v5031_v59, %v5030_v33 }
 0x46b   : > { %10231 = vmatprep.subr.bf16.mxu1 %v10230_v19  ;;  %v5329_v33 = vld [vmem:[#allocation3 + $0x3b8] sm:$0xff] }
 0x46d   : > { %9363 = vmatmul.mubr.f32.gmra.mrb[16].mxu1 %v12395_v40  ;;  %v5018_v40 = vld [vmem:[#allocation3 + $0x310] sm:$0xff] }
 0x46e   : > { %9365 = vmatprep.mubr.f32.mxu1 %v12410_v56  ;;  %v10234_v56 = vpack.c.bf16 %v5019_v17, %v5018_v40  ;;  %v13554_v40 = vld [vmem:[#allocation21_spill] sm:$0xff]  ;;  %v13555_v17 = vld [vmem:[#allocation22_spill] sm:$0xff] }
 0x471   : > { %9366 = vmatmul.mubr.f32.gmra.mrb[18].mxu1 %v12406_v51  ;;  %v13547_v51 = vmax.f32 %v12475_v13, 0.0  ;;  %v13550_v13 = vld [vmem:[#allocation17_spill] sm:$0xff] }
 0x472   : > { %9368 = vmatprep.mubr.f32.mxu1 %v12422_v60  ;;  %v5021_v60 = vld [vmem:[#allocation3 + $0x328] sm:$0xff] }
 0x475   : > { %9369 = vmatmul.mubr.f32.gmra.mrb[20].mxu1 %v12418_v4  ;;  %v5020_v4 = vld [vmem:[#allocation3 + $0x320] sm:$0xff] }
 0x476   : > { %9371 = vmatprep.mubr.f32.mxu1 %v12434_v49  ;;  %v5022_v49 = vld [vmem:[#allocation3 + $0x330] sm:$0xff] }
 0x479   : > { %9372 = vmatmul.mubr.f32.gmra.mrb[22].mxu1 %v12430_v42  ;;  %v10238_v42 = vpack.c.bf16 %v5021_v60, %v5020_v4  ;;  %v13560_v4 = vld [vmem:[#allocation27_spill] sm:$0xff]  ;;  %v13561_v60 = vld [vmem:[#allocation28_spill] sm:$0xff] }
 0x47a   : > { %9374 = vmatprep.mubr.f32.mxu1 %v12446_v16  ;;  %v13548_v16 = vld [vmem:[#allocation15_spill] sm:$0xff] }
 0x47d   : > { %9375 = vmatmul.mubr.f32.gmra.mrb[24].mxu1 %v12442_v15  ;;  %v5023_v15 = vld [vmem:[#allocation3 + $0x338] sm:$0xff] }
 0x47e   : > { %9377 = vmatprep.mubr.f32.mxu1 %v12458_v39  ;;  %v5024_v39 = vld [vmem:[#allocation3 + $0x340] sm:$0xff] }
 0x481   : > { %9378 = vmatmul.mubr.f32.gmra.mrb[26].mxu1 %v12454_v32  ;;  %v10242_v32 = vpack.c.bf16 %v5023_v15, %v5022_v49  ;;  %v13563_v49 = vld [vmem:[#allocation30_spill] sm:$0xff]  ;;  %v13564_v15 = vld [vmem:[#allocation31_spill] sm:$0xff] }
 0x482   : > { %9380 = vmatprep.mubr.f32.mxu1 %v12470_v0  ;;  %v13549_v0 = vld [vmem:[#allocation16_spill] sm:$0xff] }
 0x485   : > { %9381 = vmatmul.mubr.f32.gmra.mrb[28].mxu1 %v12466_v54  ;;  %v5025_v54 = vld [vmem:[#allocation3 + $0x348] sm:$0xff] }
 0x486   : > { %9383 = vmatprep.mubr.f32.mxu1 %v13546_v20  ;;  %v10246_v31 = vpack.c.bf16 %v5025_v54, %v5024_v39  ;;  %v5323_v20 = vld [vmem:[#allocation3 + $0x388] sm:$0xff]  ;;  %v13568_v54 = vld [vmem:[#allocation35_spill] sm:$0xff] }
 0x487   : > { %v13567_v39 = vld [vmem:[#allocation34_spill] sm:$0xff] }
 0x489   : > { %9384 = vmatmul.mubr.f32.gmra.mrb[30].mxu1 %v13547_v51  ;;  %v13557_v51 = vld [vmem:[#allocation24_spill] sm:$0xff] }
 0x48a   : > { %9418 = vmatprep.mubr.f32.mxu1 %v12582_v43  ;;  %v5026_v43 = vld [vmem:[#allocation3 + $0x350] sm:$0xff] }
 0x48d   : > { %9419 = vmatmul.mubr.f32.vlgmr.msra.gmra.mrb[0].mxu1 %v12585_v58  ;;  %v5027_v58 = vld [vmem:[#allocation3 + $0x358] sm:$0xff] }
 0x48e   : > { %9421 = vmatprep.mubr.f32.mxu1 %v12588_v25  ;;  %10233 = vmatpush3.bf16.msra.mxu1 %v10230_v19  ;;  %v13551_v25 = vld [vmem:[#allocation18_spill] sm:$0xff]  ;;  %v5322_v19 = vld [vmem:[#allocation3 + $0x380] sm:$0xff] }
 0x48f   : > { %10235 = vmatprep.subr.bf16.mxu1 %v10234_v56 }
 0x491   : > { %9422 = vmatmul.mubr.f32.gmra.mrb[2].mxu1 %v12591_v28  ;;  %v10250_v28 = vpack.c.bf16 %v5027_v58, %v5026_v43  ;;  %v12799_v43 = vld [vmem:[#allocation2 + $0x18a] sm:$0xff]  ;;  %v5324_v58 = vld [vmem:[#allocation3 + $0x390] sm:$0xff] }
 0x492   : > { %9424 = vmatprep.mubr.f32.mxu1 %v13548_v16  ;;  %10237 = vmatpush3.bf16.msra.mxu1 %v10234_v56  ;;  %v13559_v56 = vld [vmem:[#allocation26_spill] sm:$0xff]  ;;  %v13565_v16 = vld [vmem:[#allocation32_spill] sm:$0xff] }
 0x493   : > { %10239 = vmatprep.subr.bf16.mxu1 %v10238_v42 }
 0x495   : > { %9425 = vmatmul.mubr.f32.gmra.mrb[4].mxu1 %v13549_v0  ;;  %v13569_v0 = vld [vmem:[#allocation36_spill] sm:$0xff] }
 0x496   : > { %9427 = vmatprep.mubr.f32.mxu1 %v13550_v13  ;;  %10241 = vmatpush3.bf16.msra.mxu1 %v10238_v42  ;;  %v13562_v42 = vld [vmem:[#allocation29_spill] sm:$0xff] }
 0x497   : > { %10243 = vmatprep.subr.bf16.mxu1 %v10242_v32  ;;  %v13570_v13 = vld [vmem:[#allocation37_spill] sm:$0xff] }
 0x499   : > { %9428 = vmatmul.mubr.f32.gmra.mrb[6].mxu1 %v13551_v25  ;;  %v5325_v25 = vld [vmem:[#allocation3 + $0x398] sm:$0xff] }
 0x49a   : > { %9430 = vmatprep.mubr.f32.mxu1 %v13552_v29  ;;  %10245 = vmatpush3.bf16.msra.mxu1 %v10242_v32  ;;  %v13566_v32 = vld [vmem:[#allocation33_spill] sm:$0xff]  ;;  %v10266_v29 = vpack.c.bf16 %v5325_v25, %v5324_v58  ;;  %v5303_v25 = vld [vmem:[#allocation2 + $0xd9] sm:$0xff] }
 0x49b   : > { %10247 = vmatprep.subr.bf16.mxu1 %v10246_v31 }
 0x49d   : > { %9431 = vmatmul.mubr.f32.gmra.mrb[8].mxu1 %v12609_v2  ;;  %v10262_v2 = vpack.c.bf16 %v5323_v20, %v5322_v19  ;;  %v5335_v19 = vld [vmem:[#allocation3 + $0x3e8] sm:$0xff]  ;;  %v5337_v20 = vld [vmem:[#allocation3 + $0x3f8] sm:$0xff] }
 0x49e   : > { %9433 = vmatprep.mubr.f32.mxu1 %v12612_v26  ;;  %10249 = vmatpush3.bf16.msra.mxu1 %v10246_v31  ;;  %v13556_v26 = vld [vmem:[#allocation23_spill] sm:$0xff] }
 0x49f   : > { %10251 = vmatprep.subr.bf16.mxu1 %v10250_v28  ;;  %v12796_v31 = vld [vmem:[#allocation2 + $0x182] sm:$0xff] }
 0x4a1   : > { %9434 = vmatmul.mubr.f32.gmra.mrb[10].mxu1 %v12615_v8  ;;  %v13558_v8 = vld [vmem:[#allocation25_spill] sm:$0xff] }
 0x4a2   : > { %9436 = vmatprep.mubr.f32.mxu1 %v13553_v14  ;;  %10253 = vmatpush3.bf16.msra.mxu1 %v10250_v28  ;;  %v5326_v28 = vld [vmem:[#allocation3 + $0x3a0] sm:$0xff]  ;;  %v5331_v14 = vld [vmem:[#allocation3 + $0x3c8] sm:$0xff] }
 0x4a3   : > { %10255 = vmatprep.subr.bf16.mxu1 %v10254_v61  ;;  %v10270_v50 = vpack.c.bf16 %v5327_v1, %v5326_v28  ;;  %v5307_v28 = vld [vmem:[#allocation2 + $0x109] sm:$0xff]  ;;  %v5309_v1 = vld [vmem:[#allocation2 + $0x121] sm:$0xff] }
 0x4a5   : > { %9437 = vmatmul.mubr.f32.gmra.mrb[12].mxu1 %v13554_v40  ;;  %v5629_v40 = vld [vmem:[#allocation3 + $0x408] sm:$0xff] }
 0x4a6   : > { %9439 = vmatprep.mubr.f32.mxu1 %v13555_v17  ;;  %10257 = vmatpush3.bf16.msra.mxu1 %v10254_v61  ;;  %v5328_v61 = vld [vmem:[#allocation3 + $0x3b0] sm:$0xff] }
 0x4a7   : > { %10259 = vmatprep.subr.bf16.mxu1 %v10258_v9  ;;  %v10274_v59 = vpack.c.bf16 %v5329_v33, %v5328_v61  ;;  %v13578_v17 = vld [vmem:[#allocation43_spill] sm:$0xff]  ;;  %v5313_v33 = vld [vmem:[#allocation2 + $0x151] sm:$0xff] }
 0x4a8   : > { %v5312_v61 = vld [vmem:[#allocation2 + $0x141] sm:$0xff] }
 0x4a9   : > { %9440 = vmatmul.mubr.f32.gmra.mrb[14].mxu1 %v13556_v26  ;;  %v5637_v26 = vld [vmem:[#allocation3 + $0x448] sm:$0xff] }
 0x4aa   : > { %9442 = vmatprep.mubr.f32.mxu1 %v13557_v51  ;;  %10261 = vmatpush3.bf16.msra.mxu1 %v10258_v9  ;;  %v5333_v9 = vld [vmem:[#allocation3 + $0x3d8] sm:$0xff] }
 0x4ab   : > { %10263 = vmatprep.subr.bf16.mxu1 %v10262_v2  ;;  %v13579_v51 = vld [vmem:[#allocation44_spill] sm:$0xff] }
 0x4ad   : > { %9443 = vmatmul.mubr.f32.gmra.mrb[16].mxu1 %v13558_v8  ;;  %v13580_v8 = vld [vmem:[#allocation45_spill] sm:$0xff] }
 0x4ae   : > { %9445 = vmatprep.mubr.f32.mxu1 %v13559_v56 }
 0x4b1   : > { %9446 = vmatmul.mubr.f32.gmra.mrb[18].mxu1 %v13560_v4  ;;  %v5638_v4 = vld [vmem:[#allocation3 + $0x450] sm:$0xff] }
 0x4b2   : > { %9448 = vmatprep.mubr.f32.mxu1 %v13561_v60  ;;  %v5639_v60 = vld [vmem:[#allocation3 + $0x458] sm:$0xff] }
 0x4b5   : > { %9449 = vmatmul.mubr.f32.gmra.mrb[20].mxu1 %v13562_v42  ;;  %v13581_v42 = vld [vmem:[#allocation46_spill] sm:$0xff] }
 0x4b6   : > { %9451 = vmatprep.mubr.f32.mxu1 %v13563_v49  ;;  %v13582_v49 = vld [vmem:[#allocation47_spill] sm:$0xff] }
 0x4b9   : > { %9452 = vmatmul.mubr.f32.gmra.mrb[22].mxu1 %v13564_v15  ;;  %v10314_v15 = vpack.c.bf16 %v5639_v60, %v5638_v4  ;;  %v6608_v4 = vld [vmem:[%s13358_s4 + $0x8] sm:$0xff] }
 0x4ba   : > { %9454 = vmatprep.mubr.f32.mxu1 %v13565_v16  ;;  %v5640_v16 = vld [vmem:[#allocation3 + $0x460] sm:$0xff] }
 0x4bd   : > { %9455 = vmatmul.mubr.f32.gmra.mrb[24].mxu1 %v13566_v32  ;;  %v5641_v32 = vld [vmem:[#allocation3 + $0x468] sm:$0xff] }
 0x4be   : > { %9457 = vmatprep.mubr.f32.mxu1 %v13567_v39  ;;  %v10318_v39 = vpack.c.bf16 %v5641_v32, %v5640_v16  ;;  %v6613_v16 = vld [vmem:[%s13358_s4 + $0x30] sm:$0xff] }
 0x4c1   : > { %9458 = vmatmul.mubr.f32.gmra.mrb[26].mxu1 %v13568_v54  ;;  %v5642_v54 = vld [vmem:[#allocation3 + $0x470] sm:$0xff] }
 0x4c2   : > { %9460 = vmatprep.mubr.f32.mxu1 %v13569_v0  ;;  %v5643_v0 = vld [vmem:[#allocation3 + $0x478] sm:$0xff] }
 0x4c3   : > { %v10322_v58 = vpack.c.bf16 %v5643_v0, %v5642_v54  ;;  %v6615_v0 = vld [vmem:[%s13358_s4 + $0x40] sm:$0xff] }
 0x4c5   : > { %9461 = vmatmul.mubr.f32.gmra.mrb[28].mxu1 %v13570_v13  ;;  %v5301_v13 = vld [vmem:[#allocation2 + $0xc1] sm:$0xff] }
 0x4c6   : > { %9463 = vmatprep.mubr.f32.mxu1 %v12796_v31 }
 0x4c9   : > { %9464 = vmatmul.mubr.f32.gmra.mrb[30].mxu1 %v12799_v43 }
 0x4ca   : > { %9498 = vmatprep.mubr.f32.mxu1 %v12498_v18  ;;  %v5330_v18 = vld [vmem:[#allocation3 + $0x3c0] sm:$0xff] }
 0x4cd   : > { %9499 = vmatmul.mubr.f32.vlgmr.msra.gmra.mrb[0].mxu1 %v12501_v55  ;;  %v10278_v55 = vpack.c.bf16 %v5331_v14, %v5330_v18  ;;  %v5315_v18 = vld [vmem:[#allocation2 + $0x169] sm:$0xff]  ;;  %v5316_v14 = vld [vmem:[#allocation2 + $0x171] sm:$0xff] }
 0x4ce   : > { %9501 = vmatprep.mubr.f32.mxu1 %v12504_v7  ;;  %10265 = vmatpush3.bf16.msra.mxu1 %v10262_v2  ;;  %v5332_v7 = vld [vmem:[#allocation3 + $0x3d0] sm:$0xff] }
 0x4cf   : > { %10267 = vmatprep.subr.bf16.mxu1 %v10266_v29 }
 0x4d1   : > { %9502 = vmatmul.mubr.f32.gmra.mrb[2].mxu1 %v12507_v22  ;;  %v10282_v22 = vpack.c.bf16 %v5333_v9, %v5332_v7  ;;  %v5319_v7 = vld [vmem:[#allocation2 + $0x199] sm:$0xff]  ;;  %v5318_v9 = vld [vmem:[#allocation2 + $0x189] sm:$0xff] }
 0x4d2   : > { %9504 = vmatprep.mubr.f32.mxu1 %v12510_v6  ;;  %10269 = vmatpush3.bf16.msra.mxu1 %v10266_v29  ;;  %v5334_v6 = vld [vmem:[#allocation3 + $0x3e0] sm:$0xff]  ;;  %v5306_v29 = vld [vmem:[#allocation2 + $0xf9] sm:$0xff] }
 0x4d3   : > { %10271 = vmatprep.subr.bf16.mxu1 %v10270_v50 }
 0x4d5   : > { %9505 = vmatmul.mubr.f32.gmra.mrb[4].mxu1 %v12513_v34  ;;  %v10286_v34 = vpack.c.bf16 %v5335_v19, %v5334_v6  ;;  %v5595_v6 = vld [vmem:[#allocation2 + $0x32] sm:$0xff]  ;;  %v5596_v19 = vld [vmem:[#allocation2 + $0x3a] sm:$0xff] }
 0x4d6   : > { %9507 = vmatprep.mubr.f32.mxu1 %v12516_v10  ;;  %10273 = vmatpush3.bf16.msra.mxu1 %v10270_v50  ;;  %v5336_v10 = vld [vmem:[#allocation3 + $0x3f0] sm:$0xff]  ;;  %v5310_v50 = vld [vmem:[#allocation2 + $0x129] sm:$0xff] }
 0x4d7   : > { %10275 = vmatprep.subr.bf16.mxu1 %v10274_v59 }
 0x4d9   : > { %9508 = vmatmul.mubr.f32.gmra.mrb[6].mxu1 %v12519_v11  ;;  %v10290_v11 = vpack.c.bf16 %v5337_v20, %v5336_v10  ;;  %v5598_v10 = vld [vmem:[#allocation2 + $0x52] sm:$0xff]  ;;  %v5599_v20 = vld [vmem:[#allocation2 + $0x62] sm:$0xff] }
 0x4da   : > { %9510 = vmatprep.mubr.f32.mxu1 %v12522_v3  ;;  %10277 = vmatpush3.bf16.msra.mxu1 %v10274_v59  ;;  %v5628_v3 = vld [vmem:[#allocation3 + $0x400] sm:$0xff]  ;;  %v5314_v59 = vld [vmem:[#allocation2 + $0x159] sm:$0xff] }
 0x4db   : > { %10279 = vmatprep.subr.bf16.mxu1 %v10278_v55 }
 0x4dd   : > { %9511 = vmatmul.mubr.f32.gmra.mrb[8].mxu1 %v12525_v24  ;;  %v10294_v24 = vpack.c.bf16 %v5629_v40, %v5628_v3  ;;  %v5601_v3 = vld [vmem:[#allocation2 + $0x7a] sm:$0xff]  ;;  %v5602_v40 = vld [vmem:[#allocation2 + $0x82] sm:$0xff] }
 0x4de   : > { %9513 = vmatprep.mubr.f32.mxu1 %v12528_v30  ;;  %10281 = vmatpush3.bf16.msra.mxu1 %v10278_v55  ;;  %v13571_v30 = vld [vmem:[#allocation13_spill] sm:$0xff]  ;;  %v5317_v55 = vld [vmem:[#allocation2 + $0x181] sm:$0xff] }
 0x4df   : > { %10283 = vmatprep.subr.bf16.mxu1 %v10282_v22 }
 0x4e1   : > { %9514 = vmatmul.mubr.f32.gmra.mrb[10].mxu1 %v12531_v38  ;;  %v13572_v38 = vld [vmem:[#allocation14_spill] sm:$0xff] }
 0x4e2   : > { %9516 = vmatprep.mubr.f32.mxu1 %v12534_v44  ;;  %10285 = vmatpush3.bf16.msra.mxu1 %v10282_v22  ;;  %v13573_v44 = vld [vmem:[#allocation38_spill] sm:$0xff]  ;;  %v5320_v22 = vld [vmem:[#allocation2 + $0x1a1] sm:$0xff] }
 0x4e3   : > { %10287 = vmatprep.subr.bf16.mxu1 %v10286_v34 }
 0x4e5   : > { %9517 = vmatmul.mubr.f32.gmra.mrb[12].mxu1 %v12537_v47  ;;  %v13574_v47 = vld [vmem:[#allocation39_spill] sm:$0xff] }
 0x4e6   : > { %9519 = vmatprep.mubr.f32.mxu1 %v12540_v48  ;;  %10289 = vmatpush3.bf16.msra.mxu1 %v10286_v34  ;;  %v12832_v48 = vld [vmem:[#allocation2] sm:$0xff]  ;;  %v5597_v34 = vld [vmem:[#allocation2 + $0x4a] sm:$0xff] }
 0x4e7   : > { %10291 = vmatprep.subr.bf16.mxu1 %v10290_v11 }
 0x4e9   : > { %9520 = vmatmul.mubr.f32.gmra.mrb[14].mxu1 %v12543_v53  ;;  %v5630_v53 = vld [vmem:[#allocation3 + $0x410] sm:$0xff] }
 0x4ea   : > { %9522 = vmatprep.mubr.f32.mxu1 %v12546_v57  ;;  %10293 = vmatpush3.bf16.msra.mxu1 %v10290_v11  ;;  %v5631_v57 = vld [vmem:[#allocation3 + $0x418] sm:$0xff] }
 0x4eb   : > { %10295 = vmatprep.subr.bf16.mxu1 %v10294_v24  ;;  %v5600_v11 = vld [vmem:[#allocation2 + $0x6a] sm:$0xff] }
 0x4ed   : > { %9523 = vmatmul.mubr.f32.gmra.mrb[16].mxu1 %v12549_v63  ;;  %v10298_v63 = vpack.c.bf16 %v5631_v57, %v5630_v53  ;;  %v5608_v53 = vld [vmem:[#allocation2 + $0xca] sm:$0xff]  ;;  %v5609_v57 = vld [vmem:[#allocation2 + $0xda] sm:$0xff] }
 0x4ee   : > { %9525 = vmatprep.mubr.f32.mxu1 %v12552_v23  ;;  %v5632_v23 = vld [vmem:[#allocation3 + $0x420] sm:$0xff] }
 0x4f1   : > { %9526 = vmatmul.mubr.f32.gmra.mrb[18].mxu1 %v12555_v35  ;;  %v5633_v35 = vld [vmem:[#allocation3 + $0x428] sm:$0xff] }
 0x4f2   : > { %9528 = vmatprep.mubr.f32.mxu1 %v12558_v36  ;;  %v13575_v36 = vld [vmem:[#allocation40_spill] sm:$0xff] }
 0x4f5   : > { %9529 = vmatmul.mubr.f32.gmra.mrb[20].mxu1 %v12561_v12  ;;  %v13576_v12 = vld [vmem:[#allocation41_spill] sm:$0xff] }
 0x4f6   : > { %9531 = vmatprep.mubr.f32.mxu1 %v12564_v62  ;;  %v10302_v62 = vpack.c.bf16 %v5633_v35, %v5632_v23  ;;  %v5611_v23 = vld [vmem:[#allocation2 + $0xf2] sm:$0xff]  ;;  %v5612_v35 = vld [vmem:[#allocation2 + $0xfa] sm:$0xff] }
 0x4f9   : > { %9532 = vmatmul.mubr.f32.gmra.mrb[22].mxu1 %v12567_v41  ;;  %v5634_v41 = vld [vmem:[#allocation3 + $0x430] sm:$0xff] }
 0x4fa   : > { %9534 = vmatprep.mubr.f32.mxu1 %v12570_v45  ;;  %v5635_v45 = vld [vmem:[#allocation3 + $0x438] sm:$0xff] }
 0x4fb   : > { %v10306_v2 = vpack.c.bf16 %v5635_v45, %v5634_v41  ;;  %v5616_v41 = vld [vmem:[#allocation2 + $0x12a] sm:$0xff]  ;;  %v5617_v45 = vld [vmem:[#allocation2 + $0x13a] sm:$0xff] }
 0x4fd   : > { %9535 = vmatmul.mubr.f32.gmra.mrb[24].mxu1 %v12573_v21  ;;  %v13577_v21 = vld [vmem:[#allocation42_spill] sm:$0xff] }
 0x4fe   : > { %9537 = vmatprep.mubr.f32.mxu1 %v13571_v30  ;;  %v5604_v30 = vld [vmem:[#allocation2 + $0x9a] sm:$0xff] }
 0x501   : > { %9538 = vmatmul.mubr.f32.gmra.mrb[26].mxu1 %v13572_v38  ;;  %v5605_v38 = vld [vmem:[#allocation2 + $0xaa] sm:$0xff] }
 0x502   : > { %9540 = vmatprep.mubr.f32.mxu1 %v13573_v44  ;;  %v5606_v44 = vld [vmem:[#allocation2 + $0xb2] sm:$0xff] }
 0x505   : > { %9541 = vmatmul.mubr.f32.gmra.mrb[28].mxu1 %v13574_v47  ;;  %v5607_v47 = vld [vmem:[#allocation2 + $0xc2] sm:$0xff] }
 0x506   : > { %9543 = vmatprep.mubr.f32.mxu1 %v12832_v48 }
 0x509   : > { %9544 = vmatmul.mubr.f32.gmra.mrb[30].mxu1 %v12832_v48 }
 0x50a   : > { %9578 = vmatprep.mubr.f32.mxu1 %v12708_v27  ;;  %v5636_v27 = vld [vmem:[#allocation3 + $0x440] sm:$0xff] }
 0x50b   : > { %v10310_v56 = vpack.c.bf16 %v5637_v26, %v5636_v27  ;;  %v5621_v27 = vld [vmem:[#allocation2 + $0x16a] sm:$0xff]  ;;  %v5622_v26 = vld [vmem:[#allocation2 + $0x172] sm:$0xff] }
 0x50d   : > { %9579 = vmatmul.mubr.f32.vlgmr.msra.gmra.mrb[0].mxu1 %v13575_v36  ;;  %v5613_v36 = vld [vmem:[#allocation2 + $0x10a] sm:$0xff] }
 0x50e   : > { %9581 = vmatprep.mubr.f32.mxu1 %v13576_v12  ;;  %10297 = vmatpush3.bf16.msra.mxu1 %v10294_v24  ;;  %v5603_v24 = vld [vmem:[#allocation2 + $0x92] sm:$0xff] }
 0x50f   : > { %10299 = vmatprep.subr.bf16.mxu1 %v10298_v63  ;;  %v5614_v12 = vld [vmem:[#allocation2 + $0x112] sm:$0xff] }
 0x511   : > { %9582 = vmatmul.mubr.f32.gmra.mrb[2].mxu1 %v13577_v21  ;;  %v5618_v21 = vld [vmem:[#allocation2 + $0x142] sm:$0xff] }
 0x512   : > { %9584 = vmatprep.mubr.f32.mxu1 %v13578_v17  ;;  %10301 = vmatpush3.bf16.msra.mxu1 %v10298_v63  ;;  %v5610_v63 = vld [vmem:[#allocation2 + $0xe2] sm:$0xff]  ;;  %v5619_v17 = vld [vmem:[#allocation2 + $0x152] sm:$0xff] }
 0x513   : > { %10303 = vmatprep.subr.bf16.mxu1 %v10302_v62 }
 0x515   : > { %9585 = vmatmul.mubr.f32.gmra.mrb[4].mxu1 %v13579_v51  ;;  %v5625_v51 = vld [vmem:[#allocation2 + $0x19a] sm:$0xff] }
 0x516   : > { %9587 = vmatprep.mubr.f32.mxu1 %v13580_v8  ;;  %10305 = vmatpush3.bf16.msra.mxu1 %v10302_v62  ;;  %v5615_v62 = vld [vmem:[#allocation2 + $0x122] sm:$0xff] }
 0x517   : > { %10307 = vmatprep.subr.bf16.mxu1 %v10306_v2  ;;  %v5626_v8 = vld [vmem:[#allocation2 + $0x1a2] sm:$0xff] }
 0x519   : > { %9588 = vmatmul.mubr.f32.gmra.mrb[6].mxu1 %v13581_v42 }
 0x51a   : > { %9590 = vmatprep.mubr.f32.mxu1 %v13582_v49  ;;  %10309 = vmatpush3.bf16.msra.mxu1 %v10306_v2  ;;  %v5620_v2 = vld [vmem:[#allocation2 + $0x15a] sm:$0xff] }
 0x51b   : > { %10311 = vmatprep.subr.bf16.mxu1 %v10310_v56  ;;  %v6611_v49 = vld [vmem:[%s13358_s4 + $0x20] sm:$0xff] }
 0x51d   : > { %9591 = vmatmul.mubr.f32.gmra.mrb[8].mxu1 %v12735_v52  ;;  %v5304_v52 = vld [vmem:[#allocation2 + $0xe1] sm:$0xff] }
 0x51e   : > { %9593 = vmatprep.mubr.f32.mxu1 %v12738_v37  ;;  %10313 = vmatpush3.bf16.msra.mxu1 %v10310_v56  ;;  %v5305_v37 = vld [vmem:[#allocation2 + $0xf1] sm:$0xff]  ;;  %v6607_v56 = vld [vmem:[%s13358_s4] sm:$0xff] }
 0x51f   : > { %10315 = vmatprep.subr.bf16.mxu1 %v10314_v15  ;;  %v10326_v60 = vpack.c.bf16 %v6608_v4, %v6607_v56 }
 0x521   : > { %9594 = vmatmul.mubr.f32.gmra.mrb[10].mxu1 %v12741_v5  ;;  %v5308_v5 = vld [vmem:[#allocation2 + $0x111] sm:$0xff]  ;;  %10327 = vmatprep.subr.bf16.mxu0 %v10326_v60 }
 0x522   : > { %9596 = vmatprep.mubr.f32.mxu1 %v5301_v13  ;;  %10317 = vmatpush3.bf16.msra.mxu1 %v10314_v15  ;;  %v6612_v15 = vld [vmem:[%s13358_s4 + $0x28] sm:$0xff] }
 0x523   : > { %10319 = vmatprep.subr.bf16.mxu1 %v10318_v39  ;;  %10329 = vmatpush3.bf16.msra.mxu0 %v10326_v60  ;;  %v10334_v32 = vpack.c.bf16 %v6612_v15, %v6611_v49  ;;  %v6616_v13 = vld [vmem:[%s13358_s4 + $0x48] sm:$0xff] }
 0x525   : > { %9597 = vmatmul.mubr.f32.gmra.mrb[12].mxu1 %v12745_v46  ;;  %v5311_v46 = vld [vmem:[#allocation2 + $0x139] sm:$0xff] }
 0x526   : > { %9599 = vmatprep.mubr.f32.mxu1 %v5303_v25  ;;  %10321 = vmatpush3.bf16.msra.mxu1 %v10318_v39  ;;  %v6614_v39 = vld [vmem:[%s13358_s4 + $0x38] sm:$0xff] }
 0x527   : > { %10323 = vmatprep.subr.bf16.mxu1 %v10322_v58  ;;  %v10338_v54 = vpack.c.bf16 %v6614_v39, %v6613_v16  ;;  %v6584_v25 = vld [vmem:[#allocation6 + $0x8] sm:$0xff]  ;;  %v6605_v16 = vld [vmem:[%s12879_s19 + $0x30] sm:$0xff] }
 0x529   : > { %9600 = vmatmul.mubr.f32.gmra.mrb[14].mxu1 %v5304_v52  ;;  %v10342_v52 = vpack.c.bf16 %v6616_v13, %v6615_v0 }
 0x52a   : > { %9602 = vmatprep.mubr.f32.mxu1 %v5305_v37  ;;  %10325 = vmatpush3.bf16.msra.mxu1 %v10322_v58  ;;  %v6599_v58 = vld [vmem:[%s12879_s19] sm:$0xff]  ;;  %v6617_v37 = vld [vmem:[%s13358_s4 + $0x50] sm:$0xff] }
 0x52b   : > { %9738 = vmatprep.mubr.f32.mxu0 %v6599_v58 }
 0x52d   : > { %9603 = vmatmul.mubr.f32.gmra.mrb[16].mxu1 %v5306_v29  ;;  %v6618_v29 = vld [vmem:[%s13358_s4 + $0x58] sm:$0xff] }
 0x52e   : > { %9605 = vmatprep.mubr.f32.mxu1 %v5307_v28  ;;  %v10346_v28 = vpack.c.bf16 %v6618_v29, %v6617_v37 }
 0x531   : > { %9606 = vmatmul.mubr.f32.gmra.mrb[18].mxu1 %v5308_v5  ;;  %v6619_v5 = vld [vmem:[%s13358_s4 + $0x60] sm:$0xff] }
 0x532   : > { %9608 = vmatprep.mubr.f32.mxu1 %v5309_v1  ;;  %v6620_v1 = vld [vmem:[%s13358_s4 + $0x68] sm:$0xff] }
 0x535   : > { %9609 = vmatmul.mubr.f32.gmra.mrb[20].mxu1 %v5310_v50  ;;  %v10350_v50 = vpack.c.bf16 %v6620_v1, %v6619_v5 }
 0x536   : > { %9611 = vmatprep.mubr.f32.mxu1 %v5311_v46  ;;  %v6621_v46 = vld [vmem:[%s13358_s4 + $0x70] sm:$0xff] }
 0x539   : > { %9612 = vmatmul.mubr.f32.gmra.mrb[22].mxu1 %v5312_v61  ;;  %v6622_v61 = vld [vmem:[%s13358_s4 + $0x78] sm:$0xff] }
 0x53a   : > { %9614 = vmatprep.mubr.f32.mxu1 %v5313_v33  ;;  %v12909_v33 = vld [vmem:[%s13359_s5 + $0x2] ss:$0 sm:$0xff] }
 0x53d   : > { %9615 = vmatmul.mubr.f32.gmra.mrb[24].mxu1 %v5314_v59  ;;  %v10354_v59 = vpack.c.bf16 %v6622_v61, %v6621_v46  ;;  %v6606_v61 = vld [vmem:[%s12879_s19 + $0x38] sm:$0xff] }
 0x53e   : > { %9617 = vmatprep.mubr.f32.mxu1 %v5315_v18 }
 0x541   : > { %9618 = vmatmul.mubr.f32.gmra.mrb[26].mxu1 %v5316_v14  ;;  %v12914_v14 = vld [vmem:[%s13359_s5 + $0x3] ss:$0 sm:$0xff] }
 0x542   : > { %9620 = vmatprep.mubr.f32.mxu1 %v5317_v55 }
 0x545   : > { %9621 = vmatmul.mubr.f32.gmra.mrb[28].mxu1 %v5318_v9 }
 0x546   : > { %9623 = vmatprep.mubr.f32.mxu1 %v5319_v7 }
 0x549   : > { %9624 = vmatmul.mubr.f32.gmra.mrb[30].mxu1 %v5320_v22 }
 0x54a   : > { %9658 = vmatprep.mubr.f32.mxu1 %v5595_v6 }
 0x54d   : > { %9659 = vmatmul.mubr.f32.vlgmr.msra.gmra.mrb[0].mxu1 %v5596_v19 }
 0x54e   : > { %9661 = vmatprep.mubr.f32.mxu1 %v5597_v34 }
 0x551   : > { %9662 = vmatmul.mubr.f32.gmra.mrb[2].mxu1 %v5598_v10 }
 0x552   : > { %9664 = vmatprep.mubr.f32.mxu1 %v5599_v20 }
 0x555   : > { %9665 = vmatmul.mubr.f32.gmra.mrb[4].mxu1 %v5600_v11  ;;  %v6071_v11 = vld [vmem:[#allocation2 + $0x1] sm:$0xff] }
 0x556   : > { %9667 = vmatprep.mubr.f32.mxu1 %v5601_v3  ;;  %v6072_v3 = vld [vmem:[#allocation2 + $0x9] sm:$0xff] }
 0x559   : > { %9668 = vmatmul.mubr.f32.gmra.mrb[6].mxu1 %v5602_v40 }
 0x55a   : > { %9670 = vmatprep.mubr.f32.mxu1 %v5603_v24 }
 0x55d   : > { %9671 = vmatmul.mubr.f32.gmra.mrb[8].mxu1 %v5604_v30  ;;  %v6600_v30 = vld [vmem:[%s12879_s19 + $0x8] sm:$0xff] }
 0x55e   : > { %9673 = vmatprep.mubr.f32.mxu1 %v5605_v38 }
 0x561   : > { %9674 = vmatmul.mubr.f32.gmra.mrb[10].mxu1 %v5606_v44  ;;  %v6601_v44 = vld [vmem:[%s12879_s19 + $0x10] sm:$0xff] }
 0x562   : > { %9676 = vmatprep.mubr.f32.mxu1 %v5607_v47 }
 0x565   : > { %9677 = vmatmul.mubr.f32.gmra.mrb[12].mxu1 %v5608_v53 }
 0x566   : > { %9679 = vmatprep.mubr.f32.mxu1 %v5609_v57  ;;  %v6103_v57 = vmax.f32 %v12832_v48, %v6071_v11 }
 0x569   : > { %9680 = vmatmul.mubr.f32.gmra.mrb[14].mxu1 %v5610_v63  ;;  %v6104_v63 = vmax.f32 %v12832_v48, %v6072_v3  ;;  %v6603_v48 = vld [vmem:[%s12879_s19 + $0x20] sm:$0xff] }
 0x56a   : > { %9682 = vmatprep.mubr.f32.mxu1 %v5611_v23 }
 0x56d   : > { %9683 = vmatmul.mubr.f32.gmra.mrb[16].mxu1 %v5612_v35 }
 0x56e   : > { %9685 = vmatprep.mubr.f32.mxu1 %v5613_v36 }
 0x571   : > { %9686 = vmatmul.mubr.f32.gmra.mrb[18].mxu1 %v5614_v12  ;;  %v6135_v12 = vld [vmem:[#allocation2 + $0x2] sm:$0xff] }
 0x572   : > { %9688 = vmatprep.mubr.f32.mxu1 %v5615_v62  ;;  %v6136_v62 = vld [vmem:[#allocation2 + $0xa] sm:$0xff] }
 0x575   : > { %9689 = vmatmul.mubr.f32.gmra.mrb[20].mxu1 %v5616_v41 }
 0x576   : > { %9691 = vmatprep.mubr.f32.mxu1 %v5617_v45 }
 0x579   : > { %9692 = vmatmul.mubr.f32.gmra.mrb[22].mxu1 %v5618_v21  ;;  %v6602_v21 = vld [vmem:[%s12879_s19 + $0x18] sm:$0xff] }
 0x57a   : > { %9694 = vmatprep.mubr.f32.mxu1 %v5619_v17 }
 0x57d   : > { %9695 = vmatmul.mubr.f32.gmra.mrb[24].mxu1 %v5620_v2 }
 0x57e   : > { %9697 = vmatprep.mubr.f32.mxu1 %v5621_v27 }
 0x581   : > { %9698 = vmatmul.mubr.f32.gmra.mrb[26].mxu1 %v5622_v26  ;;  %v6167_v26 = vmax.f32 %v6103_v57, %v6135_v12 }
 0x582   : > { %9700 = vmatprep.mubr.f32.mxu1 %v12796_v31  ;;  %v6609_v31 = vld [vmem:[%s13358_s4 + $0x10] sm:$0xff] }
 0x585   : > { %9701 = vmatmul.mubr.f32.gmra.mrb[28].mxu1 %v12799_v43  ;;  %v6610_v43 = vld [vmem:[%s13358_s4 + $0x18] sm:$0xff] }
 0x586   : > { %9703 = vmatprep.mubr.f32.mxu1 %v5625_v51  ;;  %v10330_v42 = vpack.c.bf16 %v6610_v43, %v6609_v31  ;;  %v6168_v51 = vmax.f32 %v6104_v63, %v6136_v62  ;;  %v6604_v43 = vld [vmem:[%s12879_s19 + $0x28] sm:$0xff]  ;;  %s11034_s19 = scalar_lea.vmem %s11033_s20, 2048 }
 0x587   : > { %p11036_p7 = scmp.lt.s32.totalorder %s11034_s19, %s11028_s16 }
 0x588   : > { %10331 = vmatprep.subr.bf16.mxu0 %v10330_v42 }
 0x589   : > { %9704 = vmatmul.mubr.f32.gmra.mrb[30].mxu1 %v5626_v8  ;;  %10333 = vmatpush3.bf16.msra.mxu0 %v10330_v42  ;;  %p11037_p8 = por %p11036_p7, %p11035_p4 }
 0x58a   : > { %10335 = vmatprep.subr.bf16.mxu0 %v10334_v32  ;;  %6818 = vmatprep.mubr.f32.mxu1 %v6584_v25 }
 0x58b   : > { %p11038_p11 = pnand %p11037_p8, %p11031_p3 }
 0x58d   : > { %10337 = vmatpush3.bf16.msra.mxu0 %v10334_v32 }
 0x58e   : > { %10339 = vmatprep.subr.bf16.mxu0 %v10338_v54 }
 0x591   : > { %10341 = vmatpush3.bf16.msra.mxu0 %v10338_v54 }
 0x592   : > { %10343 = vmatprep.subr.bf16.mxu0 %v10342_v52 }
 0x595   : > { %10345 = vmatpush3.bf16.msra.mxu0 %v10342_v52 }
 0x596   : > { %10347 = vmatprep.subr.bf16.mxu0 %v10346_v28 }
 0x599   : > { %10349 = vmatpush3.bf16.msra.mxu0 %v10346_v28 }
 0x59a   : > { %10351 = vmatprep.subr.bf16.mxu0 %v10350_v50 }
 0x59d   : > { %10353 = vmatpush3.bf16.msra.mxu0 %v10350_v50 }
 0x59e   : > { %10355 = vmatprep.subr.bf16.mxu0 %v10354_v59 }
 0x5a1   : > { %10357 = vmatpush3.bf16.msra.mxu0 %v10354_v59 }
 0x5a4   : > { %9739 = vmatmul.mubr.f32.vlgmr.msra.gmra.mrb[32].mxu0 %v6600_v30 }
 0x5a5   : > { %9741 = vmatprep.mubr.f32.mxu0 %v6601_v44 }
 0x5a8   : > { %9742 = vmatmul.mubr.f32.gmra.mrb[34].mxu0 %v6602_v21 }
 0x5a9   : > { %9744 = vmatprep.mubr.f32.mxu0 %v6603_v48 }
 0x5ac   : > { %9745 = vmatmul.mubr.f32.gmra.mrb[36].mxu0 %v6604_v43 }
 0x5ad   : > { %9747 = vmatprep.mubr.f32.mxu0 %v6605_v16 }
 0x5b0   : > { %9748 = vmatmul.mubr.f32.gmra.mrb[38].mxu0 %v6606_v61 }
 0x620   : > { %v9660_v18 = vpop.f32.mrb[0].mxu1 }
 0x621   : > { %v5907_v55 = vmul.f32 %v9660_v18, %v12909_v33  ;;  %v5710_v7 = vpop.f32.mrb[1].mxu1 }
 0x622   : > { %v5906_v9 = vmul.f32 %v12909_v33, %v5710_v7 }
 0x623   : > { %v5944_v22 = vadd.f32 %v12914_v14, %v5907_v55 }
 0x624   : > { %v5943_v6 = vadd.f32 %v12914_v14, %v5906_v9  ;;  %v9663_v19 = vpop.f32.mrb[2].mxu1 }
 0x625   : > { %v12920_v34 = vmax.f32 %v5944_v22, 0.0  ;;  %v5909_v10 = vmul.f32 %v9663_v19, %v12909_v33  ;;  %v5720_v20 = vpop.f32.mrb[3].mxu1 }
 0x626   : > { %v12923_v40 = vmax.f32 %v5943_v6, 0.0  ;;  %v5908_v24 = vmul.f32 %v12909_v33, %v5720_v20 }
 0x627   : > { %6008 = vst [vmem:[#allocation2 + $0x21] sm:$0xff] %v12920_v34  ;;  %v5946_v38 = vadd.f32 %v12914_v14, %v5909_v10 }
 0x628   : > { %6007 = vst [vmem:[#allocation2 + $0x19] sm:$0xff] %v12923_v40  ;;  %v5945_v47 = vadd.f32 %v12914_v14, %v5908_v24  ;;  %v9666_v53 = vpop.f32.mrb[4].mxu1 }
 0x629   : > { %v12934_v23 = vmax.f32 %v5946_v38, 0.0  ;;  %v5911_v35 = vmul.f32 %v9666_v53, %v12909_v33  ;;  %v5730_v36 = vpop.f32.mrb[5].mxu1 }
 0x62a   : > { %v12937_v41 = vmax.f32 %v5945_v47, 0.0  ;;  %v5910_v45 = vmul.f32 %v12909_v33, %v5730_v36 }
 0x62b   : > { %6010 = vst [vmem:[#allocation2 + $0x39] sm:$0xff] %v12934_v23  ;;  %v5948_v17 = vadd.f32 %v12914_v14, %v5911_v35 }
 0x62c   : > { %6009 = vst [vmem:[#allocation2 + $0x31] sm:$0xff] %v12937_v41  ;;  %v5947_v2 = vadd.f32 %v12914_v14, %v5910_v45  ;;  %v9669_v27 = vpop.f32.mrb[6].mxu1 }
 0x62d   : > { %v12946_v8 = vmax.f32 %v5948_v17, 0.0  ;;  %v5913_v56 = vmul.f32 %v9669_v27, %v12909_v33  ;;  %v5740_v4 = vpop.f32.mrb[7].mxu1 }
 0x62e   : > { %v12949_v60 = vmax.f32 %v5947_v2, 0.0  ;;  %v5912_v31 = vmul.f32 %v12909_v33, %v5740_v4  ;;  %v6328_v46 = vld [vmem:[#allocation2 + $0x22] sm:$0xff] }
 0x62f   : > { %6012 = vst [vmem:[#allocation2 + $0x51] sm:$0xff] %v12946_v8  ;;  %v5950_v42 = vadd.f32 %v12914_v14, %v5913_v56  ;;  %v6199_v49 = vld [vmem:[#allocation2 + $0x18] sm:$0xff]  ;;  %v6200_v15 = vld [vmem:[#allocation2 + $0x20] sm:$0xff] }
 0x630   : > { %6011 = vst [vmem:[#allocation2 + $0x49] sm:$0xff] %v12949_v60  ;;  %v5949_v32 = vadd.f32 %v12914_v14, %v5912_v31  ;;  %v9672_v39 = vpop.f32.mrb[8].mxu1  ;;  %v6231_v54 = vmax.f32 %v6167_v26, %v6199_v49  ;;  %v6232_v0 = vmax.f32 %v6168_v51, %v6200_v15  ;;  %v6105_v13 = vmax.f32 %v6199_v49, %v12923_v40  ;;  %v6327_v50 = vld [vmem:[#allocation2 + $0x1a] sm:$0xff] }
 0x631   : > { %v12959_v58 = vmax.f32 %v5950_v42, 0.0  ;;  %v5915_v25 = vmul.f32 %v9672_v39, %v12909_v33  ;;  %v5750_v52 = vpop.f32.mrb[9].mxu1  ;;  %v6106_v37 = vmax.f32 %v6200_v15, %v12920_v34 }
 0x632   : > { %v12963_v29 = vmax.f32 %v5949_v32, 0.0  ;;  %v5914_v28 = vmul.f32 %v12909_v33, %v5750_v52  ;;  %v6295_v5 = vmax.f32 %v6231_v54, %v12923_v40  ;;  %v6296_v1 = vmax.f32 %v6232_v0, %v12920_v34  ;;  %v6520_v17 = vld [vmem:[#allocation2 + $0x3a] sm:$0xff] }
 0x633   : > { %6014 = vst [vmem:[#allocation2 + $0x69] sm:$0xff] %v12959_v58  ;;  %v5952_v59 = vadd.f32 %v12914_v14, %v5915_v25  ;;  %v6391_v18 = vld [vmem:[#allocation2 + $0x30] sm:$0xff]  ;;  %v6392_v55 = vld [vmem:[#allocation2 + $0x38] sm:$0xff]  ;;  %v6169_v7 = vmax.f32 %v6105_v13, %v6327_v50  ;;  %v6170_v9 = vmax.f32 %v6106_v37, %v6328_v46 }
 0x634   : > { %6013 = vst [vmem:[#allocation2 + $0x61] sm:$0xff] %v12963_v29  ;;  %v5951_v22 = vadd.f32 %v12914_v14, %v5914_v28  ;;  %v9675_v6 = vpop.f32.mrb[10].mxu1  ;;  %v6359_v19 = vmax.f32 %v6295_v5, %v6327_v50  ;;  %v6360_v10 = vmax.f32 %v6296_v1, %v6328_v46  ;;  %v6107_v34 = vmax.f32 %v6391_v18, %v12937_v41  ;;  %v6519_v57 = vld [vmem:[#allocation2 + $0x32] sm:$0xff] }
 0x635   : > { %v12974_v20 = vmax.f32 %v5952_v59, 0.0  ;;  %v5917_v11 = vmul.f32 %v9675_v6, %v12909_v33  ;;  %v5760_v3 = vpop.f32.mrb[11].mxu1  ;;  %v6233_v40 = vmax.f32 %v6169_v7, %v6391_v18  ;;  %v6234_v24 = vmax.f32 %v6170_v9, %v6392_v55 }
 0x636   : > { %v12977_v30 = vmax.f32 %v5951_v22, 0.0  ;;  %v5916_v38 = vmul.f32 %v12909_v33, %v5760_v3  ;;  %v6423_v44 = vmax.f32 %v6359_v19, %v6391_v18  ;;  %v6424_v47 = vmax.f32 %v6360_v10, %v6392_v55  ;;  %v6522_v59 = vld [vmem:[#allocation2 + $0x52] sm:$0xff] }
 0x637   : > { %6016 = vst [vmem:[#allocation2 + $0x81] sm:$0xff] %v12974_v20  ;;  %v12982_v53 = vadd.f32 %v12914_v14, %v5917_v11  ;;  %v6297_v63 = vmax.f32 %v6233_v40, %v12937_v41  ;;  %v6298_v35 = vmax.f32 %v6234_v24, %v12934_v23  ;;  %v6108_v36 = vmax.f32 %v6392_v55, %v12934_v23  ;;  %v6393_v4 = vld [vmem:[#allocation2 + $0x48] sm:$0xff] }
 0x638   : > { %6015 = vst [vmem:[#allocation2 + $0x79] sm:$0xff] %v12977_v30  ;;  %v12989_v12 = vadd.f32 %v12914_v14, %v5916_v38  ;;  %v9678_v62 = vpop.f32.mrb[12].mxu1  ;;  %v6487_v45 = vmax.f32 %v6423_v44, %v12937_v41  ;;  %v6488_v21 = vmax.f32 %v6424_v47, %v12934_v23  ;;  %v6171_v48 = vmax.f32 %v6107_v34, %v6519_v57  ;;  %v6394_v41 = vld [vmem:[#allocation2 + $0x50] sm:$0xff] }
 0x639   : > { %v5986_v2 = vmax.f32 %v12982_v53, 0.0  ;;  %v5919_v27 = vmul.f32 %v9678_v62, %v12909_v33  ;;  %v5770_v26 = vpop.f32.mrb[13].mxu1  ;;  %v6361_v51 = vmax.f32 %v6297_v63, %v6519_v57  ;;  %v6362_v56 = vmax.f32 %v6298_v35, %v6520_v17  ;;  %v6521_v61 = vld [vmem:[#allocation2 + $0x4a] sm:$0xff] }
 0x63a   : > { %v5985_v31 = vmax.f32 %v12989_v12, 0.0  ;;  %v5918_v43 = vmul.f32 %v12909_v33, %v5770_v26  ;;  %v12997_v42 = vmax.f32 %v6487_v45, %v6519_v57  ;;  %v12999_v49 = vmax.f32 %v6488_v21, %v6520_v17 }
 0x63b   : > { %6018 = vst [vmem:[#allocation2 + $0x99] sm:$0xff] %v5986_v2  ;;  %v5956_v23 = vadd.f32 %v12914_v14, %v5919_v27  ;;  %v6425_v15 = vmax.f32 %v6361_v51, %v6393_v4  ;;  %v6426_v16 = vmax.f32 %v6362_v56, %v6394_v41  ;;  %v6172_v32 = vmax.f32 %v6108_v36, %v6520_v17  ;;  %v6395_v3 = vld [vmem:[#allocation2 + $0x60] sm:$0xff] }
 0x63c   : > { %6017 = vst [vmem:[#allocation2 + $0x91] sm:$0xff] %v5985_v31  ;;  %v5955_v39 = vadd.f32 %v12914_v14, %v5918_v43  ;;  %v9681_v54 = vpop.f32.mrb[14].mxu1  ;;  %v10360_v0 = vpack.c.bf16 %v12999_v49, %v12997_v42  ;;  %v6235_v13 = vmax.f32 %v6171_v48, %v6393_v4  ;;  %v6109_v25 = vmax.f32 %v6393_v4, %v12949_v60 }
 0x63d   : > { %v5988_v52 = vmax.f32 %v5956_v23, 0.0  ;;  %v5921_v37 = vmul.f32 %v9681_v54, %v12909_v33  ;;  %v5780_v28 = vpop.f32.mrb[15].mxu1  ;;  %v6489_v5 = vmax.f32 %v6425_v15, %v12949_v60  ;;  %v6490_v1 = vmax.f32 %v6426_v16, %v12946_v8  ;;  %v6523_v23 = vld [vmem:[#allocation2 + $0x62] sm:$0xff] }
 0x63e   : > { %v5987_v50 = vmax.f32 %v5955_v39, 0.0  ;;  %v5920_v46 = vmul.f32 %v12909_v33, %v5780_v28  ;;  %v6236_v18 = vmax.f32 %v6172_v32, %v6394_v41  ;;  %v6299_v55 = vmax.f32 %v6235_v13, %v12949_v60  ;;  %v6396_v60 = vld [vmem:[#allocation2 + $0x68] sm:$0xff] }
 0x63f   : > { %6020 = vst [vmem:[#allocation2 + $0xb1] sm:$0xff] %v5988_v52  ;;  %v13016_v7 = vadd.f32 %v12914_v14, %v5921_v37  ;;  %v13018_v9 = vmax.f32 %v6489_v5, %v6521_v61  ;;  %v13020_v22 = vmax.f32 %v6490_v1, %v6522_v59  ;;  %v6110_v6 = vmax.f32 %v6394_v41, %v12946_v8  ;;  %v13045_v32 = vld [vmem:[#allocation2 + $0x78] sm:$0xff]  ;;  %v6524_v52 = vld [vmem:[#allocation2 + $0x6a] sm:$0xff] }
 0x640   : > { %6019 = vst [vmem:[#allocation2 + $0xa9] sm:$0xff] %v5987_v50  ;;  %v13024_v19 = vadd.f32 %v12914_v14, %v5920_v46  ;;  %v9684_v10 = vpop.f32.mrb[16].mxu1  ;;  %v6300_v34 = vmax.f32 %v6236_v18, %v12946_v8  ;;  %v6363_v11 = vmax.f32 %v6299_v55, %v6521_v61  ;;  %v6173_v40 = vmax.f32 %v6109_v25, %v6521_v61  ;;  %v13047_v39 = vld [vmem:[#allocation2 + $0x79] sm:$0xff] }
 0x641   : > { %v5990_v24 = vmax.f32 %v13016_v7, 0.0  ;;  %v5923_v38 = vmul.f32 %v9684_v10, %v12909_v33  ;;  %v5790_v44 = vpop.f32.mrb[17].mxu1  ;;  %v10364_v47 = vpack.c.bf16 %v13020_v22, %v13018_v9  ;;  %v6174_v57 = vmax.f32 %v6110_v6, %v6522_v59 }
 0x642   : > { %v5989_v63 = vmax.f32 %v13024_v19, 0.0  ;;  %v5922_v35 = vmul.f32 %v12909_v33, %v5790_v44  ;;  %v6364_v36 = vmax.f32 %v6300_v34, %v6522_v59  ;;  %v6427_v62 = vmax.f32 %v6363_v11, %v6395_v3  ;;  %v13061_v59 = vld [vmem:[#allocation2 + $0x80] sm:$0xff] }
 0x643   : > { %6022 = vst [vmem:[#allocation2 + $0xc9] sm:$0xff] %v5990_v24  ;;  %v5960_v8 = vadd.f32 %v12914_v14, %v5923_v38  ;;  %v6237_v45 = vmax.f32 %v6173_v40, %v6395_v3  ;;  %v6238_v21 = vmax.f32 %v6174_v57, %v6396_v60  ;;  %v6111_v17 = vmax.f32 %v6395_v3, %v12963_v29  ;;  %v13219_v9 = vld [vmem:[#allocation2 + $0x92] sm:$0xff] }
 0x644   : > { %6021 = vst [vmem:[#allocation2 + $0xc1] sm:$0xff] %v5989_v63  ;;  %v5959_v48 = vadd.f32 %v12914_v14, %v5922_v35  ;;  %v9687_v27 = vpop.f32.mrb[18].mxu1  ;;  %v6428_v26 = vmax.f32 %v6364_v36, %v6396_v60  ;;  %v6491_v51 = vmax.f32 %v6427_v62, %v12963_v29  ;;  %v6112_v56 = vmax.f32 %v6396_v60, %v12959_v58 }
 0x645   : > { %v13040_v4 = vmax.f32 %v5960_v8, 0.0  ;;  %v5925_v43 = vmul.f32 %v9687_v27, %v12909_v33  ;;  %v5800_v41 = vpop.f32.mrb[19].mxu1  ;;  %v6301_v15 = vmax.f32 %v6237_v45, %v12963_v29  ;;  %v6302_v16 = vmax.f32 %v6238_v21, %v12959_v58  ;;  %v13093_v27 = vld [vmem:[#allocation2 + $0x82] sm:$0xff] }
 0x646   : > { %v13049_v54 = vmax.f32 %v5959_v48, 0.0  ;;  %v5924_v13 = vmul.f32 %v12909_v33, %v5800_v41  ;;  %v6492_v25 = vmax.f32 %v6428_v26, %v12959_v58  ;;  %v13053_v37 = vmax.f32 %v6491_v51, %v6523_v23  ;;  %v13091_v48 = vld [vmem:[#allocation2 + $0x7a] sm:$0xff] }
 0x647   : > { %6024 = vst [vmem:[#allocation2 + $0xe1] sm:$0xff] %v13040_v4  ;;  %v5962_v28 = vadd.f32 %v12914_v14, %v5925_v43  ;;  %v6365_v29 = vmax.f32 %v6301_v15, %v6523_v23  ;;  %v6366_v5 = vmax.f32 %v6302_v16, %v6524_v52  ;;  %v6175_v1 = vmax.f32 %v6111_v17, %v6523_v23 }
 0x648   : > { %6023 = vst [vmem:[#allocation2 + $0xd9] sm:$0xff] %v13049_v54  ;;  %v5961_v50 = vadd.f32 %v12914_v14, %v5924_v13  ;;  %v9690_v46 = vpop.f32.mrb[20].mxu1  ;;  %v13059_v61 = vmax.f32 %v6492_v25, %v6524_v52  ;;  %v6176_v58 = vmax.f32 %v6112_v56, %v6524_v52  ;;  %v6113_v18 = vmax.f32 %v13045_v32, %v13047_v39 }
 0x649   : > { %v13065_v55 = vmax.f32 %v5962_v28, 0.0  ;;  %v5927_v6 = vmul.f32 %v9690_v46, %v12909_v33  ;;  %v5810_v19 = vpop.f32.mrb[21].mxu1  ;;  %v6429_v10 = vmax.f32 %v6365_v29, %v13045_v32  ;;  %v6430_v34 = vmax.f32 %v6366_v5, %v13061_v59 }
 0x64a   : > { %v13070_v11 = vmax.f32 %v5961_v50, 0.0  ;;  %v5926_v3 = vmul.f32 %v12909_v33, %v5810_v19  ;;  %v10368_v60 = vpack.c.bf16 %v13059_v61, %v13053_v37  ;;  %v6239_v40 = vmax.f32 %v6175_v1, %v13045_v32  ;;  %v13101_v23 = vld [vmem:[#allocation2 + $0xca] sm:$0xff] }
 0x64b   : > { %6026 = vst [vmem:[#allocation2 + $0xf9] sm:$0xff] %v13065_v55  ;;  %v5964_v38 = vadd.f32 %v12914_v14, %v5927_v6  ;;  %v13078_v44 = vld [vmem:[#allocation2 + $0xc0] sm:$0xff]  ;;  %v13080_v57 = vld [vmem:[#allocation2 + $0xc8] sm:$0xff]  ;;  %v6493_v35 = vmax.f32 %v6429_v10, %v12977_v30  ;;  %v6494_v36 = vmax.f32 %v6430_v34, %v12974_v20  ;;  %v6240_v62 = vmax.f32 %v6176_v58, %v13061_v59 }
 0x64c   : > { %6025 = vst [vmem:[#allocation2 + $0xf1] sm:$0xff] %v13070_v11  ;;  %v5963_v8 = vadd.f32 %v12914_v14, %v5926_v3  ;;  %v9693_v45 = vpop.f32.mrb[22].mxu1  ;;  %v6119_v21 = vmax.f32 %v13078_v44, %v5989_v63  ;;  %v6120_v17 = vmax.f32 %v13080_v57, %v5990_v24  ;;  %v6303_v26 = vmax.f32 %v6239_v40, %v12977_v30  ;;  %v13099_v41 = vld [vmem:[#allocation2 + $0xc2] sm:$0xff] }
 0x64d   : > { %v13096_v51 = vmax.f32 %v5964_v38, 0.0  ;;  %v5929_v56 = vmul.f32 %v9693_v45, %v12909_v33  ;;  %v5820_v43 = vpop.f32.mrb[23].mxu1  ;;  %v13104_v63 = vmax.f32 %v6493_v35, %v13091_v48  ;;  %v13107_v7 = vmax.f32 %v6494_v36, %v13093_v27  ;;  %v13136_v45 = vld [vmem:[#allocation2 + $0x90] sm:$0xff] }
 0x64e   : > { %v13109_v24 = vmax.f32 %v5963_v8, 0.0  ;;  %v5928_v15 = vmul.f32 %v12909_v33, %v5820_v43  ;;  %v6183_v30 = vmax.f32 %v6119_v21, %v13099_v41  ;;  %v6184_v16 = vmax.f32 %v6120_v17, %v13101_v23  ;;  %v6344_v8 = vld [vmem:[#allocation2 + $0xe2] sm:$0xff] }
 0x64f   : > { %6028 = vst [vmem:[#allocation2 + $0x111] sm:$0xff] %v13096_v51  ;;  %v5966_v13 = vadd.f32 %v12914_v14, %v5929_v56  ;;  %v6215_v25 = vld [vmem:[#allocation2 + $0xd8] sm:$0xff]  ;;  %v6216_v52 = vld [vmem:[#allocation2 + $0xe0] sm:$0xff]  ;;  %v13119_v29 = vmax.f32 %v6240_v62, %v12974_v20  ;;  %v6367_v5 = vmax.f32 %v6303_v26, %v13091_v48 }
 0x650   : > { %6027 = vst [vmem:[#allocation2 + $0x109] sm:$0xff] %v13109_v24  ;;  %v5965_v1 = vadd.f32 %v12914_v14, %v5928_v15  ;;  %v9696_v50 = vpop.f32.mrb[24].mxu1  ;;  %v6247_v46 = vmax.f32 %v6183_v30, %v6215_v25  ;;  %v6248_v58 = vmax.f32 %v6184_v16, %v6216_v52  ;;  %v6121_v6 = vmax.f32 %v6215_v25, %v13049_v54  ;;  %v6343_v62 = vld [vmem:[#allocation2 + $0xda] sm:$0xff] }
 0x651   : > { %v13125_v19 = vmax.f32 %v5966_v13, 0.0  ;;  %v5931_v10 = vmul.f32 %v9696_v50, %v12909_v33  ;;  %v5830_v34 = vpop.f32.mrb[25].mxu1  ;;  %v6122_v3 = vmax.f32 %v6216_v52, %v13040_v4  ;;  %v6368_v20 = vmax.f32 %v13119_v29, %v13093_v27 }
 0x652   : > { %v13131_v40 = vmax.f32 %v5965_v1, 0.0  ;;  %v5930_v38 = vmul.f32 %v12909_v33, %v5830_v34  ;;  %v6311_v35 = vmax.f32 %v6247_v46, %v13049_v54  ;;  %v6312_v36 = vmax.f32 %v6248_v58, %v13040_v4 }
 0x653   : > { %6030 = vst [vmem:[#allocation2 + $0x129] sm:$0xff] %v13125_v19  ;;  %v5968_v21 = vadd.f32 %v12914_v14, %v5931_v10  ;;  %v6407_v17 = vld [vmem:[#allocation2 + $0xf0] sm:$0xff]  ;;  %v6408_v26 = vld [vmem:[#allocation2 + $0xf8] sm:$0xff]  ;;  %v6185_v56 = vmax.f32 %v6121_v6, %v6343_v62  ;;  %v6186_v43 = vmax.f32 %v6122_v3, %v6344_v8  ;;  %v13141_v15 = vmax.f32 %v6367_v5, %v13136_v45 }
 0x654   : > { %6029 = vst [vmem:[#allocation2 + $0x121] sm:$0xff] %v13131_v40  ;;  %v5967_v54 = vadd.f32 %v12914_v14, %v5930_v38  ;;  %v9699_v4 = vpop.f32.mrb[26].mxu1  ;;  %v6375_v30 = vmax.f32 %v6311_v35, %v6343_v62  ;;  %v6376_v16 = vmax.f32 %v6312_v36, %v6344_v8  ;;  %v6123_v13 = vmax.f32 %v6407_v17, %v13070_v11  ;;  %v6535_v3 = vld [vmem:[#allocation2 + $0xf2] sm:$0xff] }
 0x655   : > { %v13146_v25 = vmax.f32 %v5968_v21, 0.0  ;;  %v5933_v52 = vmul.f32 %v9699_v4, %v12909_v33  ;;  %v5840_v1 = vpop.f32.mrb[27].mxu1  ;;  %v6249_v50 = vmax.f32 %v6185_v56, %v6407_v17  ;;  %v6250_v46 = vmax.f32 %v6186_v43, %v6408_v26  ;;  %v6536_v56 = vld [vmem:[#allocation2 + $0xfa] sm:$0xff] }
 0x656   : > { %v13149_v58 = vmax.f32 %v5967_v54, 0.0  ;;  %v5932_v5 = vmul.f32 %v12909_v33, %v5840_v1  ;;  %v6439_v6 = vmax.f32 %v6375_v30, %v6407_v17  ;;  %v6440_v10 = vmax.f32 %v6376_v16, %v6408_v26 }
 0x657   : > { %6032 = vst [vmem:[#allocation2 + $0x141] sm:$0xff] %v13146_v25  ;;  %v5970_v34 = vadd.f32 %v12914_v14, %v5933_v52  ;;  %v6313_v38 = vmax.f32 %v6249_v50, %v13070_v11  ;;  %v6314_v35 = vmax.f32 %v6250_v46, %v13065_v55  ;;  %v6124_v36 = vmax.f32 %v6408_v26, %v13065_v55  ;;  %v6409_v1 = vld [vmem:[#allocation2 + $0x108] sm:$0xff]  ;;  %v6410_v28 = vld [vmem:[#allocation2 + $0x110] sm:$0xff] }
 0x658   : > { %6031 = vst [vmem:[#allocation2 + $0x139] sm:$0xff] %v13149_v58  ;;  %v5969_v62 = vadd.f32 %v12914_v14, %v5932_v5  ;;  %v9702_v8 = vpop.f32.mrb[28].mxu1  ;;  %v6503_v21 = vmax.f32 %v6439_v6, %v13070_v11  ;;  %v6504_v17 = vmax.f32 %v6440_v10, %v13065_v55  ;;  %v6187_v43 = vmax.f32 %v6123_v13, %v6535_v3 }
 0x659   : > { %v13161_v54 = vmax.f32 %v5970_v34, 0.0  ;;  %v5935_v4 = vmul.f32 %v9702_v8, %v12909_v33  ;;  %v5850_v30 = vpop.f32.mrb[29].mxu1  ;;  %v6377_v16 = vmax.f32 %v6313_v38, %v6535_v3  ;;  %v6378_v52 = vmax.f32 %v6314_v35, %v6536_v56 }
 0x65a   : > { %v13164_v26 = vmax.f32 %v5969_v62, 0.0  ;;  %v5934_v50 = vmul.f32 %v12909_v33, %v5850_v30  ;;  %v6567_v46 = vmax.f32 %v6503_v21, %v6535_v3  ;;  %v6568_v5 = vmax.f32 %v6504_v17, %v6536_v56 }
 0x65b   : > { %6034 = vst [vmem:[#allocation2 + $0x159] sm:$0xff] %v13161_v54  ;;  %v5972_v55 = vadd.f32 %v12914_v14, %v5935_v4  ;;  %v6441_v11 = vmax.f32 %v6377_v16, %v6409_v1  ;;  %v6442_v13 = vmax.f32 %v6378_v52, %v6410_v28  ;;  %v6188_v6 = vmax.f32 %v6124_v36, %v6536_v56  ;;  %v6537_v56 = vld [vmem:[#allocation2 + $0x10a] sm:$0xff]  ;;  %v6538_v16 = vld [vmem:[#allocation2 + $0x112] sm:$0xff] }
 0x65c   : > { %6033 = vst [vmem:[#allocation2 + $0x151] sm:$0xff] %v13164_v26  ;;  %v5971_v10 = vadd.f32 %v12914_v14, %v5934_v50  ;;  %v9705_v34 = vpop.f32.mrb[30].mxu1  ;;  %v10358_v38 = vpack.c.bf16 %v6568_v5, %v6567_v46  ;;  %v6251_v35 = vmax.f32 %v6187_v43, %v6409_v1  ;;  %v6125_v62 = vmax.f32 %v6409_v1, %v13109_v24  ;;  %v6411_v1 = vld [vmem:[#allocation2 + $0x120] sm:$0xff] }
 0x65d   : > { %v13172_v8 = vmax.f32 %v5972_v55, 0.0  ;;  %v5937_v3 = vmul.f32 %v9705_v34, %v12909_v33  ;;  %v5860_v21 = vpop.f32.mrb[31].mxu1  ;;  %v6505_v17 = vmax.f32 %v6441_v11, %v13109_v24  ;;  %v6506_v4 = vmax.f32 %v6442_v13, %v13096_v51  ;;  %v6412_v13 = vld [vmem:[#allocation2 + $0x128] sm:$0xff] }
 0x65e   : > { %v13177_v30 = vmax.f32 %v5971_v10, 0.0  ;;  %v5936_v36 = vmul.f32 %v12909_v33, %v5860_v21  ;;  %10359 = vmatprep.subr.bf16.mxu1 %v10358_v38  ;;  %v6252_v52 = vmax.f32 %v6188_v6, %v6410_v28  ;;  %v6315_v43 = vmax.f32 %v6251_v35, %v13109_v24  ;;  %v6539_v35 = vld [vmem:[#allocation2 + $0x122] sm:$0xff] }
 0x65f   : > { %6036 = vst [vmem:[#allocation2 + $0x171] sm:$0xff] %v13172_v8  ;;  %v13183_v50 = vadd.f32 %v12914_v14, %v5937_v3  ;;  %10361 = vmatpush3.bf16.msra.mxu1 %v10360_v0  ;;  %v6569_v46 = vmax.f32 %v6505_v17, %v6537_v56  ;;  %v6570_v5 = vmax.f32 %v6506_v4, %v6538_v16  ;;  %v6413_v21 = vld [vmem:[#allocation2 + $0x138] sm:$0xff] }
 0x660   : > { %v6126_v33 = vmax.f32 %v6410_v28, %v13096_v51  ;;  %6035 = vst [vmem:[#allocation2 + $0x169] sm:$0xff] %v13177_v30  ;;  %v13191_v55 = vadd.f32 %v12914_v14, %v5936_v36  ;;  %v6316_v24 = vmax.f32 %v6252_v52, %v13096_v51  ;;  %v6379_v11 = vmax.f32 %v6315_v43, %v6537_v56  ;;  %v13197_v14 = vld [vmem:[#allocation2 + $0x98] sm:$0xff]  ;;  %v6414_v43 = vld [vmem:[#allocation2 + $0x140] sm:$0xff] }
 0x661   : > { %v6189_v6 = vmax.f32 %v6125_v62, %v6537_v56  ;;  %v6006_v10 = vmax.f32 %v13183_v50, 0.0  ;;  %v10362_v34 = vpack.c.bf16 %v6570_v5, %v6569_v46  ;;  %v6127_v42 = vmax.f32 %v6411_v1, %v13131_v40  ;;  %v6541_v53 = vld [vmem:[#allocation2 + $0x13a] sm:$0xff]  ;;  %v6468_v50 = vld [vmem:[#allocation2 + $0xc9] sm:$0xff] }
 0x662   : > { %v6190_v38 = vmax.f32 %v6126_v33, %v6538_v16  ;;  %v6005_v49 = vmax.f32 %v13191_v55, 0.0  ;;  %v6380_v0 = vmax.f32 %v6316_v24, %v6538_v16  ;;  %v6443_v28 = vmax.f32 %v6379_v11, %v6411_v1  ;;  %v6540_v16 = vld [vmem:[#allocation2 + $0x12a] sm:$0xff]  ;;  %v13222_v24 = vld [vmem:[#allocation2 + $0x9a] sm:$0xff] }
 0x663   : > { %v6253_v3 = vmax.f32 %v6189_v6, %v6411_v1  ;;  %6038 = vst [vmem:[#allocation2 + $0x189] sm:$0xff] %v6006_v10  ;;  %10363 = vmatprep.subr.bf16.mxu1 %v10362_v34  ;;  %v6128_v62 = vmax.f32 %v6412_v13, %v13125_v19  ;;  %v6191_v17 = vmax.f32 %v6127_v42, %v6539_v35  ;;  %v6542_v42 = vld [vmem:[#allocation2 + $0x142] sm:$0xff]  ;;  %v6544_v61 = vld [vmem:[#allocation2 + $0x15a] sm:$0xff] }
 0x664   : > { %v6254_v51 = vmax.f32 %v6190_v38, %v6412_v13  ;;  %v6432_v4 = vmax.f32 %v6368_v20, %v13197_v14  ;;  %6037 = vst [vmem:[#allocation2 + $0x181] sm:$0xff] %v6005_v49  ;;  %10365 = vmatpush3.bf16.msra.mxu1 %v10364_v47  ;;  %v6444_v36 = vmax.f32 %v6380_v0, %v6412_v13 }
 0x665   : > { %v6507_v56 = vmax.f32 %v6443_v28, %v13131_v40  ;;  %v6317_v52 = vmax.f32 %v6253_v3, %v13131_v40  ;;  %v6495_v1 = vmax.f32 %v13141_v15, %v5985_v31  ;;  %v6192_v20 = vmax.f32 %v6128_v62, %v6540_v16  ;;  %v6416_v3 = vld [vmem:[#allocation2 + $0x158] sm:$0xff] }
 0x666   : > { %v6318_v29 = vmax.f32 %v6254_v51, %v13125_v19  ;;  %v6255_v46 = vmax.f32 %v6191_v17, %v6413_v21  ;;  %v6496_v5 = vmax.f32 %v6432_v4, %v5986_v2  ;;  %v6508_v22 = vmax.f32 %v6444_v36, %v13125_v19  ;;  %v6082_v19 = vld [vmem:[#allocation2 + $0x81] sm:$0xff] }
 0x667   : > { %v6571_v47 = vmax.f32 %v6507_v56, %v6539_v35  ;;  %v6381_v33 = vmax.f32 %v6317_v52, %v6539_v35  ;;  %v6559_v40 = vmax.f32 %v6495_v1, %v13219_v9  ;;  %v6256_v11 = vmax.f32 %v6192_v20, %v6414_v43  ;;  %v6415_v35 = vld [vmem:[#allocation2 + $0x150] sm:$0xff] }
 0x668   : > { %v6382_v12 = vmax.f32 %v6318_v29, %v6540_v16  ;;  %v6319_v31 = vmax.f32 %v6255_v46, %v13149_v58  ;;  %v6560_v15 = vmax.f32 %v6496_v5, %v13222_v24  ;;  %v6572_v13 = vmax.f32 %v6508_v22, %v6540_v16 }
 0x669   : > { %v6445_v6 = vmax.f32 %v6381_v33, %v6413_v21  ;;  %v6129_v2 = vmax.f32 %v6413_v21, %v13149_v58  ;;  %v6130_v34 = vmax.f32 %v6414_v43, %v13146_v25  ;;  %v6320_v0 = vmax.f32 %v6256_v11, %v13146_v25  ;;  %v6274_v11 = vld [vmem:[#allocation2 + $0x99] sm:$0xff] }
 0x66a   : > { %v6446_v38 = vmax.f32 %v6382_v12, %v6414_v43  ;;  %v6383_v28 = vmax.f32 %v6319_v31, %v6541_v53  ;;  %v13230_v51 = vpack.c.bf16 %v6560_v15, %v6559_v40  ;;  %v10366_v62 = vpack.c.bf16 %v6572_v13, %v6571_v47  ;;  %v6273_v40 = vld [vmem:[#allocation2 + $0x91] sm:$0xff] }
 0x66b   : > { %v6509_v17 = vmax.f32 %v6445_v6, %v13149_v58  ;;  %v6193_v4 = vmax.f32 %v6129_v2, %v6541_v53  ;;  %v6194_v36 = vmax.f32 %v6130_v34, %v6542_v42  ;;  %v6384_v21 = vmax.f32 %v6320_v0, %v6542_v42  ;;  %v13251_v6 = vld [vmem:[#allocation2 + $0x170] sm:$0xff]  ;;  %v6293_v55 = vld [vmem:[#allocation2 + $0x181] sm:$0xff] }
 0x66c   : > { %v6510_v56 = vmax.f32 %v6446_v38, %v13146_v25  ;;  %v6447_v16 = vmax.f32 %v6383_v28, %v6415_v35  ;;  %v6114_v52 = vmax.f32 %v13061_v59, %v6082_v19  ;;  %10367 = vmatprep.subr.bf16.mxu1 %v10366_v62  ;;  %v6177_v20 = vmax.f32 %v6113_v18, %v13091_v48  ;;  %v6543_v59 = vld [vmem:[#allocation2 + $0x152] sm:$0xff] }
 0x66d   : > { %v6573_v43 = vmax.f32 %v6509_v17, %v6541_v53  ;;  %v6257_v1 = vmax.f32 %v6193_v4, %v6415_v35  ;;  %v6258_v29 = vmax.f32 %v6194_v36, %v6416_v3  ;;  %10369 = vmatpush3.bf16.msra.mxu1 %v10368_v60  ;;  %v6448_v46 = vmax.f32 %v6384_v21, %v6416_v3  ;;  %v13263_v4 = vld [vmem:[#allocation2 + $0xb0] sm:$0xff] }
 0x66e   : > { %v6574_v58 = vmax.f32 %v6510_v56, %v6542_v42  ;;  %v6511_v25 = vmax.f32 %v6447_v16, %v13164_v26  ;;  %v6178_v5 = vmax.f32 %v6114_v52, %v13093_v27  ;;  %v6241_v33 = vmax.f32 %v6177_v20, %v13136_v45  ;;  %v6417_v27 = vld [vmem:[#allocation2 + $0x168] sm:$0xff]  ;;  %v6546_v21 = vld [vmem:[#allocation2 + $0x172] sm:$0xff] }
 0x66f   : > { %v6321_v22 = vmax.f32 %v6257_v1, %v13164_v26  ;;  %v6322_v47 = vmax.f32 %v6258_v29, %v13161_v54  ;;  %v6131_v32 = vmax.f32 %v6415_v35, %v13164_v26  ;;  %v6512_v37 = vmax.f32 %v6448_v46, %v13161_v54  ;;  %v6401_v35 = vld [vmem:[#allocation2 + $0xa8] sm:$0xff] }
 0x670   : > { %v10370_v39 = vpack.c.bf16 %v6574_v58, %v6573_v43  ;;  %v6575_v18 = vmax.f32 %v6511_v25, %v6543_v59  ;;  %v6242_v60 = vmax.f32 %v6178_v5, %v13197_v14  ;;  %v6305_v31 = vmax.f32 %v6241_v33, %v6273_v40  ;;  %v6545_v56 = vld [vmem:[#allocation2 + $0x16a] sm:$0xff] }
 0x671   : > { %v6385_v48 = vmax.f32 %v6321_v22, %v6543_v59  ;;  %v6386_v12 = vmax.f32 %v6322_v47, %v6544_v61  ;;  %v6132_v15 = vmax.f32 %v6416_v3, %v13161_v54  ;;  %v6576_v13 = vmax.f32 %v6512_v37, %v6544_v61  ;;  %v6101_v1 = vld [vmem:[#allocation2 + $0x169] sm:$0xff]  ;;  %v6466_v58 = vld [vmem:[#allocation2 + $0xb1] sm:$0xff] }
 0x672   : > { %10371 = vmatprep.subr.bf16.mxu1 %v10370_v39  ;;  %v6306_v53 = vmax.f32 %v6242_v60, %v6274_v11  ;;  %v6195_v26 = vmax.f32 %v6131_v32, %v6543_v59  ;;  %v6115_v2 = vmax.f32 %v13136_v45, %v6273_v40  ;;  %v13583_v34 = vpack.c.bf16 %v13107_v7, %v13104_v63  ;;  %v6465_v7 = vld [vmem:[#allocation2 + $0xa9] sm:$0xff]  ;;  %v6419_v39 = vld [vmem:[#allocation2 + $0x180] sm:$0xff] }
 0x673   : > { %v6449_v19 = vmax.f32 %v6385_v48, %v6417_v27  ;;  %v6450_v38 = vmax.f32 %v6386_v12, %v13251_v6  ;;  %v6369_v42 = vmax.f32 %v6305_v31, %v13219_v9  ;;  %v6196_v0 = vmax.f32 %v6132_v15, %v6544_v61  ;;  %v6529_v59 = vld [vmem:[#allocation2 + $0xaa] sm:$0xff] }
 0x674   : > { %10373 = vmatpush3.bf16.msra.mxu1 %v13583_v34  ;;  %v10374_v28 = vpack.c.bf16 %v6576_v13, %v6575_v18  ;;  %v6370_v54 = vmax.f32 %v6306_v53, %v13222_v24  ;;  %v6259_v3 = vmax.f32 %v6195_v26, %v6417_v27  ;;  %v6116_v62 = vmax.f32 %v13197_v14, %v6274_v11  ;;  %v6420_v61 = vld [vmem:[#allocation2 + $0x188] sm:$0xff] }
 0x675   : > { %v6513_v17 = vmax.f32 %v6449_v19, %v13177_v30  ;;  %v6514_v45 = vmax.f32 %v6450_v38, %v13172_v8  ;;  %v6433_v63 = vmax.f32 %v6369_v42, %v6401_v35  ;;  %v6260_v36 = vmax.f32 %v6196_v0, %v13251_v6  ;;  %v6213_v42 = vld [vmem:[#allocation2 + $0xc0] sm:$0xff]  ;;  %v6548_v0 = vld [vmem:[#allocation2 + $0x18a] sm:$0xff] }
 0x676   : > { %10375 = vmatprep.subr.bf16.mxu1 %v10374_v28  ;;  %v6434_v16 = vmax.f32 %v6370_v54, %v13263_v4  ;;  %v6323_v52 = vmax.f32 %v6259_v3, %v13177_v30  ;;  %v6179_v43 = vmax.f32 %v6115_v2, %v13219_v9  ;;  %v6180_v14 = vmax.f32 %v6116_v62, %v13222_v24  ;;  %v6102_v30 = vld [vmem:[#allocation2 + $0x171] sm:$0xff]  ;;  %v6547_v2 = vld [vmem:[#allocation2 + $0x182] sm:$0xff] }
 0x677   : > { %v6577_v29 = vmax.f32 %v6513_v17, %v6545_v56  ;;  %v6578_v20 = vmax.f32 %v6514_v45, %v6546_v21  ;;  %v6497_v46 = vmax.f32 %v6433_v63, %v6465_v7  ;;  %v6324_v25 = vmax.f32 %v6260_v36, %v13172_v8  ;;  %v6530_v9 = vld [vmem:[#allocation2 + $0xb2] sm:$0xff]  ;;  %v6467_v62 = vld [vmem:[#allocation2 + $0xc1] sm:$0xff] }
 0x678   : > { %10377 = vmatpush3.bf16.msra.mxu1 %v13230_v51  ;;  %v6498_v5 = vmax.f32 %v6434_v16, %v6466_v58  ;;  %v6387_v22 = vmax.f32 %v6323_v52, %v6545_v56  ;;  %v6243_v47 = vmax.f32 %v6179_v43, %v6401_v35  ;;  %v6244_v33 = vmax.f32 %v6180_v14, %v13263_v4  ;;  %v6485_v43 = vld [vmem:[#allocation2 + $0x199] sm:$0xff] }
 0x679   : > { %v10378_v40 = vpack.c.bf16 %v6578_v20, %v6577_v29  ;;  %v6561_v32 = vmax.f32 %v6497_v46, %v6529_v59  ;;  %v6388_v24 = vmax.f32 %v6324_v25, %v6546_v21  ;;  %v6133_v37 = vmax.f32 %v6417_v27, %v6101_v1  ;;  %v10971_v29 = vld [vmem:[#allocation2] sm:$0xff] }
 0x67a   : > { %v6562_v51 = vmax.f32 %v6498_v5, %v6530_v9  ;;  %v6451_v18 = vmax.f32 %v6387_v22, %v6419_v39  ;;  %v6307_v60 = vmax.f32 %v6243_v47, %v6465_v7  ;;  %v6308_v48 = vmax.f32 %v6244_v33, %v6466_v58  ;;  %v6341_v46 = vld [vmem:[#allocation2 + $0xc2] sm:$0xff]  ;;  %v6342_v22 = vld [vmem:[#allocation2 + $0xca] sm:$0xff] }
 0x67b   : > { %10379 = vmatprep.subr.bf16.mxu1 %v10378_v40  ;;  %v6452_v8 = vmax.f32 %v6388_v24, %v6420_v61  ;;  %v6134_v12 = vmax.f32 %v13251_v6, %v6102_v30  ;;  %v6197_v11 = vmax.f32 %v6133_v37, %v6545_v56  ;;  %v6117_v31 = vmax.f32 %v6401_v35, %v6465_v7  ;;  %v6214_v35 = vld [vmem:[#allocation2 + $0xc8] sm:$0xff] }
 0x67c   : > { %v10380_v15 = vpack.c.bf16 %v6562_v51, %v6561_v32  ;;  %v6515_v13 = vmax.f32 %v6451_v18, %v6005_v49  ;;  %v6371_v53 = vmax.f32 %v6307_v60, %v6529_v59  ;;  %v6372_v26 = vmax.f32 %v6308_v48, %v6530_v9  ;;  %v6486_v5 = vld [vmem:[#allocation2 + $0x1a1] sm:$0xff]  ;;  %v6469_v51 = vld [vmem:[#allocation2 + $0xd9] sm:$0xff] }
 0x67d   : > { %v6516_v27 = vmax.f32 %v6452_v8, %v6006_v10  ;;  %v6198_v34 = vmax.f32 %v6134_v12, %v6546_v21  ;;  %v6261_v19 = vmax.f32 %v6197_v11, %v6419_v39  ;;  %v6118_v38 = vmax.f32 %v13263_v4, %v6466_v58  ;;  %v6294_v4 = vld [vmem:[#allocation2 + $0x189] sm:$0xff]  ;;  %v6533_v8 = vld [vmem:[#allocation2 + $0xda] sm:$0xff] }
 0x67e   : > { %10381 = vmatpush3.bf16.msra.mxu1 %v10380_v15  ;;  %v6579_v6 = vmax.f32 %v6515_v13, %v6547_v2  ;;  %v6435_v28 = vmax.f32 %v6371_v53, %v13078_v44  ;;  %v6436_v54 = vmax.f32 %v6372_v26, %v13080_v57  ;;  %v6181_v49 = vmax.f32 %v6117_v31, %v6529_v59  ;;  %v6549_v59 = vld [vmem:[#allocation2 + $0x19a] sm:$0xff]  ;;  %v6534_v12 = vld [vmem:[#allocation2 + $0xe2] sm:$0xff]  ;;  %v6583_v53 = vld [vmem:[#allocation6] sm:$0xff] }
 0x67f   : > { %v6580_v3 = vmax.f32 %v6516_v27, %v6548_v0  ;;  %v6262_v10 = vmax.f32 %v6198_v34, %v6420_v61  ;;  %v6325_v17 = vmax.f32 %v6261_v19, %v6293_v55  ;;  %v6182_v45 = vmax.f32 %v6118_v38, %v6530_v9  ;;  %v6405_v9 = vld [vmem:[#allocation2 + $0xd8] sm:$0xff]  ;;  %v6470_v61 = vld [vmem:[#allocation2 + $0xe1] sm:$0xff]  ;;  %v6587_v34 = vld [vmem:[#allocation6 + $0x20] sm:$0xff] }
 0x680   : > { %v6499_v63 = vmax.f32 %v6435_v28, %v6467_v62  ;;  %v6500_v7 = vmax.f32 %v6436_v54, %v6468_v50  ;;  %v6245_v36 = vmax.f32 %v6181_v49, %v6213_v42  ;;  %v6586_v26 = vld [vmem:[#allocation6 + $0x18] sm:$0xff]  ;;  %v6585_v27 = vld [vmem:[#allocation6 + $0x10] sm:$0xff]  ;;  %v6592_v42 = vld [vmem:[#allocation6 + $0x48] sm:$0xff] }
 0x681   : > { %v10382_v56 = vpack.c.bf16 %v6580_v3, %v6579_v6  ;;  %v6326_v21 = vmax.f32 %v6262_v10, %v6294_v4  ;;  %v6389_v16 = vmax.f32 %v6325_v17, %v6547_v2  ;;  %v6246_v52 = vmax.f32 %v6182_v45, %v6214_v35  ;;  %v6588_v2 = vld [vmem:[#allocation6 + $0x28] sm:$0xff]  ;;  %v6590_v19 = vld [vmem:[#allocation6 + $0x38] sm:$0xff]  ;;  %v6589_v38 = vld [vmem:[#allocation6 + $0x30] sm:$0xff]  ;;  %v9740_v3 = vpop.f32.mrb[32].mxu0 }
 0x682   : > { %v6563_v44 = vmax.f32 %v6499_v63, %v13099_v41  ;;  %v6564_v57 = vmax.f32 %v6500_v7, %v13101_v23  ;;  %v6309_v14 = vmax.f32 %v6245_v36, %v6467_v62  ;;  %v6550_v41 = vld [vmem:[#allocation2 + $0x1a2] sm:$0xff]  ;;  %v6596_v54 = vld [vmem:[#allocation6 + $0x68] sm:$0xff]  ;;  %v6595_v55 = vld [vmem:[#allocation6 + $0x60] sm:$0xff]  ;;  %v6689_v62 = vpop.f32.mrb[33].mxu0 }
 0x683   : > { %10383 = vmatprep.subr.bf16.mxu1 %v10382_v56  ;;  %v6390_v1 = vmax.f32 %v6326_v21, %v6548_v0  ;;  %v6453_v20 = vmax.f32 %v6389_v16, %v10971_v29  ;;  %v6310_v58 = vmax.f32 %v6246_v52, %v6468_v50  ;;  %v6406_v23 = vld [vmem:[#allocation2 + $0xe0] sm:$0xff]  ;;  %v6591_v0 = vld [vmem:[#allocation6 + $0x40] sm:$0xff]  ;;  %v6594_v6 = vld [vmem:[#allocation6 + $0x58] sm:$0xff]  ;;  %v9743_v50 = vpop.f32.mrb[34].mxu0 }
 0x684   : > { %v10384_v25 = vpack.c.bf16 %v6564_v57, %v6563_v44  ;;  %v6373_v47 = vmax.f32 %v6309_v14, %v6341_v46  ;;  %v6593_v28 = vld [vmem:[#allocation6 + $0x50] sm:$0xff]  ;;  %v6598_v49 = vld [vmem:[#allocation6 + $0x78] sm:$0xff]  ;;  %v6699_v10 = vpop.f32.mrb[35].mxu0 }
 0x685   : > { %v6454_v33 = vmax.f32 %v6390_v1, %v10971_v29  ;;  %v6517_v30 = vmax.f32 %v6453_v20, %v6485_v43  ;;  %v6374_v40 = vmax.f32 %v6310_v58, %v6342_v22  ;;  %v6597_v35 = vld [vmem:[#allocation6 + $0x70] sm:$0xff]  ;;  %v9746_v17 = vpop.f32.mrb[36].mxu0 }
 0x686   : > { %10385 = vmatpush3.bf16.msra.mxu1 %v10384_v25  ;;  %v6437_v32 = vmax.f32 %v6373_v47, %v6405_v9  ;;  %v6709_v45 = vpop.f32.mrb[37].mxu0  ;;  %v7313_v4 = vld [vmem:[%s13359_s5 + $0x4] ss:$0 sm:$0xff]  ;;  %v7314_v56 = vld [vmem:[%s13359_s5 + $0x5] ss:$0 sm:$0xff] }
 0x687   : > { %v6518_v24 = vmax.f32 %v6454_v33, %v6486_v5  ;;  %v6581_v39 = vmax.f32 %v6517_v30, %v6549_v59  ;;  %v6438_v37 = vmax.f32 %v6374_v40, %v6406_v23  ;;  %v9749_v63 = vpop.f32.mrb[38].mxu0  ;;  %v6733_v36 = vmul.f32 %v7313_v4, %v6689_v62 }
 0x688   : > { %v6501_v18 = vmax.f32 %v6437_v32, %v6469_v51  ;;  %v6719_v7 = vpop.f32.mrb[39].mxu0  ;;  %v6734_v21 = vmul.f32 %v9740_v3, %v7313_v4  ;;  %v6735_v29 = vmul.f32 %v7313_v4, %v6699_v10  ;;  %v6736_v25 = vmul.f32 %v9743_v50, %v7313_v4 }
 0x689   : > { %v6582_v60 = vmax.f32 %v6518_v24, %v6550_v41  ;;  %v6502_v48 = vmax.f32 %v6438_v37, %v6470_v61  ;;  %v6746_v16 = vadd.f32 %v7314_v56, %v6733_v36  ;;  %v6737_v9 = vmul.f32 %v7313_v4, %v6709_v45 }
 0x68a   : > { %v6565_v11 = vmax.f32 %v6501_v18, %v6533_v8  ;;  %v6747_v43 = vadd.f32 %v7314_v56, %v6734_v21  ;;  %v6748_v5 = vadd.f32 %v7314_v56, %v6735_v29  ;;  %v6749_v33 = vadd.f32 %v7314_v56, %v6736_v25 }
 0x68b   : > { %v10386_v31 = vpack.c.bf16 %v6582_v60, %v6581_v39  ;;  %v6566_v15 = vmax.f32 %v6502_v48, %v6534_v12  ;;  %v6738_v24 = vmul.f32 %v9746_v17, %v7313_v4  ;;  %v6750_v39 = vadd.f32 %v7314_v56, %v6737_v9 }
 0x68c   : > { %v6739_v8 = vmul.f32 %v7313_v4, %v6719_v7 }
 0x68d   : > { %10387 = vmatprep.subr.bf16.mxu1 %v10386_v31  ;;  %v10388_v13 = vpack.c.bf16 %v6566_v15, %v6565_v11  ;;  %v6751_v18 = vadd.f32 %v7314_v56, %v6738_v24  ;;  %v6740_v15 = vmul.f32 %v9749_v63, %v7313_v4 }
 0x68f   : > { %10389 = vmatpush3.bf16.msra.mxu1 %v10388_v13  ;;  %v6752_v13 = vadd.f32 %v7314_v56, %v6739_v8 }
 0x692   : > { %6819 = vmatmul.mubr.f32.vlgmr.msra.gmra.mrb[32].mxu1 %v6583_v53 }
 0x693   : > { %6823 = vmatprep.mubr.f32.mxu1 %v6586_v26 }
 0x696   : > { %6824 = vmatmul.mubr.f32.gmra.mrb[34].mxu1 %v6585_v27 }
 0x697   : > { %6828 = vmatprep.mubr.f32.mxu1 %v6588_v2  ;;  %v6753_v2 = vadd.f32 %v7314_v56, %v6740_v15 }
 0x69a   : > { %6829 = vmatmul.mubr.f32.gmra.mrb[36].mxu1 %v6587_v34 }
 0x69b   : > { %6833 = vmatprep.mubr.f32.mxu1 %v6590_v19 }
 0x69e   : > { %6834 = vmatmul.mubr.f32.gmra.mrb[38].mxu1 %v6589_v38 }
 0x69f   : > { %6838 = vmatprep.mubr.f32.mxu1 %v6592_v42 }
 0x6a2   : > { %6839 = vmatmul.mubr.f32.gmra.mrb[40].mxu1 %v6591_v0 }
 0x6a3   : > { %6843 = vmatprep.mubr.f32.mxu1 %v6594_v6 }
 0x6a6   : > { %6844 = vmatmul.mubr.f32.gmra.mrb[42].mxu1 %v6593_v28 }
 0x6a7   : > { %6848 = vmatprep.mubr.f32.mxu1 %v6596_v54 }
 0x6aa   : > { %6849 = vmatmul.mubr.f32.gmra.mrb[44].mxu1 %v6595_v55 }
 0x6ab   : > { %6853 = vmatprep.mubr.f32.mxu1 %v6598_v49 }
 0x6ae   : > { %6854 = vmatmul.mubr.f32.gmra.mrb[46].mxu1 %v6597_v35 }
 0x765   : > { %v8242_v52 = vpop.f32.mrb[32].mxu1 }
 0x766   : > { %v8243_v44 = vpop.f32.mrb[33].mxu1 }
 0x767   : > { %v8244_v57 = vadd.f32 %v8243_v44, %v8242_v52 }
 0x769   : > { %v6821_v14 = vadd.f32 %v8244_v57, %v6746_v16  ;;  %v8245_v1 = vpop.f32.mrb[34].mxu1 }
 0x76a   : > { %v8246_v20 = vpop.f32.mrb[35].mxu1 }
 0x76b   : > { %6859 = vst [vmem:[%s13292_s10] sm:$0xff] %v6821_v14  ;;  %v8247_v58 = vadd.f32 %v8246_v20, %v8245_v1 }
 0x76d   : > { %v6826_v46 = vadd.f32 %v8247_v58, %v6747_v43  ;;  %v8248_v59 = vpop.f32.mrb[36].mxu1 }
 0x76e   : > { %v8249_v22 = vpop.f32.mrb[37].mxu1 }
 0x76f   : > { %6860 = vst [vmem:[%s13292_s10 + $0x8] sm:$0xff] %v6826_v46  ;;  %v8250_v47 = vadd.f32 %v8249_v22, %v8248_v59 }
 0x771   : > { %v6831_v30 = vadd.f32 %v8250_v47, %v6748_v5  ;;  %v8251_v40 = vpop.f32.mrb[38].mxu1 }
 0x772   : > { %v8252_v41 = vpop.f32.mrb[39].mxu1 }
 0x773   : > { %6861 = vst [vmem:[%s13292_s10 + $0x10] sm:$0xff] %v6831_v30  ;;  %v8253_v23 = vadd.f32 %v8252_v41, %v8251_v40 }
 0x775   : > { %v6836_v32 = vadd.f32 %v8253_v23, %v6749_v33  ;;  %v8254_v37 = vpop.f32.mrb[40].mxu1 }
 0x776   : > { %v8255_v51 = vpop.f32.mrb[41].mxu1 }
 0x777   : > { %6862 = vst [vmem:[%s13292_s10 + $0x18] sm:$0xff] %v6836_v32  ;;  %v8256_v61 = vadd.f32 %v8255_v51, %v8254_v37 }
 0x779   : > { %v6841_v60 = vadd.f32 %v8256_v61, %v6750_v39  ;;  %v8257_v48 = vpop.f32.mrb[42].mxu1 }
 0x77a   : > { %v8258_v12 = vpop.f32.mrb[43].mxu1 }
 0x77b   : > { %6863 = vst [vmem:[%s13292_s10 + $0x20] sm:$0xff] %v6841_v60  ;;  %v8259_v11 = vadd.f32 %v8258_v12, %v8257_v48 }
 0x77d   : > { %v6846_v31 = vadd.f32 %v8259_v11, %v6751_v18  ;;  %v8260_v53 = vpop.f32.mrb[44].mxu1 }
 0x77e   : > { %v8261_v26 = vpop.f32.mrb[45].mxu1 }
 0x77f   : > { %6864 = vst [vmem:[%s13292_s10 + $0x28] sm:$0xff] %v6846_v31  ;;  %v8262_v27 = vadd.f32 %v8261_v26, %v8260_v53 }
 0x781   : > { %v6851_v34 = vadd.f32 %v8262_v27, %v6752_v13  ;;  %v8263_v19 = vpop.f32.mrb[46].mxu1 }
 0x782   : > { %v8264_v38 = vpop.f32.mrb[47].mxu1 }
 0x783   : > { %6865 = vst [vmem:[%s13292_s10 + $0x30] sm:$0xff] %v6851_v34  ;;  %v8265_v42 = vadd.f32 %v8264_v38, %v8263_v19 }
 0x785   : > { %v6856_v0 = vadd.f32 %v8265_v42, %v6753_v2 }
 0x787   : > { %6866 = vst [vmem:[%s13292_s10 + $0x38] sm:$0xff] %v6856_v0 }
 0x788   : > { %11041 = shalt.err (!%p11038_p11)
}
 0x789   : > { %s11042_s29 = scalar_lea.hbm %s13308_s22, 1024  ;;  %s11046_s9 = scalar_lea.hbm %s13361_s7, 2048 }
 0x78a   : > { %p11043_p13 = scmp.ne.s32.totalorder %s13308_s22, %s11042_s29  ;;  %p11047_p6 = scmp.lt.u32.totalorder %s13308_s22, %s13361_s7 }
 0x78b   : > { %p11048_p9 = scmp.lt.u32.totalorder %s11046_s9, %s11042_s29  ;;  %p11050_p12 = scmp.lt.u32.totalorder %s11042_s29, %s13308_s22 }
 0x78c   : > { %p11044_p0 = pnand %p11043_p13, %p13584_p1 }
 0x78d   : > { %p11049_p10 = por %p11048_p9, %p11047_p6 }
 0x78e   : > { %p11045_p5 = pneg %p11044_p0 }
 0x78f   : > { %p11051_p2 = por %p11050_p12, %p11049_p10 }
 0x791   : > { %p11052_p3 = pnand %p11051_p2, %p11045_p5 }
 0x793   : > { %11055 = shalt.err (!%p11052_p3)
}
 0x794   : > { %s11108_s17 = smov 128   ;;  %s11109_s18 = smov 8  }
 0x795   : > { %10911 = dma.vmem_to_hbm [thread:$0]  (%p13584_p1), %s13303_s14, 1024, %s13308_s22, %s13313_s23, %s11108_s17, %s11108_s17, %s11109_s18  }
 0x796 PF: > { %p10928_p4 = scmp.ge.s32.totalorder %s11098_s27, 2  ;;  %s6896_s21 = sand.u32 1, %s11086_s24  }
 0x797   : > { %p13585_p7 = scmp.ne.s32.totalorder %s13437_s12, 0  ;;  %s6897_s16 = scalar_lea.sflag [#allocation5], %s6896_s21 }
 0x799   : > { %p10921_p8 = pnand %p10928_p4, %p13585_p7 }
 0x79b   : > { %11081 = dma.done.wait (!%p10921_p8), %s6897_s16, 1024  }
 0x79c   : > { %11083 = vsyncadd (!%p10921_p8), %s6897_s16, 4294966272  ;;  %s13586_s28 = sld [smem:[#allocation12_spill]]  ;;  %p19_p11 = scmp.ge.s32.totalorder %s11175_s30, 4  }
 0x79d   : > { %s13587_s24 = smov %s11090_s25  ;;  %s13588_s25 = smov %s11094_s26 }
 0x79e   : > { %s13590_s27 = smov %s11175_s30  ;;  %21 = sbr.rel (!%p19_p11) target bundleno = 5 (0x5), region = 115 }
 0x7a2   : > { %s13589_s26 = smov %s13586_s28 }
 0x7a5   :  { %6902 = vsyncpa [#allocation4], 1 }
 0x7a6   :  { %6904 = vsyncpa [#allocation4 + $0x1], 1 }
 0x7a7   :  { %6905 = vsyncpa [#allocation7], 1 }
 0x7a8   :  { %6906 = vsyncpa [#allocation5], 1 }
 0x7a9   :  { %6908 = vsyncpa [#allocation5 + $0x1], 1 }

</bundles_post_ra>
